<compile_context>
chip_gen: v5e
topology: v5e:2x2
jax: 0.10.0
libtpu: 0.0.40
codegen_flags: <defaults>
</compile_context>

<pallas_src>
import functools

import jax
import jax.numpy as jnp
from jax.experimental import pallas as pl
from jax.experimental.pallas import tpu as pltpu

# Logical (PyTorch) sizes.
D_IN, L2, L3, L4, D_OUT = 350, 700, 450, 325, 1
# Lane-padded sizes (multiples of 128).
DP0, DP1, DP2, DP3, DPO = 384, 768, 512, 384, 128
BN_EPS = 1e-5


def _round_up(x, m):
    return (x + m - 1) // m * m


# -----------------------------------------------------------------------------
# Stage 1: x -> tanh(L1) -> tanh(L2) -> L3 (pre-BN activations) plus per-tile
#          partial BN statistics (sum, sum of squares over valid rows).
# -----------------------------------------------------------------------------
def _stage1_kernel(n_ref, x_ref, w0_ref, w1_ref, w2_ref, bias_ref,
                   h3_ref, stats_ref, *, batch_tile):
    x = x_ref[...].astype(jnp.bfloat16)                         # (TB, DP0)

    b0 = bias_ref[0:1, :DP1]                                    # (1, DP1) f32
    b1 = bias_ref[1:2, :DP2]                                    # (1, DP2)
    b2 = bias_ref[2:3, :DP3]                                    # (1, DP3)

    h = jnp.dot(x, w0_ref[...], preferred_element_type=jnp.float32) + b0
    h = jnp.tanh(h).astype(jnp.bfloat16)                        # (TB, DP1)
    h = jnp.dot(h, w1_ref[...], preferred_element_type=jnp.float32) + b1
    h = jnp.tanh(h).astype(jnp.bfloat16)                        # (TB, DP2)
    h = jnp.dot(h, w2_ref[...], preferred_element_type=jnp.float32) + b2
    # h: (TB, DP3) f32 pre-BN activations.

    # Mask out batch-padding rows so they do not pollute the BN statistics.
    row0 = pl.program_id(0) * batch_tile
    rows = row0 + jax.lax.broadcasted_iota(jnp.int32, (batch_tile, DP3), 0)
    h = jnp.where(rows < n_ref[0], h, 0.0)

    h3_ref[...] = h
    stats_ref[...] = jnp.concatenate(
        [jnp.sum(h, axis=0, keepdims=True),
         jnp.sum(h * h, axis=0, keepdims=True),
         jnp.zeros((6, DP3), jnp.float32)], axis=0)             # (8, DP3)


# -----------------------------------------------------------------------------
# Stage 2: BN affine (scale/shift folded from global mean/var) -> tanh ->
#          Linear(325->1, padded to 128 lanes) -> sigmoid.
# -----------------------------------------------------------------------------
def _stage2_kernel(h3_ref, small_ref, w3_ref, out_ref):
    scale = small_ref[0:1, :]                                   # gamma*rsqrt(var+eps)
    shift = small_ref[1:2, :]                                   # beta - mean*scale
    b3 = small_ref[2:3, :DPO]                                   # (1, DPO)

    h = jnp.tanh(h3_ref[...] * scale + shift)                   # (TB, DP3)
    logit = jnp.dot(h.astype(jnp.bfloat16), w3_ref[...],
                    preferred_element_type=jnp.float32) + b3    # (TB, DPO)
    out_ref[...] = jax.nn.sigmoid(logit)                        # lane-dense store


def ngram_classifier_forward(x, params, *, batch_tile=512):
    """Forward pass of NgramClassifier (training-mode BatchNorm)."""
    B = x.shape[0]
    tb = min(batch_tile, _round_up(B, 8))
    b_pad = _round_up(B, tb)
    num_tiles = b_pad // tb

    # Pad input to (b_pad, DP0); padded rows / lanes are zero.
    x_pad = jnp.zeros((b_pad, DP0), jnp.float32).at[:B, :D_IN].set(
        x.astype(jnp.float32))
    n_valid = jnp.array([B], jnp.int32)

    cparams = pltpu.CompilerParams(
        dimension_semantics=("parallel",),
        vmem_limit_bytes=32 * 1024 * 1024,
    )

    h3, stats = pl.pallas_call(
        functools.partial(_stage1_kernel, batch_tile=tb),
        grid=(num_tiles,),
        in_specs=[
            pl.BlockSpec(memory_space=pltpu.MemorySpace.SMEM),   # n_valid
            pl.BlockSpec((tb, DP0), lambda i: (i, 0)),           # x tile
            pl.BlockSpec((DP0, DP1), lambda i: (0, 0)),          # w0 (resident)
            pl.BlockSpec((DP1, DP2), lambda i: (0, 0)),          # w1 (resident)
            pl.BlockSpec((DP2, DP3), lambda i: (0, 0)),          # w2 (resident)
            pl.BlockSpec((3, DP1), lambda i: (0, 0)),            # packed biases
        ],
        out_specs=[
            pl.BlockSpec((tb, DP3), lambda i: (i, 0)),           # pre-BN acts
            pl.BlockSpec((8, DP3), lambda i: (i, 0)),            # per-tile stats
        ],
        out_shape=[
            jax.ShapeDtypeStruct((b_pad, DP3), jnp.float32),
            jax.ShapeDtypeStruct((num_tiles * 8, DP3), jnp.float32),
        ],
        compiler_params=cparams,
    )(n_valid, x_pad, params["w0"], params["w1"], params["w2"],
      params["bias_pack"])

    # Tiny global BN reduction (exact whole-batch stats, biased variance).
    stats = stats.reshape(num_tiles, 8, DP3)
    total = jnp.sum(stats[:, 0, :], axis=0)
    total_sq = jnp.sum(stats[:, 1, :], axis=0)
    n = jnp.float32(B)
    mean = total / n
    var = jnp.maximum(total_sq / n - mean * mean, 0.0)
    scale = params["bn_gamma"] * jax.lax.rsqrt(var + BN_EPS)     # (DP3,)
    shift = params["bn_beta"] - mean * scale
    b3_row = jnp.zeros((DP3,), jnp.float32).at[:DPO].set(params["b3"])
    small_pack = jnp.stack([scale, shift, b3_row], axis=0)       # (3, DP3)

    out = pl.pallas_call(
        _stage2_kernel,
        grid=(num_tiles,),
        in_specs=[
            pl.BlockSpec((tb, DP3), lambda i: (i, 0)),           # pre-BN acts
            pl.BlockSpec((3, DP3), lambda i: (0, 0)),            # scale/shift/b3
            pl.BlockSpec((DP3, DPO), lambda i: (0, 0)),          # w3 (resident)
        ],
        out_specs=pl.BlockSpec((tb, DPO), lambda i: (i, 0)),
        out_shape=jax.ShapeDtypeStruct((b_pad, DPO), jnp.float32),
        compiler_params=cparams,
    )(h3, small_pack, params["w3"])

    return out[:B, :D_OUT]


def init_params(key):
    """PyTorch-style init (uniform +/- 1/sqrt(fan_in)).  Weights are stored
    pre-transposed as (in, out), zero-padded to lane multiples, in bfloat16.
    BatchNorm gamma=1, beta=0 (PyTorch default)."""
    def linear(k, fan_in, fan_out, pad_in, pad_out):
        kw, kb = jax.random.split(k)
        bound = 1.0 / (fan_in ** 0.5)
        w = jax.random.uniform(kw, (fan_in, fan_out), jnp.float32, -bound, bound)
        b = jax.random.uniform(kb, (fan_out,), jnp.float32, -bound, bound)
        w_pad = jnp.zeros((pad_in, pad_out), jnp.float32).at[:fan_in, :fan_out].set(w)
        b_pad = jnp.zeros((pad_out,), jnp.float32).at[:fan_out].set(b)
        return w_pad.astype(jnp.bfloat16), b_pad

    k0, k1, k2, k3 = jax.random.split(key, 4)
    w0, b0 = linear(k0, D_IN, L2, DP0, DP1)
    w1, b1 = linear(k1, L2, L3, DP1, DP2)
    w2, b2 = linear(k2, L3, L4, DP2, DP3)
    w3, b3 = linear(k3, L4, D_OUT, DP3, DPO)

    bias_pack = jnp.zeros((3, DP1), jnp.float32)
    bias_pack = bias_pack.at[0, :DP1].set(b0)
    bias_pack = bias_pack.at[1, :DP2].set(b1)
    bias_pack = bias_pack.at[2, :DP3].set(b2)

    gamma = jnp.zeros((DP3,), jnp.float32).at[:L4].set(1.0)
    beta = jnp.zeros((DP3,), jnp.float32)

    return dict(w0=w0, w1=w1, w2=w2, w3=w3, b3=b3,
                bias_pack=bias_pack, bn_gamma=gamma, bn_beta=beta)


def reference_forward(x, params):
    """Pure-JAX reference using the same bf16 weights / activation casts
    (f32 accumulation) for a tight numerical check of the kernels."""
    B = x.shape[0]
    f32 = jnp.float32
    w0 = params["w0"].astype(f32)
    w1 = params["w1"].astype(f32)
    w2 = params["w2"].astype(f32)
    w3 = params["w3"].astype(f32)
    b0 = params["bias_pack"][0, :DP1]
    b1 = params["bias_pack"][1, :DP2]
    b2 = params["bias_pack"][2, :DP3]

    xb = jnp.zeros((B, DP0), f32).at[:, :D_IN].set(x)
    xb = xb.astype(jnp.bfloat16).astype(f32)
    h = jnp.tanh(xb @ w0 + b0).astype(jnp.bfloat16).astype(f32)
    h = jnp.tanh(h @ w1 + b1).astype(jnp.bfloat16).astype(f32)
    h = h @ w2 + b2
    mean = jnp.mean(h, axis=0)
    var = jnp.mean((h - mean) ** 2, axis=0)                     # biased, as PyTorch train()
    hn = (h - mean) * jax.lax.rsqrt(var + BN_EPS)
    hn = hn * params["bn_gamma"] + params["bn_beta"]
    hn = jnp.tanh(hn).astype(jnp.bfloat16).astype(f32)
    y = hn @ w3 + params["b3"]
    return jax.nn.sigmoid(y[:, :D_OUT])


if __name__ == "__main__":
    key = jax.random.PRNGKey(0)
    k_x, k_p = jax.random.split(key)

    B = 8  # small batch for the correctness run
    x = jax.random.normal(k_x, (B, D_IN), jnp.float32)
    params = init_params(k_p)

    y = ngram_classifier_forward(x, params)
    jax.block_until_ready(y)

    assert y.shape == (B, D_OUT) and y.dtype == jnp.float32
    assert bool(jnp.all(jnp.isfinite(y)))

    y_ref = reference_forward(x, params)
    err = float(jnp.max(jnp.abs(y - y_ref)))
    assert err < 5e-2, f"max abs err vs reference: {err}"
    print("KERNEL_OK")
</pallas_src>

<mosaic_0001>
module attributes {stable_mosaic.version = 11 : i64} {
  func.func @_stage1_kernel(%arg0: i32, %arg1: memref<1xi32, #tpu.memory_space<smem>>, %arg2: memref<8x384xf32, #tpu.memory_space<vmem>>, %arg3: memref<384x768xbf16, #tpu.memory_space<vmem>>, %arg4: memref<768x512xbf16, #tpu.memory_space<vmem>>, %arg5: memref<512x384xbf16, #tpu.memory_space<vmem>>, %arg6: memref<3x768xf32, #tpu.memory_space<vmem>>, %arg7: memref<8x384xf32, #tpu.memory_space<vmem>>, %arg8: memref<8x384xf32, #tpu.memory_space<vmem>>) attributes {dimension_semantics = [#tpu.dimension_semantics<parallel>], iteration_bounds = array<i64: 1>, scalar_prefetch = 0 : i64, scratch_operands = 0 : i64, tpu.core_type = #tpu.core_type<tc>, window_params = [{transform_indices = @transform_0, window_bounds = array<i64: 1>}, {transform_indices = @transform_1, window_bounds = array<i64: 8, 384>}, {pipeline_mode = #tpu.pipeline_mode<synchronous>, transform_indices = @transform_2, window_bounds = array<i64: 384, 768>}, {pipeline_mode = #tpu.pipeline_mode<synchronous>, transform_indices = @transform_3, window_bounds = array<i64: 768, 512>}, {pipeline_mode = #tpu.pipeline_mode<synchronous>, transform_indices = @transform_4, window_bounds = array<i64: 512, 384>}, {pipeline_mode = #tpu.pipeline_mode<synchronous>, transform_indices = @transform_5, window_bounds = array<i64: 3, 768>}, {transform_indices = @transform_6, window_bounds = array<i64: 8, 384>}, {transform_indices = @transform_7, window_bounds = array<i64: 8, 384>}]} {
    %c0 = arith.constant 0 : index
    %c0_0 = arith.constant 0 : index
    %0 = vector.load %arg2[%c0, %c0_0] : memref<8x384xf32, #tpu.memory_space<vmem>>, vector<8x384xf32>
    %1 = arith.truncf %0 : vector<8x384xf32> to vector<8x384xbf16>
    %c0_1 = arith.constant 0 : index
    %c0_2 = arith.constant 0 : index
    %2 = vector.load %arg6[%c0_1, %c0_2] : memref<3x768xf32, #tpu.memory_space<vmem>>, vector<1x768xf32>
    %c1 = arith.constant 1 : index
    %c0_3 = arith.constant 0 : index
    %3 = vector.load %arg6[%c1, %c0_3] : memref<3x768xf32, #tpu.memory_space<vmem>>, vector<1x512xf32>
    %c2 = arith.constant 2 : index
    %c0_4 = arith.constant 0 : index
    %4 = vector.load %arg6[%c2, %c0_4] : memref<3x768xf32, #tpu.memory_space<vmem>>, vector<1x384xf32>
    %c0_5 = arith.constant 0 : index
    %c0_6 = arith.constant 0 : index
    %5 = vector.load %arg3[%c0_5, %c0_6] : memref<384x768xbf16, #tpu.memory_space<vmem>>, vector<384x768xbf16>
    %cst = arith.constant dense<0.000000e+00> : vector<8x768xf32>
    %6 = tpu.matmul %1, %5, %cst {dimension_numbers = #tpu.dot_dimension_numbers<[1], [0], [0], [1], [0, 0, 1, 1], [], []>} : vector<8x384xbf16>, vector<384x768xbf16>, vector<8x768xf32> -> vector<8x768xf32>
    %7 = vector.broadcast %2 : vector<1x768xf32> to vector<8x768xf32>
    %8 = arith.addf %6, %7 : vector<8x768xf32>
    %9 = math.tanh %8 : vector<8x768xf32>
    %10 = arith.truncf %9 : vector<8x768xf32> to vector<8x768xbf16>
    %c0_7 = arith.constant 0 : index
    %c0_8 = arith.constant 0 : index
    %11 = vector.load %arg4[%c0_7, %c0_8] : memref<768x512xbf16, #tpu.memory_space<vmem>>, vector<768x512xbf16>
    %cst_9 = arith.constant dense<0.000000e+00> : vector<8x512xf32>
    %12 = tpu.matmul %10, %11, %cst_9 {dimension_numbers = #tpu.dot_dimension_numbers<[1], [0], [0], [1], [0, 0, 1, 1], [], []>} : vector<8x768xbf16>, vector<768x512xbf16>, vector<8x512xf32> -> vector<8x512xf32>
    %13 = vector.broadcast %3 : vector<1x512xf32> to vector<8x512xf32>
    %14 = arith.addf %12, %13 : vector<8x512xf32>
    %15 = math.tanh %14 : vector<8x512xf32>
    %16 = arith.truncf %15 : vector<8x512xf32> to vector<8x512xbf16>
    %c0_10 = arith.constant 0 : index
    %c0_11 = arith.constant 0 : index
    %17 = vector.load %arg5[%c0_10, %c0_11] : memref<512x384xbf16, #tpu.memory_space<vmem>>, vector<512x384xbf16>
    %cst_12 = arith.constant dense<0.000000e+00> : vector<8x384xf32>
    %18 = tpu.matmul %16, %17, %cst_12 {dimension_numbers = #tpu.dot_dimension_numbers<[1], [0], [0], [1], [0, 0, 1, 1], [], []>} : vector<8x512xbf16>, vector<512x384xbf16>, vector<8x384xf32> -> vector<8x384xf32>
    %19 = vector.broadcast %4 : vector<1x384xf32> to vector<8x384xf32>
    %20 = arith.addf %18, %19 : vector<8x384xf32>
    %c8_i32 = arith.constant 8 : i32
    %21 = arith.muli %arg0, %c8_i32 : i32
    %22 = tpu.iota {dimensions = array<i32: 0>} : vector<8x384xi32>
    %23 = vector.broadcast %21 : i32 to vector<8x384xi32>
    %24 = arith.addi %23, %22 : vector<8x384xi32>
    %c0_13 = arith.constant 0 : index
    %25 = memref.load %arg1[%c0_13] : memref<1xi32, #tpu.memory_space<smem>>
    %26 = vector.broadcast %25 : i32 to vector<8x384xi32>
    %27 = arith.cmpi slt, %24, %26 : vector<8x384xi32>
    %cst_14 = arith.constant 0.000000e+00 : f32
    %28 = vector.broadcast %cst_14 : f32 to vector<8x384xf32>
    %29 = arith.select %27, %20, %28 : vector<8x384xi1>, vector<8x384xf32>
    %c0_15 = arith.constant 0 : index
    %c0_16 = arith.constant 0 : index
    %30 = vector.load %arg7[%c0_15, %c0_16] : memref<8x384xf32, #tpu.memory_space<vmem>>, vector<8x384xf32>
    tpu.vector_store %arg7[%c0_15, %c0_16], %29 {strides = array<i32>} : memref<8x384xf32, #tpu.memory_space<vmem>>, vector<8x384xf32>,
    %cst_17 = arith.constant dense<0.000000e+00> : vector<384xf32>
    %31 = vector.multi_reduction <add>, %29, %cst_17 [0] : vector<8x384xf32> to vector<384xf32>
    %32 = vector.shape_cast %31 : vector<384xf32> to vector<1x384xf32>
    %33 = arith.mulf %29, %29 : vector<8x384xf32>
    %cst_18 = arith.constant dense<0.000000e+00> : vector<384xf32>
    %34 = vector.multi_reduction <add>, %33, %cst_18 [0] : vector<8x384xf32> to vector<384xf32>
    %35 = vector.shape_cast %34 : vector<384xf32> to vector<1x384xf32>
    %cst_19 = arith.constant 0.000000e+00 : f32
    %36 = vector.broadcast %cst_19 : f32 to vector<6x384xf32>
    %37 = tpu.concatenate %32, %35, %36 in 0 : vector<1x384xf32>, vector<1x384xf32>, vector<6x384xf32> -> vector<8x384xf32>
    %c0_20 = arith.constant 0 : index
    %c0_21 = arith.constant 0 : index
    %38 = vector.load %arg8[%c0_20, %c0_21] : memref<8x384xf32, #tpu.memory_space<vmem>>, vector<8x384xf32>
    tpu.vector_store %arg8[%c0_20, %c0_21], %37 {strides = array<i32>} : memref<8x384xf32, #tpu.memory_space<vmem>>, vector<8x384xf32>,
    return
  }
  func.func @transform_0(%arg0: i32) -> i32 {
    %c0_i32 = arith.constant 0 : i32
    %c0_i32_0 = arith.constant 0 : i32
    return %c0_i32 : i32
  }
  func.func @transform_1(%arg0: i32) -> (i32, i32) {
    %c0_i32 = arith.constant 0 : i32
    %c0_i32_0 = arith.constant 0 : i32
    return %arg0, %c0_i32 : i32, i32
  }
  func.func @transform_2(%arg0: i32) -> (i32, i32) {
    %c0_i32 = arith.constant 0 : i32
    %c0_i32_0 = arith.constant 0 : i32
    %c0_i32_1 = arith.constant 0 : i32
    return %c0_i32, %c0_i32_0 : i32, i32
  }
  func.func @transform_3(%arg0: i32) -> (i32, i32) {
    %c0_i32 = arith.constant 0 : i32
    %c0_i32_0 = arith.constant 0 : i32
    %c0_i32_1 = arith.constant 0 : i32
    return %c0_i32, %c0_i32_0 : i32, i32
  }
  func.func @transform_4(%arg0: i32) -> (i32, i32) {
    %c0_i32 = arith.constant 0 : i32
    %c0_i32_0 = arith.constant 0 : i32
    %c0_i32_1 = arith.constant 0 : i32
    return %c0_i32, %c0_i32_0 : i32, i32
  }
  func.func @transform_5(%arg0: i32) -> (i32, i32) {
    %c0_i32 = arith.constant 0 : i32
    %c0_i32_0 = arith.constant 0 : i32
    %c0_i32_1 = arith.constant 0 : i32
    return %c0_i32, %c0_i32_0 : i32, i32
  }
  func.func @transform_6(%arg0: i32) -> (i32, i32) {
    %c0_i32 = arith.constant 0 : i32
    %c0_i32_0 = arith.constant 0 : i32
    return %arg0, %c0_i32 : i32, i32
  }
  func.func @transform_7(%arg0: i32) -> (i32, i32) {
    %c0_i32 = arith.constant 0 : i32
    %c0_i32_0 = arith.constant 0 : i32
    return %arg0, %c0_i32 : i32, i32
  }
}

</mosaic_0001>

<bundles_post_ra>
// kernel: tpu_custom_call.1
= control target key start
LH: loop header
LB: loop body
LE: loop exit
PB: predicated region body
PF: predicated region fallthrough
CT: control target
= control target key end

     0   :  { %14 = vsyncpa [#allocation4], 0  ;;  %s6224_s0 = inlined_call_operand.<no memory space> [shape: s32[1], index: 0, kind: input, shape index: {}]   ;;  %s6225_s1 = inlined_call_operand.hbm [shape: f32[8,384], index: 1, kind: input, shape index: {}]   ;;  %s6226_s2 = inlined_call_operand.hbm [shape: bf16[384,768], index: 2, kind: input, shape index: {}]   ;;  %s6227_s3 = inlined_call_operand.hbm [shape: bf16[768,512], index: 3, kind: input, shape index: {}]   ;;  %s6228_s4 = inlined_call_operand.hbm [shape: bf16[512,384], index: 4, kind: input, shape index: {}]   ;;  %s6229_s5 = inlined_call_operand.hbm [shape: f32[3,768], index: 5, kind: input, shape index: {}]   ;;  %s6230_s6 = inlined_call_operand.hbm [shape: f32[8,384], index: 6, kind: output, shape index: {0}]   ;;  %s6231_s7 = inlined_call_operand.hbm [shape: f32[8,384], index: 7, kind: output, shape index: {1}]  }
   0x1   :  { %15 = vsyncpa [#allocation7], 0 }
   0x2   :  { %16 = vsyncpa [#allocation10], 0 }
   0x3   :  { %17 = vsyncpa [#allocation5], 0  ;;  %s36_s26 = sshll.u32 %s6226_s2, 4  ;;  %s37_s26 = int_to_ptr.hbm [resolvable:$true] %s36_s26 }
   0x4   :  { %18 = vsyncpa [#allocation14], 0  ;;  %s5991_s27 = smov [#allocation6]   ;;  %s62_s8 = sshll.u32 %s6228_s4, 4  ;;  %s63_s8 = int_to_ptr.hbm [resolvable:$true] %s62_s8 }
   0x5   :  { %s38_s28 = sshll.u32 %s5991_s27, 4  ;;  %s5992_s9 = smov 384   ;;  %s39_s28 = int_to_ptr.vmem [resolvable:$true] %s38_s28 }
   0x6   :  { %s5993_s10 = smov 24   ;;  %s5994_s11 = smov [#allocation9]  }
   0x7   :  { %44 = dma.hbm_to_vmem [thread:$0]  %s37_s26, 18432, %s39_s28, [#allocation7], %s5992_s9, %s5992_s9, %s5993_s10  }
   0x8   :  { %s64_s12 = sshll.u32 %s5994_s11, 4  ;;  %s5995_s13 = smov 192   ;;  %s65_s12 = int_to_ptr.vmem [resolvable:$true] %s64_s12 }
   0x9   :  { %s5996_s14 = smov 12   ;;  %s26_s16 = sshll.u32 %s6225_s1, 4  ;;  %s27_s16 = int_to_ptr.hbm [resolvable:$true] %s26_s16 }
   0xa   :  { %70 = dma.hbm_to_vmem [thread:$0]  %s63_s8, 12288, %s65_s12, [#allocation10], %s5995_s13, %s5995_s13, %s5996_s14  }
   0xb   :  { %s5997_s17 = smov [#allocation3]   ;;  %s49_s20 = sshll.u32 %s6227_s3, 4  ;;  %s50_s20 = int_to_ptr.hbm [resolvable:$true] %s49_s20 }
   0xc   :  { %s28_s18 = sshll.u32 %s5997_s17, 4  ;;  %s5998_s21 = smov [#allocation8]   ;;  %s29_s18 = int_to_ptr.vmem [resolvable:$true] %s28_s18 }
   0xd   :  { %31 = dma.hbm_to_vmem [thread:$0]  %s27_s16, 384, %s29_s18, [#allocation4]  }
   0xe   :  { %s51_s22 = sshll.u32 %s5998_s21, 4  ;;  %s5999_s23 = smov 256   ;;  %s52_s22 = int_to_ptr.vmem [resolvable:$true] %s51_s22 }
   0xf   :  { %s6000_s24 = smov 16   ;;  %s76_s1 = sshll.u32 %s6229_s5, 4  ;;  %s77_s1 = int_to_ptr.hbm [resolvable:$true] %s76_s1 }
  0x10   :  { %57 = dma.hbm_to_vmem [thread:$0]  %s50_s20, 24576, %s52_s22, [#allocation7], %s5999_s23, %s5999_s23, %s6000_s24  }
  0x11   :  { %s6001_s27 = smov [#allocation11]  }
  0x12   :  { %s78_s28 = sshll.u32 %s6001_s27, 4  ;;  %s79_s28 = int_to_ptr.vmem [resolvable:$true] %s78_s28 }
  0x13   :  { %81 = dma.hbm_to_vmem [thread:$0]  %s77_s1, 384, %s79_s28, [#allocation10]  }
  0x14   :  { %5981 = dma.done.wait [#allocation4], 384  }
  0x15   :  { %5982 = vsyncadd [#allocation4], 4294966912 }
  0x16   :  { %5983 = dma.done.wait [#allocation7], 43008  }
  0x17   :  { %5984 = vsyncadd [#allocation7], 4294924288 }
  0x18   :  { %5985 = dma.done.wait [#allocation10], 12672  }
  0x19   :  { %5986 = vsyncadd [#allocation10], 4294954624  ;;  %v3789_v0 = vld [vmem:[#allocation6 + $0x150] sm:$0xf]  ;;  %v5392_v1 = vld [vmem:[#allocation6 + $0x164] sm:$0xf0] }
  0x1a   :  { %v3981_v2 = vld [vmem:[#allocation6 + $0x2d0] sm:$0xf]  ;;  %v3790_v3 = vor.u32 %v5392_v1, %v3789_v0  ;;  %v5440_v4 = vld [vmem:[#allocation6 + $0x2e4] sm:$0xf0]  ;;  %v5389_v9 = vld [vmem:[#allocation6 + $0x154] sm:$0xf] }
  0x1b   :  { %v4173_v5 = vld [vmem:[#allocation6 + $0x450] sm:$0xf]  ;;  %v5488_v6 = vld [vmem:[#allocation6 + $0x464] sm:$0xf0]  ;;  %v3982_v7 = vor.u32 %v5440_v4, %v3981_v2  ;;  %v3791_v10 = vld [vmem:[#allocation6 + $0x168] sm:$0xf0] }
  0x1c   :  { %v4174_v8 = vor.u32 %v5488_v6, %v4173_v5  ;;  %v3765_v11 = vld [vmem:[#allocation6 + $0x120] sm:$0xf]  ;;  %990 = vmatpush.bf16.msra.mxu0 %v3790_v3  ;;  %v3794_v12 = vor.u32 %v5389_v9, %v3791_v10  ;;  %v5386_v13 = vld [vmem:[#allocation6 + $0x134] sm:$0xf0]  ;;  %v5383_v20 = vld [vmem:[#allocation6 + $0x124] sm:$0xf] }
  0x1d   :  { %v3957_v14 = vld [vmem:[#allocation6 + $0x2a0] sm:$0xf]  ;;  %v5434_v15 = vld [vmem:[#allocation6 + $0x2b4] sm:$0xf0]  ;;  %1003 = vmatpush.bf16.msra.mxu1 %v3982_v7  ;;  %v3766_v16 = vor.u32 %v5386_v13, %v3765_v11  ;;  %v3767_v22 = vld [vmem:[#allocation6 + $0x138] sm:$0xf0] }
  0x1e   :  { %1016 = vmatpush.bf16.msra.mxu2 %v4174_v8  ;;  %v3958_v17 = vor.u32 %v5434_v15, %v3957_v14  ;;  %v4149_v18 = vld [vmem:[#allocation6 + $0x420] sm:$0xf]  ;;  %v5482_v19 = vld [vmem:[#allocation6 + $0x434] sm:$0xf0]  ;;  %1029 = vmatpush.bf16.msra.mxu3 %v3794_v12  ;;  %v3741_v23 = vld [vmem:[#allocation6 + $0xf0] sm:$0xf]  ;;  %v3770_v25 = vor.u32 %v5383_v20, %v3767_v22 }
  0x1f   :  { %v4150_v21 = vor.u32 %v5482_v19, %v4149_v18  ;;  %v5380_v24 = vld [vmem:[#allocation6 + $0x104] sm:$0xf0]  ;;  %v3933_v26 = vld [vmem:[#allocation6 + $0x270] sm:$0xf]  ;;  %v5377_v31 = vld [vmem:[#allocation6 + $0xf4] sm:$0xf] }
  0x20   :  { %v5428_v27 = vld [vmem:[#allocation6 + $0x284] sm:$0xf0]  ;;  %v4125_v28 = vld [vmem:[#allocation6 + $0x3f0] sm:$0xf]  ;;  %991 = vmatpush.bf16.msra.mxu0 %v3766_v16  ;;  %v3742_v29 = vor.u32 %v5380_v24, %v3741_v23  ;;  %v3743_v32 = vld [vmem:[#allocation6 + $0x108] sm:$0xf0] }
  0x21   :  { %v5476_v30 = vld [vmem:[#allocation6 + $0x404] sm:$0xf0]  ;;  %1004 = vmatpush.bf16.msra.mxu1 %v3958_v17  ;;  %v3934_v33 = vor.u32 %v5428_v27, %v3933_v26  ;;  %v3717_v35 = vld [vmem:[#allocation6 + $0xc0] sm:$0xf]  ;;  %v5374_v36 = vld [vmem:[#allocation6 + $0xd4] sm:$0xf0]  ;;  %v3746_v38 = vor.u32 %v5377_v31, %v3743_v32 }
  0x22   :  { %1017 = vmatpush.bf16.msra.mxu2 %v4150_v21  ;;  %v4126_v34 = vor.u32 %v5476_v30, %v4125_v28  ;;  %v3909_v37 = vld [vmem:[#allocation6 + $0x240] sm:$0xf]  ;;  %1030 = vmatpush.bf16.msra.mxu3 %v3770_v25  ;;  %v5422_v39 = vld [vmem:[#allocation6 + $0x254] sm:$0xf0]  ;;  %v5371_v42 = vld [vmem:[#allocation6 + $0xc4] sm:$0xf]  ;;  %v3718_v44 = vor.u32 %v5374_v36, %v3717_v35 }
  0x23   :  { %v4101_v40 = vld [vmem:[#allocation6 + $0x3c0] sm:$0xf]  ;;  %v5470_v41 = vld [vmem:[#allocation6 + $0x3d4] sm:$0xf0]  ;;  %v3719_v43 = vld [vmem:[#allocation6 + $0xd8] sm:$0xf0]  ;;  %v3910_v45 = vor.u32 %v5422_v39, %v3909_v37 }
  0x24   :  { %992 = vmatpush.bf16.msra.mxu0 %v3742_v29  ;;  %v4102_v46 = vor.u32 %v5470_v41, %v4101_v40  ;;  %v3693_v47 = vld [vmem:[#allocation6 + $0x90] sm:$0xf]  ;;  %v5368_v48 = vld [vmem:[#allocation6 + $0xa4] sm:$0xf0]  ;;  %v3722_v50 = vor.u32 %v5371_v42, %v3719_v43  ;;  %v5365_v54 = vld [vmem:[#allocation6 + $0x94] sm:$0xf] }
  0x25   :  { %1005 = vmatpush.bf16.msra.mxu1 %v3934_v33  ;;  %v3885_v49 = vld [vmem:[#allocation6 + $0x210] sm:$0xf]  ;;  %v5416_v51 = vld [vmem:[#allocation6 + $0x224] sm:$0xf0]  ;;  %v3695_v55 = vld [vmem:[#allocation6 + $0xa8] sm:$0xf0]  ;;  %v3694_v56 = vor.u32 %v5368_v48, %v3693_v47 }
  0x26   :  { %1018 = vmatpush.bf16.msra.mxu2 %v4126_v34  ;;  %1031 = vmatpush.bf16.msra.mxu3 %v3746_v38  ;;  %v4077_v52 = vld [vmem:[#allocation6 + $0x390] sm:$0xf]  ;;  %v5464_v53 = vld [vmem:[#allocation6 + $0x3a4] sm:$0xf0]  ;;  %v3886_v57 = vor.u32 %v5416_v51, %v3885_v49  ;;  %v3669_v59 = vld [vmem:[#allocation6 + $0x60] sm:$0xf]  ;;  %v3698_v62 = vor.u32 %v5365_v54, %v3695_v55 }
  0x27   :  { %v4078_v58 = vor.u32 %v5464_v53, %v4077_v52  ;;  %v5362_v60 = vld [vmem:[#allocation6 + $0x74] sm:$0xf0]  ;;  %v3861_v61 = vld [vmem:[#allocation6 + $0x1e0] sm:$0xf]  ;;  %v5359_v2 = vld [vmem:[#allocation6 + $0x64] sm:$0xf] }
  0x28   :  { %993 = vmatpush.bf16.msra.mxu0 %v3718_v44  ;;  %v5410_v63 = vld [vmem:[#allocation6 + $0x1f4] sm:$0xf0]  ;;  %v4053_v0 = vld [vmem:[#allocation6 + $0x360] sm:$0xf]  ;;  %v3671_v3 = vld [vmem:[#allocation6 + $0x78] sm:$0xf0]  ;;  %v3670_v4 = vor.u32 %v5362_v60, %v3669_v59 }
  0x29   :  { %1006 = vmatpush.bf16.msra.mxu1 %v3910_v45  ;;  %v5458_v1 = vld [vmem:[#allocation6 + $0x374] sm:$0xf0]  ;;  %v3862_v5 = vor.u32 %v5410_v63, %v3861_v61  ;;  %v3645_v7 = vld [vmem:[#allocation6 + $0x30] sm:$0xf]  ;;  %v5356_v8 = vld [vmem:[#allocation6 + $0x44] sm:$0xf0]  ;;  %v3674_v10 = vor.u32 %v5359_v2, %v3671_v3 }
  0x2a   :  { %1019 = vmatpush.bf16.msra.mxu2 %v4102_v46  ;;  %1032 = vmatpush.bf16.msra.mxu3 %v3722_v50  ;;  %v4054_v6 = vor.u32 %v5458_v1, %v4053_v0  ;;  %v3837_v9 = vld [vmem:[#allocation6 + $0x1b0] sm:$0xf]  ;;  %v5404_v11 = vld [vmem:[#allocation6 + $0x1c4] sm:$0xf0]  ;;  %v5353_v14 = vld [vmem:[#allocation6 + $0x34] sm:$0xf]  ;;  %v3646_v16 = vor.u32 %v5356_v8, %v3645_v7 }
  0x2b   :  { %v4029_v12 = vld [vmem:[#allocation6 + $0x330] sm:$0xf]  ;;  %v5452_v13 = vld [vmem:[#allocation6 + $0x344] sm:$0xf0]  ;;  %v3647_v15 = vld [vmem:[#allocation6 + $0x48] sm:$0xf0]  ;;  %v3838_v19 = vor.u32 %v5404_v11, %v3837_v9 }
  0x2c   :  { %994 = vmatpush.bf16.msra.mxu0 %v3694_v56  ;;  %v3621_v17 = vld [vmem:[#allocation6] sm:$0xf]  ;;  %v5350_v18 = vld [vmem:[#allocation6 + $0x14] sm:$0xf0]  ;;  %v4030_v20 = vor.u32 %v5452_v13, %v4029_v12  ;;  %v3650_v24 = vor.u32 %v5353_v14, %v3647_v15  ;;  %v5437_v26 = vld [vmem:[#allocation6 + $0x2d4] sm:$0xf] }
  0x2d   :  { %1007 = vmatpush.bf16.msra.mxu1 %v3886_v57  ;;  %v3813_v21 = vld [vmem:[#allocation6 + $0x180] sm:$0xf]  ;;  %v5398_v22 = vld [vmem:[#allocation6 + $0x194] sm:$0xf0]  ;;  %v3983_v27 = vld [vmem:[#allocation6 + $0x2e8] sm:$0xf0]  ;;  %v3622_v31 = vor.u32 %v5350_v18, %v3621_v17 }
  0x2e   :  { %1020 = vmatpush.bf16.msra.mxu2 %v4078_v58  ;;  %1033 = vmatpush.bf16.msra.mxu3 %v3698_v62  ;;  %v4005_v23 = vld [vmem:[#allocation6 + $0x300] sm:$0xf]  ;;  %v5446_v25 = vld [vmem:[#allocation6 + $0x314] sm:$0xf0]  ;;  %v5485_v28 = vld [vmem:[#allocation6 + $0x454] sm:$0xf]  ;;  %v3814_v35 = vor.u32 %v5398_v22, %v3813_v21  ;;  %v3986_v39 = vor.u32 %v5437_v26, %v3983_v27 }
  0x2f   :  { %v4175_v29 = vld [vmem:[#allocation6 + $0x468] sm:$0xf0]  ;;  %v3797_v30 = vld [vmem:[#allocation6 + $0x158] sm:$0xf]  ;;  %v5393_v32 = vld [vmem:[#allocation6 + $0x16c] sm:$0xf0]  ;;  %v4006_v36 = vor.u32 %v5446_v25, %v4005_v23 }
  0x30   :  { %995 = vmatpush.bf16.msra.mxu0 %v3670_v4  ;;  %v5347_v33 = vld [vmem:[#allocation6 + $0x4] sm:$0xf]  ;;  %v3623_v34 = vld [vmem:[#allocation6 + $0x18] sm:$0xf0]  ;;  %v3989_v37 = vld [vmem:[#allocation6 + $0x2d8] sm:$0xf]  ;;  %v4178_v40 = vor.u32 %v5485_v28, %v4175_v29  ;;  %v3798_v42 = vor.u32 %v5393_v32, %v3797_v30 }
  0x31   :  { %1008 = vmatpush.bf16.msra.mxu1 %v3862_v5  ;;  %v5441_v38 = vld [vmem:[#allocation6 + $0x2ec] sm:$0xf0]  ;;  %v5431_v41 = vld [vmem:[#allocation6 + $0x2a4] sm:$0xf]  ;;  %v3626_v43 = vor.u32 %v5347_v33, %v3623_v34  ;;  %v3959_v44 = vld [vmem:[#allocation6 + $0x2b8] sm:$0xf0] }
  0x32   :  { %1021 = vmatpush.bf16.msra.mxu2 %v4054_v6  ;;  %1034 = vmatpush.bf16.msra.mxu3 %v3674_v10  ;;  %v5479_v45 = vld [vmem:[#allocation6 + $0x424] sm:$0xf]  ;;  %v4151_v46 = vld [vmem:[#allocation6 + $0x438] sm:$0xf0]  ;;  %v3990_v47 = vor.u32 %v5441_v38, %v3989_v37  ;;  %v3773_v48 = vld [vmem:[#allocation6 + $0x128] sm:$0xf]  ;;  %v3962_v52 = vor.u32 %v5431_v41, %v3959_v44 }
  0x33   :  { %v5387_v49 = vld [vmem:[#allocation6 + $0x13c] sm:$0xf0]  ;;  %v3965_v50 = vld [vmem:[#allocation6 + $0x2a8] sm:$0xf]  ;;  %v4154_v53 = vor.u32 %v5479_v45, %v4151_v46  ;;  %v5425_v54 = vld [vmem:[#allocation6 + $0x274] sm:$0xf] }
  0x34   :  { %996 = vmatpush.bf16.msra.mxu0 %v3646_v16  ;;  %v5435_v51 = vld [vmem:[#allocation6 + $0x2bc] sm:$0xf0]  ;;  %v3935_v55 = vld [vmem:[#allocation6 + $0x288] sm:$0xf0]  ;;  %v5473_v56 = vld [vmem:[#allocation6 + $0x3f4] sm:$0xf]  ;;  %v3774_v57 = vor.u32 %v5387_v49, %v3773_v48 }
  0x35   :  { %1009 = vmatpush.bf16.msra.mxu1 %v3838_v19  ;;  %v4127_v58 = vld [vmem:[#allocation6 + $0x408] sm:$0xf0]  ;;  %v3749_v59 = vld [vmem:[#allocation6 + $0xf8] sm:$0xf]  ;;  %v3966_v61 = vor.u32 %v5435_v51, %v3965_v50  ;;  %v5381_v62 = vld [vmem:[#allocation6 + $0x10c] sm:$0xf0]  ;;  %v3938_v6 = vor.u32 %v5425_v54, %v3935_v55 }
  0x36   :  { %1022 = vmatpush.bf16.msra.mxu2 %v4030_v20  ;;  %1035 = vmatpush.bf16.msra.mxu3 %v3650_v24  ;;  %v102_v60 = vld [vmem:[#allocation3] sm:$0xff]  ;;  %v103_v0 = vld [vmem:[#allocation3 + $0x8] sm:$0xff]  ;;  %v104_v1 = vld [vmem:[#allocation3 + $0x10] sm:$0xff]  ;;  %v4130_v7 = vor.u32 %v5473_v56, %v4127_v58  ;;  %v3750_v9 = vor.u32 %v5381_v62, %v3749_v59  ;;  %vm3573_vm1 = vcmask 1040384   ;;  %vm3577_vm2 = vcmask 1041408   ;;  %s3591_s9 = sshll.u32 %s6230_s6, 4  ;;  %s3592_s9 = int_to_ptr.hbm [resolvable:$true] %s3591_s9 }
  0x37   :  { %v6059_v63 = vpack.c.bf16 %v102_v60, %v102_v60  ;;  %v3941_v2 = vld [vmem:[#allocation6 + $0x278] sm:$0xf]  ;;  %v5429_v3 = vld [vmem:[#allocation6 + $0x28c] sm:$0xf0]  ;;  %v6061_v4 = vpack.c.bf16 %v103_v0, %v103_v0  ;;  %v6063_v5 = vpack.c.bf16 %v104_v1, %v104_v1  ;;  %v5419_v8 = vld [vmem:[#allocation6 + $0x244] sm:$0xf] }
  0x38   :  { %997 = vmatpush.bf16.msra.mxu0 %v3622_v31  ;;  %v3911_v10 = vld [vmem:[#allocation6 + $0x258] sm:$0xf0]  ;;  %v5467_v11 = vld [vmem:[#allocation6 + $0x3c4] sm:$0xf]  ;;  %v3942_v13 = vor.u32 %v5429_v3, %v3941_v2  ;;  %v3725_v14 = vld [vmem:[#allocation6 + $0xc8] sm:$0xf] }
  0x39   :  { %1010 = vmatpush.bf16.msra.mxu1 %v3814_v35  ;;  %v4103_v12 = vld [vmem:[#allocation6 + $0x3d8] sm:$0xf0]  ;;  %v5375_v15 = vld [vmem:[#allocation6 + $0xdc] sm:$0xf0]  ;;  %v3917_v16 = vld [vmem:[#allocation6 + $0x248] sm:$0xf]  ;;  %v3914_v18 = vor.u32 %v5419_v8, %v3911_v10 }
  0x3a   :  { %1023 = vmatpush.bf16.msra.mxu2 %v4006_v36  ;;  %1036 = vmatpush.bf16.msra.mxu3 %v3626_v43  ;;  %v5423_v17 = vld [vmem:[#allocation6 + $0x25c] sm:$0xf0]  ;;  %v4106_v19 = vor.u32 %v5467_v11, %v4103_v12  ;;  %v5413_v20 = vld [vmem:[#allocation6 + $0x214] sm:$0xf]  ;;  %v3726_v21 = vor.u32 %v5375_v15, %v3725_v14  ;;  %v3887_v22 = vld [vmem:[#allocation6 + $0x228] sm:$0xf0] }
  0x3b   :  { %998 = vmatmul.bf16.vlgmr.msra.gmra.mxu0 %v6059_v63  ;;  %v5461_v23 = vld [vmem:[#allocation6 + $0x394] sm:$0xf]  ;;  %v4079_v24 = vld [vmem:[#allocation6 + $0x3a8] sm:$0xf0]  ;;  %v3918_v25 = vor.u32 %v5423_v17, %v3917_v16  ;;  %v3701_v26 = vld [vmem:[#allocation6 + $0x98] sm:$0xf]  ;;  %v3890_v30 = vor.u32 %v5413_v20, %v3887_v22 }
  0x3c   :  { %1042 = vmatpush.bf16.msrb.mxu0 %v3986_v39  ;;  %1011 = vmatmul.bf16.vlgmr.msra.gmra.mxu1 %v6061_v4  ;;  %v5369_v27 = vld [vmem:[#allocation6 + $0xac] sm:$0xf0]  ;;  %v3893_v28 = vld [vmem:[#allocation6 + $0x218] sm:$0xf]  ;;  %v4082_v31 = vor.u32 %v5461_v23, %v4079_v24  ;;  %v5407_v32 = vld [vmem:[#allocation6 + $0x1e4] sm:$0xf] }
  0x3d   :  { %1055 = vmatpush.bf16.msrb.mxu1 %v4178_v40  ;;  %1024 = vmatmul.bf16.vlgmr.msra.gmra.mxu2 %v6063_v5  ;;  %v5417_v29 = vld [vmem:[#allocation6 + $0x22c] sm:$0xf0]  ;;  %v3702_v33 = vor.u32 %v5369_v27, %v3701_v26  ;;  %v3863_v34 = vld [vmem:[#allocation6 + $0x1f8] sm:$0xf0]  ;;  %v5455_v35 = vld [vmem:[#allocation6 + $0x364] sm:$0xf] }
  0x3e   :  { %1068 = vmatpush.bf16.msrb.mxu2 %v3798_v42  ;;  %1081 = vmatpush.bf16.msrb.mxu3 %v3990_v47  ;;  %v4055_v36 = vld [vmem:[#allocation6 + $0x378] sm:$0xf0]  ;;  %v3894_v37 = vor.u32 %v5417_v29, %v3893_v28  ;;  %v3677_v38 = vld [vmem:[#allocation6 + $0x68] sm:$0xf]  ;;  %v5363_v39 = vld [vmem:[#allocation6 + $0x7c] sm:$0xf0]  ;;  %v3866_v42 = vor.u32 %v5407_v32, %v3863_v34 }
  0x3f   :  { %1037 = vmatmul.bf16.vlgmr.msra.gmra.mxu3 %v6059_v63  ;;  %v3869_v40 = vld [vmem:[#allocation6 + $0x1e8] sm:$0xf]  ;;  %v5411_v41 = vld [vmem:[#allocation6 + $0x1fc] sm:$0xf0]  ;;  %v4058_v43 = vor.u32 %v5455_v35, %v4055_v36  ;;  %v5401_v44 = vld [vmem:[#allocation6 + $0x1b4] sm:$0xf]  ;;  %v3678_v45 = vor.u32 %v5363_v39, %v3677_v38 }
  0x40   :  { %1043 = vmatpush.bf16.msrb.mxu0 %v3962_v52  ;;  %v3839_v46 = vld [vmem:[#allocation6 + $0x1c8] sm:$0xf0]  ;;  %v5449_v47 = vld [vmem:[#allocation6 + $0x334] sm:$0xf]  ;;  %v3870_v49 = vor.u32 %v5411_v41, %v3869_v40  ;;  %v3653_v50 = vld [vmem:[#allocation6 + $0x38] sm:$0xf] }
  0x41   :  { %1056 = vmatpush.bf16.msrb.mxu1 %v4154_v53  ;;  %v4031_v48 = vld [vmem:[#allocation6 + $0x348] sm:$0xf0]  ;;  %v5357_v51 = vld [vmem:[#allocation6 + $0x4c] sm:$0xf0]  ;;  %v3845_v52 = vld [vmem:[#allocation6 + $0x1b8] sm:$0xf]  ;;  %v3842_v54 = vor.u32 %v5401_v44, %v3839_v46 }
  0x42   :  { %1069 = vmatpush.bf16.msrb.mxu2 %v3774_v57  ;;  %1082 = vmatpush.bf16.msrb.mxu3 %v3966_v61  ;;  %v5405_v53 = vld [vmem:[#allocation6 + $0x1cc] sm:$0xf0]  ;;  %v4034_v55 = vor.u32 %v5449_v47, %v4031_v48  ;;  %v5395_v56 = vld [vmem:[#allocation6 + $0x184] sm:$0xf]  ;;  %v3815_v57 = vld [vmem:[#allocation6 + $0x198] sm:$0xf0]  ;;  %v3654_v59 = vor.u32 %v5357_v51, %v3653_v50 }
  0x43   :  { %v5443_v58 = vld [vmem:[#allocation6 + $0x304] sm:$0xf]  ;;  %v4007_v60 = vld [vmem:[#allocation6 + $0x318] sm:$0xf0]  ;;  %v3629_v61 = vld [vmem:[#allocation6 + $0x8] sm:$0xf]  ;;  %v3846_v0 = vor.u32 %v5405_v53, %v3845_v52 }
  0x44   :  { %1044 = vmatpush.bf16.msrb.mxu0 %v3938_v6  ;;  %v5351_v62 = vld [vmem:[#allocation6 + $0x1c] sm:$0xf0]  ;;  %v4181_v1 = vld [vmem:[#allocation6 + $0x458] sm:$0xf]  ;;  %v5489_v2 = vld [vmem:[#allocation6 + $0x46c] sm:$0xf0]  ;;  %v4010_v10 = vor.u32 %v5443_v58, %v4007_v60 }
  0x45   :  { %1057 = vmatpush.bf16.msrb.mxu1 %v4130_v7  ;;  %v5390_v3 = vld [vmem:[#allocation6 + $0x15c] sm:$0xf]  ;;  %v3799_v6 = vld [vmem:[#allocation6 + $0x170] sm:$0xf0]  ;;  %v3821_v11 = vld [vmem:[#allocation6 + $0x188] sm:$0xf]  ;;  %v4182_v14 = vor.u32 %v5489_v2, %v4181_v1 }
  0x46   :  { %1070 = vmatpush.bf16.msrb.mxu2 %v3750_v9  ;;  %1083 = vmatpush.bf16.msrb.mxu3 %v3942_v13  ;;  %v5438_v7 = vld [vmem:[#allocation6 + $0x2dc] sm:$0xf]  ;;  %v3991_v8 = vld [vmem:[#allocation6 + $0x2f0] sm:$0xf0]  ;;  %v3818_v9 = vor.u32 %v5395_v56, %v3815_v57  ;;  %v5399_v12 = vld [vmem:[#allocation6 + $0x19c] sm:$0xf0]  ;;  %v3630_v13 = vor.u32 %v5351_v62, %v3629_v61  ;;  %v3802_v17 = vor.u32 %v5390_v3, %v3799_v6 }
  0x47   :  { %v5486_v15 = vld [vmem:[#allocation6 + $0x45c] sm:$0xf]  ;;  %v4183_v16 = vld [vmem:[#allocation6 + $0x470] sm:$0xf0]  ;;  %v5483_v20 = vld [vmem:[#allocation6 + $0x43c] sm:$0xf0]  ;;  %v3822_v22 = vor.u32 %v5399_v12, %v3821_v11 }
  0x48   :  { %1045 = vmatpush.bf16.msrb.mxu0 %v3914_v18  ;;  %v3994_v18 = vor.u32 %v5438_v7, %v3991_v8  ;;  %v3775_v23 = vld [vmem:[#allocation6 + $0x140] sm:$0xf0]  ;;  %v5432_v24 = vld [vmem:[#allocation6 + $0x2ac] sm:$0xf]  ;;  %v4186_v26 = vor.u32 %v5486_v15, %v4183_v16  ;;  %v4133_v32 = vld [vmem:[#allocation6 + $0x3f8] sm:$0xf] }
  0x49   :  { %1058 = vmatpush.bf16.msrb.mxu1 %v4106_v19  ;;  %v4157_v19 = vld [vmem:[#allocation6 + $0x428] sm:$0xf]  ;;  %v5480_v28 = vld [vmem:[#allocation6 + $0x42c] sm:$0xf]  ;;  %v4159_v29 = vld [vmem:[#allocation6 + $0x440] sm:$0xf0] }
  0x4a   :  { %1071 = vmatpush.bf16.msrb.mxu2 %v3726_v21  ;;  %1084 = vmatpush.bf16.msrb.mxu3 %v3918_v25  ;;  %v5384_v21 = vld [vmem:[#allocation6 + $0x12c] sm:$0xf]  ;;  %v3967_v25 = vld [vmem:[#allocation6 + $0x2c0] sm:$0xf0]  ;;  %v4158_v27 = vor.u32 %v5483_v20, %v4157_v19  ;;  %v5378_v34 = vld [vmem:[#allocation6 + $0xfc] sm:$0xf]  ;;  %v4162_v38 = vor.u32 %v5480_v28, %v4159_v29 }
  0x4b   :  { %v3751_v35 = vld [vmem:[#allocation6 + $0x110] sm:$0xf0]  ;;  %v5426_v36 = vld [vmem:[#allocation6 + $0x27c] sm:$0xf]  ;;  %v4109_v44 = vld [vmem:[#allocation6 + $0x3c8] sm:$0xf] }
  0x4c   :  { %1046 = vmatpush.bf16.msrb.mxu0 %v3890_v30  ;;  %v3778_v30 = vor.u32 %v5384_v21, %v3775_v23  ;;  %v5474_v40 = vld [vmem:[#allocation6 + $0x3fc] sm:$0xf]  ;;  %v4135_v41 = vld [vmem:[#allocation6 + $0x410] sm:$0xf0]  ;;  %v5372_v46 = vld [vmem:[#allocation6 + $0xcc] sm:$0xf] }
  0x4d   :  { %1059 = vmatpush.bf16.msrb.mxu1 %v4082_v31  ;;  %v3970_v31 = vor.u32 %v5432_v24, %v3967_v25  ;;  %v3727_v47 = vld [vmem:[#allocation6 + $0xe0] sm:$0xf0]  ;;  %v5420_v48 = vld [vmem:[#allocation6 + $0x24c] sm:$0xf]  ;;  %v4138_v50 = vor.u32 %v5474_v40, %v4135_v41  ;;  %v4085_v56 = vld [vmem:[#allocation6 + $0x398] sm:$0xf] }
  0x4e   :  { %1072 = vmatpush.bf16.msrb.mxu2 %v3702_v33  ;;  %1085 = vmatpush.bf16.msrb.mxu3 %v3894_v37  ;;  %v5477_v33 = vld [vmem:[#allocation6 + $0x40c] sm:$0xf0]  ;;  %v3943_v37 = vld [vmem:[#allocation6 + $0x290] sm:$0xf0]  ;;  %v5468_v52 = vld [vmem:[#allocation6 + $0x3cc] sm:$0xf] }
  0x4f   :  { %v4134_v39 = vor.u32 %v5477_v33, %v4133_v32  ;;  %v4111_v53 = vld [vmem:[#allocation6 + $0x3e0] sm:$0xf0]  ;;  %v5465_v57 = vld [vmem:[#allocation6 + $0x3ac] sm:$0xf0]  ;;  %v5366_v58 = vld [vmem:[#allocation6 + $0x9c] sm:$0xf] }
  0x50   :  { %1047 = vmatpush.bf16.msrb.mxu0 %v3866_v42  ;;  %v3754_v42 = vor.u32 %v5378_v34, %v3751_v35  ;;  %v5414_v60 = vld [vmem:[#allocation6 + $0x21c] sm:$0xf]  ;;  %v3895_v61 = vld [vmem:[#allocation6 + $0x230] sm:$0xf0]  ;;  %v4114_v62 = vor.u32 %v5468_v52, %v4111_v53  ;;  %v4061_v7 = vld [vmem:[#allocation6 + $0x368] sm:$0xf] }
  0x51   :  { %1060 = vmatpush.bf16.msrb.mxu1 %v4058_v43  ;;  %v3946_v43 = vor.u32 %v5426_v36, %v3943_v37  ;;  %v5462_v1 = vld [vmem:[#allocation6 + $0x39c] sm:$0xf]  ;;  %v4087_v2 = vld [vmem:[#allocation6 + $0x3b0] sm:$0xf0]  ;;  %v3898_v6 = vor.u32 %v5414_v60, %v3895_v61  ;;  %v5459_v8 = vld [vmem:[#allocation6 + $0x37c] sm:$0xf0] }
  0x52   :  { %1073 = vmatpush.bf16.msrb.mxu2 %v3678_v45  ;;  %1086 = vmatpush.bf16.msrb.mxu3 %v3870_v49  ;;  %v5471_v45 = vld [vmem:[#allocation6 + $0x3dc] sm:$0xf0]  ;;  %v3919_v49 = vld [vmem:[#allocation6 + $0x260] sm:$0xf0]  ;;  %v5408_v11 = vld [vmem:[#allocation6 + $0x1ec] sm:$0xf] }
  0x53   :  { %v4110_v51 = vor.u32 %v5471_v45, %v4109_v44  ;;  %v3871_v12 = vld [vmem:[#allocation6 + $0x200] sm:$0xf0]  ;;  %v5456_v15 = vld [vmem:[#allocation6 + $0x36c] sm:$0xf]  ;;  %v4037_v19 = vld [vmem:[#allocation6 + $0x338] sm:$0xf] }
  0x54   :  { %1048 = vmatpush.bf16.msrb.mxu0 %v3842_v54  ;;  %v3730_v54 = vor.u32 %v5372_v46, %v3727_v47  ;;  %v4063_v16 = vld [vmem:[#allocation6 + $0x380] sm:$0xf0]  ;;  %v5453_v20 = vld [vmem:[#allocation6 + $0x34c] sm:$0xf0]  ;;  %v5354_v21 = vld [vmem:[#allocation6 + $0x3c] sm:$0xf] }
  0x55   :  { %1061 = vmatpush.bf16.msrb.mxu1 %v4034_v55  ;;  %v3922_v55 = vor.u32 %v5420_v48, %v3919_v49  ;;  %v5402_v23 = vld [vmem:[#allocation6 + $0x1bc] sm:$0xf]  ;;  %v3847_v24 = vld [vmem:[#allocation6 + $0x1d0] sm:$0xf0]  ;;  %v4066_v25 = vor.u32 %v5456_v15, %v4063_v16  ;;  %v4013_v29 = vld [vmem:[#allocation6 + $0x308] sm:$0xf] }
  0x56   :  { %1074 = vmatpush.bf16.msrb.mxu2 %v3654_v59  ;;  %1087 = vmatpush.bf16.msrb.mxu3 %v3846_v0  ;;  %v3703_v59 = vld [vmem:[#allocation6 + $0xb0] sm:$0xf0]  ;;  %v4086_v0 = vor.u32 %v5465_v57, %v4085_v56  ;;  %v3850_v32 = vor.u32 %v5402_v23, %v3847_v24  ;;  %v5348_v33 = vld [vmem:[#allocation6 + $0xc] sm:$0xf]  ;;  %v3631_v34 = vld [vmem:[#allocation6 + $0x20] sm:$0xf0] }
  0x57   :  { %v3706_v3 = vor.u32 %v5366_v58, %v3703_v59  ;;  %v4039_v28 = vld [vmem:[#allocation6 + $0x350] sm:$0xf0]  ;;  %v5396_v35 = vld [vmem:[#allocation6 + $0x18c] sm:$0xf]  ;;  %v3823_v36 = vld [vmem:[#allocation6 + $0x1a0] sm:$0xf0]  ;;  %v3634_v47 = vor.u32 %v5348_v33, %v3631_v34 }
  0x58   :  { %1049 = vmatpush.bf16.msrb.mxu0 %v3818_v9  ;;  %v5360_v9 = vld [vmem:[#allocation6 + $0x6c] sm:$0xf]  ;;  %v3805_v37 = vld [vmem:[#allocation6 + $0x160] sm:$0xf]  ;;  %v5442_v41 = vld [vmem:[#allocation6 + $0x2f4] sm:$0xf0]  ;;  %v3826_v48 = vor.u32 %v5396_v35, %v3823_v36 }
  0x59   :  { %1062 = vmatpush.bf16.msrb.mxu1 %v4010_v10  ;;  %v3679_v10 = vld [vmem:[#allocation6 + $0x80] sm:$0xf0]  ;;  %v3997_v40 = vld [vmem:[#allocation6 + $0x2e0] sm:$0xf]  ;;  %v5490_v44 = vld [vmem:[#allocation6 + $0x474] sm:$0xf0] }
  0x5a   :  { %1075 = vmatpush.bf16.msrb.mxu2 %v3630_v13  ;;  %1088 = vmatpush.bf16.msrb.mxu3 %v3822_v22  ;;  %v4090_v13 = vor.u32 %v5462_v1, %v4087_v2  ;;  %v3655_v22 = vld [vmem:[#allocation6 + $0x50] sm:$0xf0]  ;;  %v5444_v45 = vld [vmem:[#allocation6 + $0x30c] sm:$0xf]  ;;  %v4015_v46 = vld [vmem:[#allocation6 + $0x320] sm:$0xf0] }
  0x5b   :  { %1050 = vmatmul.bf16.vlgmr.msrb.gmra.mxu0 %v6061_v4  ;;  %v3807_v52 = vld [vmem:[#allocation6 + $0x178] sm:$0xf0]  ;;  %v5388_v56 = vld [vmem:[#allocation6 + $0x144] sm:$0xf0]  ;;  %v3973_v57 = vld [vmem:[#allocation6 + $0x2b0] sm:$0xf] }
  0x5c   :  { %1094 = vmatpush.bf16.msra.mxu0 %v4182_v14  ;;  %1063 = vmatmul.bf16.vlgmr.msrb.gmra.mxu1 %v6063_v5  ;;  %v4062_v14 = vor.u32 %v5459_v8, %v4061_v7  ;;  %v5436_v58 = vld [vmem:[#allocation6 + $0x2c4] sm:$0xf0]  ;;  %v4165_v59 = vld [vmem:[#allocation6 + $0x430] sm:$0xf]  ;;  %v3783_v1 = vld [vmem:[#allocation6 + $0x148] sm:$0xf0] }
  0x5d   :  { %1107 = vmatpush.bf16.msra.mxu1 %v3802_v17  ;;  %1076 = vmatmul.bf16.vlgmr.msrb.gmra.mxu2 %v6059_v63  ;;  %v3682_v17 = vor.u32 %v5360_v9, %v3679_v10  ;;  %v5484_v60 = vld [vmem:[#allocation6 + $0x444] sm:$0xf0]  ;;  %v3974_v2 = vor.u32 %v5436_v58, %v3973_v57  ;;  %v5382_v7 = vld [vmem:[#allocation6 + $0x114] sm:$0xf0]  ;;  %v3949_v8 = vld [vmem:[#allocation6 + $0x280] sm:$0xf] }
  0x5e   :  { %1120 = vmatpush.bf16.msra.mxu2 %v3994_v18  ;;  %1133 = vmatpush.bf16.msra.mxu3 %v4186_v26  ;;  %v3874_v18 = vor.u32 %v5408_v11, %v3871_v12  ;;  %v5450_v26 = vld [vmem:[#allocation6 + $0x33c] sm:$0xf]  ;;  %v5430_v9 = vld [vmem:[#allocation6 + $0x294] sm:$0xf0]  ;;  %v4141_v10 = vld [vmem:[#allocation6 + $0x400] sm:$0xf] }
  0x5f   :  { %1089 = vmatmul.bf16.vlgmr.msrb.gmra.mxu3 %v6061_v4  ;;  %v5478_v11 = vld [vmem:[#allocation6 + $0x414] sm:$0xf0]  ;;  %v3759_v15 = vld [vmem:[#allocation6 + $0x118] sm:$0xf0]  ;;  %v3950_v16 = vor.u32 %v5430_v9, %v3949_v8  ;;  %v5472_v23 = vld [vmem:[#allocation6 + $0x3e4] sm:$0xf0] }
  0x60   :  { %1095 = vmatpush.bf16.msra.mxu0 %v4158_v27  ;;  %v4038_v27 = vor.u32 %v5453_v20, %v4037_v19  ;;  %v5376_v19 = vld [vmem:[#allocation6 + $0xe4] sm:$0xf0]  ;;  %v3925_v20 = vld [vmem:[#allocation6 + $0x250] sm:$0xf]  ;;  %v5418_v33 = vld [vmem:[#allocation6 + $0x234] sm:$0xf0] }
  0x61   :  { %1108 = vmatpush.bf16.msra.mxu1 %v3778_v30  ;;  %v5447_v30 = vld [vmem:[#allocation6 + $0x31c] sm:$0xf0]  ;;  %v5466_v35 = vld [vmem:[#allocation6 + $0x3b4] sm:$0xf0]  ;;  %v5400_v8 = vld [vmem:[#allocation6 + $0x1a4] sm:$0xf0] }
  0x62   :  { %1121 = vmatpush.bf16.msra.mxu2 %v3970_v31  ;;  %1134 = vmatpush.bf16.msra.mxu3 %v4162_v38  ;;  %v3658_v31 = vor.u32 %v5354_v21, %v3655_v22  ;;  %v5394_v38 = vld [vmem:[#allocation6 + $0x174] sm:$0xf0]  ;;  %v5424_v21 = vld [vmem:[#allocation6 + $0x264] sm:$0xf0]  ;;  %v4117_v22 = vld [vmem:[#allocation6 + $0x3d0] sm:$0xf] }
  0x63   :  { %v3806_v49 = vor.u32 %v5394_v38, %v3805_v37  ;;  %v4093_v34 = vld [vmem:[#allocation6 + $0x3a0] sm:$0xf]  ;;  %v5367_v38 = vld [vmem:[#allocation6 + $0xa4] sm:$0xf]  ;;  %v5406_v57 = vld [vmem:[#allocation6 + $0x1d4] sm:$0xf0] }
  0x64   :  { %1096 = vmatpush.bf16.msra.mxu0 %v4134_v39  ;;  %v4042_v39 = vor.u32 %v5450_v26, %v4039_v28  ;;  %v5373_v26 = vld [vmem:[#allocation6 + $0xd4] sm:$0xf]  ;;  %v3926_v28 = vor.u32 %v5424_v21, %v3925_v20  ;;  %v4045_v58 = vld [vmem:[#allocation6 + $0x340] sm:$0xf]  ;;  %v4021_v9 = vld [vmem:[#allocation6 + $0x310] sm:$0xf] }
  0x65   :  { %1109 = vmatpush.bf16.msra.mxu1 %v3754_v42  ;;  %v4189_v42 = vld [vmem:[#allocation6 + $0x460] sm:$0xf]  ;;  %s6003_s6 = smov [#allocation13]   ;;  %s3602_s13 = sshll.u32 %s6231_s7, 4  ;;  %s3603_s13 = int_to_ptr.hbm [resolvable:$true] %s3602_s13 }
  0x66   :  { %1122 = vmatpush.bf16.msra.mxu2 %v3946_v43  ;;  %1135 = vmatpush.bf16.msra.mxu3 %v4138_v50  ;;  %v4014_v43 = vor.u32 %v5447_v30, %v4013_v29  ;;  %v3998_v50 = vor.u32 %v5442_v41, %v3997_v40  ;;  %v4190_v53 = vor.u32 %v5490_v44, %v4189_v42  ;;  %v3709_v30 = vld [vmem:[#allocation6 + $0xa0] sm:$0xf]  ;;  %v3685_v42 = vld [vmem:[#allocation6 + $0x70] sm:$0xf]  ;;  %s3600_s10 = sshll.u32 %s6003_s6, 4  ;;  %s3601_s10 = int_to_ptr.vmem [resolvable:$true] %s3600_s10 }
  0x67   :  { %v4118_v29 = vor.u32 %v5472_v23, %v4117_v22  ;;  %v4094_v41 = vor.u32 %v5466_v35, %v4093_v34  ;;  %v3877_v44 = vld [vmem:[#allocation6 + $0x1f0] sm:$0xf]  ;;  %v5433_v23 = vld [vmem:[#allocation6 + $0x2b4] sm:$0xf]  ;;  %v4293_v35 = vld [vmem:[#allocation8 + $0xc0] sm:$0xf] }
  0x68   :  { %1097 = vmatpush.bf16.msra.mxu0 %v4110_v51  ;;  %v5391_v51 = vld [vmem:[#allocation6 + $0x164] sm:$0xf] }
  0x69   :  { %1110 = vmatpush.bf16.msra.mxu1 %v3730_v54  ;;  %v4018_v54 = vor.u32 %v5444_v45, %v4015_v46  ;;  %v3810_v61 = vor.u32 %v5391_v51, %v3807_v52  ;;  %v5412_v45 = vld [vmem:[#allocation6 + $0x204] sm:$0xf0]  ;;  %v4069_v46 = vld [vmem:[#allocation6 + $0x370] sm:$0xf]  ;;  %v3687_v51 = vld [vmem:[#allocation6 + $0x88] sm:$0xf0] }
  0x6a   :  { %1123 = vmatpush.bf16.msra.mxu2 %v3922_v55  ;;  %1136 = vmatpush.bf16.msra.mxu3 %v4114_v62  ;;  %v3781_v55 = vld [vmem:[#allocation6 + $0x130] sm:$0xf]  ;;  %v3878_v52 = vor.u32 %v5412_v45, %v3877_v44  ;;  %v5421_v45 = vld [vmem:[#allocation6 + $0x254] sm:$0xf] }
  0x6b   :  { %v3782_v62 = vor.u32 %v5388_v56, %v3781_v55  ;;  %v5358_v55 = vld [vmem:[#allocation6 + $0x54] sm:$0xf0]  ;;  %v3853_v56 = vld [vmem:[#allocation6 + $0x1c0] sm:$0xf] }
  0x6c   :  { %1098 = vmatpush.bf16.msra.mxu0 %v4086_v0  ;;  %v5385_v0 = vld [vmem:[#allocation6 + $0x134] sm:$0xf] }
  0x6d   :  { %1111 = vmatpush.bf16.msra.mxu1 %v3706_v3  ;;  %v4166_v3 = vor.u32 %v5484_v60, %v4165_v59  ;;  %v3786_v12 = vor.u32 %v5385_v0, %v3783_v1  ;;  %v5454_v59 = vld [vmem:[#allocation6 + $0x354] sm:$0xf0]  ;;  %v5355_v0 = vld [vmem:[#allocation6 + $0x44] sm:$0xf]  ;;  %v3663_v1 = vld [vmem:[#allocation6 + $0x58] sm:$0xf0] }
  0x6e   :  { %1124 = vmatpush.bf16.msra.mxu2 %v3898_v6  ;;  %1137 = vmatpush.bf16.msra.mxu3 %v4090_v13  ;;  %v3757_v6 = vld [vmem:[#allocation6 + $0x100] sm:$0xf] }
  0x6f   :  { %v3758_v13 = vor.u32 %v5382_v7, %v3757_v6  ;;  %v5352_v6 = vld [vmem:[#allocation6 + $0x24] sm:$0xf0]  ;;  %v3829_v7 = vld [vmem:[#allocation6 + $0x190] sm:$0xf] }
  0x70   :  { %1099 = vmatpush.bf16.msra.mxu0 %v4062_v14  ;;  %v5379_v14 = vld [vmem:[#allocation6 + $0x104] sm:$0xf] }
  0x71   :  { %1112 = vmatpush.bf16.msra.mxu1 %v3682_v17  ;;  %v4142_v17 = vor.u32 %v5478_v11, %v4141_v10  ;;  %v3762_v24 = vor.u32 %v5379_v14, %v3759_v15  ;;  %v5448_v10 = vld [vmem:[#allocation6 + $0x324] sm:$0xf0]  ;;  %v5439_v11 = vld [vmem:[#allocation6 + $0x2e4] sm:$0xf]  ;;  %v4191_v14 = vld [vmem:[#allocation6 + $0x478] sm:$0xf0]  ;;  %v3666_v15 = vor.u32 %v5355_v0, %v3663_v1 }
  0x72   :  { %1125 = vmatpush.bf16.msra.mxu2 %v3874_v18  ;;  %1138 = vmatpush.bf16.msra.mxu3 %v4066_v25  ;;  %v3733_v18 = vld [vmem:[#allocation6 + $0xd0] sm:$0xf]  ;;  %v4022_v20 = vor.u32 %v5448_v10, %v4021_v9  ;;  %v4421_v1 = vld [vmem:[#allocation8 + $0x1c0] sm:$0xf] }
  0x73   :  { %v3734_v25 = vor.u32 %v5376_v19, %v3733_v18  ;;  %v3639_v18 = vld [vmem:[#allocation6 + $0x28] sm:$0xf0]  ;;  %v3830_v19 = vor.u32 %v5400_v8, %v3829_v7  ;;  %v5505_v9 = vld [vmem:[#allocation8 + $0x6c] sm:$0xf0]  ;;  %v4405_v10 = vld [vmem:[#allocation8 + $0x1a0] sm:$0xf] }
  0x74   :  { %1100 = vmatpush.bf16.msra.mxu0 %v4038_v27  ;;  %v3735_v27 = vld [vmem:[#allocation6 + $0xe8] sm:$0xf0] }
  0x75   :  { %1113 = vmatpush.bf16.msra.mxu1 %v3658_v31  ;;  %v5370_v31 = vld [vmem:[#allocation6 + $0xb4] sm:$0xf0]  ;;  %v3738_v36 = vor.u32 %v5373_v26, %v3735_v27  ;;  %v4167_v26 = vld [vmem:[#allocation6 + $0x448] sm:$0xf0] }
  0x76   :  { %1126 = vmatpush.bf16.msra.mxu2 %v3850_v32  ;;  %1139 = vmatpush.bf16.msra.mxu3 %v4042_v39  ;;  %v3901_v32 = vld [vmem:[#allocation6 + $0x220] sm:$0xf]  ;;  %v3710_v37 = vor.u32 %v5370_v31, %v3709_v30  ;;  %v3711_v39 = vld [vmem:[#allocation6 + $0xb8] sm:$0xf0]  ;;  %v5521_v30 = vld [vmem:[#allocation8 + $0xec] sm:$0xf0] }
  0x77   :  { %v3902_v40 = vor.u32 %v5418_v33, %v3901_v32  ;;  %v3951_v33 = vld [vmem:[#allocation6 + $0x298] sm:$0xf0]  ;;  %v4071_v7 = vld [vmem:[#allocation6 + $0x388] sm:$0xf0] }
  0x78   :  { %1101 = vmatpush.bf16.msra.mxu0 %v4014_v43  ;;  %v5364_v43 = vld [vmem:[#allocation6 + $0x84] sm:$0xf0] }
  0x79   :  { %1114 = vmatpush.bf16.msra.mxu1 %v3634_v47  ;;  %v5460_v47 = vld [vmem:[#allocation6 + $0x384] sm:$0xf0] }
  0x7a   :  { %1127 = vmatpush.bf16.msra.mxu2 %v3826_v48  ;;  %1140 = vmatpush.bf16.msra.mxu3 %v4018_v54  ;;  %v3714_v48 = vor.u32 %v5367_v38, %v3711_v39  ;;  %v3661_v54 = vld [vmem:[#allocation6 + $0x40] sm:$0xf]  ;;  %v4143_v38 = vld [vmem:[#allocation6 + $0x418] sm:$0xf0] }
  0x7b   :  { %1102 = vmatmul.bf16.vlgmr.msra.gmra.mxu0 %v6063_v5  ;;  %v4437_v39 = vld [vmem:[#allocation8 + $0x1e0] sm:$0xf] }
  0x7c   :  { %1146 = vmatpush.bf16.msrb.mxu0 %v3806_v49  ;;  %1115 = vmatmul.bf16.vlgmr.msra.gmra.mxu1 %v6059_v63  ;;  %v3686_v49 = vor.u32 %v5364_v43, %v3685_v42 }
  0x7d   :  { %1159 = vmatpush.bf16.msrb.mxu1 %v3998_v50  ;;  %1128 = vmatmul.bf16.vlgmr.msra.gmra.mxu2 %v6061_v4  ;;  %v5361_v50 = vld [vmem:[#allocation6 + $0x74] sm:$0xf] }
  0x7e   :  { %1172 = vmatpush.bf16.msrb.mxu2 %v4190_v53  ;;  %1185 = vmatpush.bf16.msrb.mxu3 %v3810_v61  ;;  %v4070_v53 = vor.u32 %v5460_v47, %v4069_v46  ;;  %v3690_v60 = vor.u32 %v5361_v50, %v3687_v51  ;;  %v3662_v61 = vor.u32 %v5358_v55, %v3661_v54  ;;  %v4277_v46 = vld [vmem:[#allocation8 + $0xa0] sm:$0xf]  ;;  %v5513_v47 = vld [vmem:[#allocation8 + $0xac] sm:$0xf0]  ;;  %v4119_v50 = vld [vmem:[#allocation6 + $0x3e8] sm:$0xf0] }
  0x7f   :  { %1141 = vmatmul.bf16.vlgmr.msra.gmra.mxu3 %v6063_v5  ;;  %v4278_v51 = vor.u32 %v5513_v47, %v4277_v46  ;;  %v5415_v54 = vld [vmem:[#allocation6 + $0x224] sm:$0xf]  ;;  %v3903_v55 = vld [vmem:[#allocation6 + $0x238] sm:$0xf0]  ;;  %v4533_v46 = vld [vmem:[#allocation8 + $0x2a0] sm:$0xf] }
  0x80   :  { %1147 = vmatpush.bf16.msrb.mxu0 %v3782_v62  ;;  %v3637_v62 = vld [vmem:[#allocation6 + $0x10] sm:$0xf] }
  0x81   :  { %1160 = vmatpush.bf16.msrb.mxu1 %v3974_v2  ;;  %v3854_v2 = vor.u32 %v5406_v57, %v3853_v56  ;;  %v5463_v56 = vld [vmem:[#allocation6 + $0x3a4] sm:$0xf]  ;;  %v4095_v57 = vld [vmem:[#allocation6 + $0x3b8] sm:$0xf0]  ;;  %v5577_v47 = vld [vmem:[#allocation8 + $0x2ac] sm:$0xf0] }
  0x82   :  { %1173 = vmatpush.bf16.msrb.mxu2 %v4166_v3  ;;  %1186 = vmatpush.bf16.msrb.mxu3 %v3786_v12  ;;  %v4046_v3 = vor.u32 %v5454_v59, %v4045_v58  ;;  %v3999_v12 = vld [vmem:[#allocation6 + $0x2f8] sm:$0xf0]  ;;  %v4261_v58 = vld [vmem:[#allocation8 + $0x80] sm:$0xf]  ;;  %v5509_v59 = vld [vmem:[#allocation8 + $0x8c] sm:$0xf0]  ;;  %v4098_v0 = vor.u32 %v5463_v56, %v4095_v57 }
  0x83   :  { %v4002_v21 = vor.u32 %v5439_v11, %v3999_v12  ;;  %v5545_v12 = vld [vmem:[#allocation8 + $0x1ac] sm:$0xf0] }
  0x84   :  { %1148 = vmatpush.bf16.msrb.mxu0 %v3758_v13  ;;  %v5487_v13 = vld [vmem:[#allocation6 + $0x464] sm:$0xf] }
  0x85   :  { %1161 = vmatpush.bf16.msrb.mxu1 %v3950_v16  ;;  %v3638_v16 = vor.u32 %v5352_v6, %v3637_v62  ;;  %v4194_v22 = vor.u32 %v5487_v13, %v4191_v14  ;;  %v4262_v62 = vor.u32 %v5509_v59, %v4261_v58  ;;  %v5457_v6 = vld [vmem:[#allocation6 + $0x374] sm:$0xf]  ;;  %v4517_v58 = vld [vmem:[#allocation8 + $0x280] sm:$0xf]  ;;  %v5573_v59 = vld [vmem:[#allocation8 + $0x28c] sm:$0xf0] }
  0x86   :  { %1174 = vmatpush.bf16.msrb.mxu2 %v4142_v17  ;;  %1187 = vmatpush.bf16.msrb.mxu3 %v3762_v24  ;;  %v5349_v17 = vld [vmem:[#allocation6 + $0x14] sm:$0xf]  ;;  %v3975_v24 = vld [vmem:[#allocation6 + $0x2c8] sm:$0xf0]  ;;  %v4074_v14 = vor.u32 %v5457_v6, %v4071_v7  ;;  %v4357_v7 = vld [vmem:[#allocation8 + $0x140] sm:$0xf] }
  0x87   :  { %v3642_v27 = vor.u32 %v5349_v17, %v3639_v18  ;;  %v3978_v31 = vor.u32 %v5433_v23, %v3975_v24  ;;  %v3855_v17 = vld [vmem:[#allocation6 + $0x1d8] sm:$0xf0]  ;;  %v5451_v18 = vld [vmem:[#allocation6 + $0x344] sm:$0xf]  ;;  %v3831_v23 = vld [vmem:[#allocation6 + $0x1a8] sm:$0xf0] }
  0x88   :  { %1149 = vmatpush.bf16.msrb.mxu0 %v3734_v25  ;;  %v5481_v25 = vld [vmem:[#allocation6 + $0x434] sm:$0xf] }
  0x89   :  { %1162 = vmatpush.bf16.msrb.mxu1 %v3926_v28  ;;  %v5427_v28 = vld [vmem:[#allocation6 + $0x284] sm:$0xf]  ;;  %v4170_v32 = vor.u32 %v5481_v25, %v4167_v26  ;;  %v5445_v24 = vld [vmem:[#allocation6 + $0x314] sm:$0xf]  ;;  %v4023_v25 = vld [vmem:[#allocation6 + $0x328] sm:$0xf0] }
  0x8a   :  { %1175 = vmatpush.bf16.msrb.mxu2 %v4118_v29  ;;  %1188 = vmatpush.bf16.msrb.mxu3 %v3738_v36  ;;  %v4309_v29 = vld [vmem:[#allocation8 + $0xe0] sm:$0xf]  ;;  %v5517_v36 = vld [vmem:[#allocation8 + $0xcc] sm:$0xf0]  ;;  %v3954_v43 = vor.u32 %v5427_v28, %v3951_v33 }
  0x8b   :  { %v4310_v34 = vor.u32 %v5521_v30, %v4309_v29  ;;  %v4565_v26 = vld [vmem:[#allocation8 + $0x2e0] sm:$0xf]  ;;  %v5617_v29 = vld [vmem:[#allocation8 + $0x3ec] sm:$0xf0] }
  0x8c   :  { %1150 = vmatpush.bf16.msrb.mxu0 %v3710_v37  ;;  %v5475_v37 = vld [vmem:[#allocation6 + $0x404] sm:$0xf]  ;;  %v4693_v28 = vld [vmem:[#allocation8 + $0x3e0] sm:$0xf] }
  0x8d   :  { %1163 = vmatpush.bf16.msrb.mxu1 %v3902_v40  ;;  %v5553_v40 = vld [vmem:[#allocation8 + $0x1ec] sm:$0xf0]  ;;  %v4146_v44 = vor.u32 %v5475_v37, %v4143_v38  ;;  %v4694_v33 = vor.u32 %v5617_v29, %v4693_v28  ;;  %v4325_v29 = vld [vmem:[#allocation8 + $0x100] sm:$0xf] }
  0x8e   :  { %1176 = vmatpush.bf16.msrb.mxu2 %v4094_v41  ;;  %1189 = vmatpush.bf16.msrb.mxu3 %v3714_v48  ;;  %v4294_v41 = vor.u32 %v5517_v36, %v4293_v35  ;;  %v4438_v42 = vor.u32 %v5553_v40, %v4437_v39  ;;  %v3927_v48 = vld [vmem:[#allocation6 + $0x268] sm:$0xf0]  ;;  %v5581_v35 = vld [vmem:[#allocation8 + $0x2cc] sm:$0xf0]  ;;  %v4229_v36 = vld [vmem:[#allocation8 + $0x40] sm:$0xf] }
  0x8f   :  { %v5501_v37 = vld [vmem:[#allocation8 + $0x4c] sm:$0xf0]  ;;  %v4677_v39 = vld [vmem:[#allocation8 + $0x3c0] sm:$0xf] }
  0x90   :  { %1151 = vmatpush.bf16.msrb.mxu0 %v3686_v49  ;;  %v5469_v49 = vld [vmem:[#allocation6 + $0x3d4] sm:$0xf]  ;;  %v4230_v38 = vor.u32 %v5501_v37, %v4229_v36  ;;  %v5613_v40 = vld [vmem:[#allocation8 + $0x3cc] sm:$0xf0]  ;;  %v4453_v37 = vld [vmem:[#allocation8 + $0x200] sm:$0xf] }
  0x91   :  { %1164 = vmatpush.bf16.msrb.mxu1 %v3878_v52  ;;  %v3930_v52 = vor.u32 %v5421_v45, %v3927_v48  ;;  %v4213_v45 = vld [vmem:[#allocation8 + $0x20] sm:$0xf] }
  0x92   :  { %1177 = vmatpush.bf16.msrb.mxu2 %v4070_v53  ;;  %1190 = vmatpush.bf16.msrb.mxu3 %v3690_v60  ;;  %v4122_v53 = vor.u32 %v5469_v49, %v4119_v50  ;;  %v5409_v60 = vld [vmem:[#allocation6 + $0x1f4] sm:$0xf]  ;;  %v5497_v49 = vld [vmem:[#allocation8 + $0x2c] sm:$0xf0] }
  0x93   :  { %v4214_v50 = vor.u32 %v5497_v49, %v4213_v45  ;;  %v4581_v45 = vld [vmem:[#allocation8 + $0x300] sm:$0xf]  ;;  %v5589_v49 = vld [vmem:[#allocation8 + $0x30c] sm:$0xf0] }
  0x94   :  { %1152 = vmatpush.bf16.msrb.mxu0 %v3662_v61  ;;  %v3879_v61 = vld [vmem:[#allocation6 + $0x208] sm:$0xf0] }
  0x95   :  { %1165 = vmatpush.bf16.msrb.mxu1 %v3854_v2  ;;  %v5549_v2 = vld [vmem:[#allocation8 + $0x1cc] sm:$0xf0]  ;;  %v3882_v13 = vor.u32 %v5409_v60, %v3879_v61 }
  0x96   :  { %1178 = vmatpush.bf16.msrb.mxu2 %v4046_v3  ;;  %1191 = vmatpush.bf16.msrb.mxu3 %v3666_v15  ;;  %v4245_v3 = vld [vmem:[#allocation8 + $0x60] sm:$0xf]  ;;  %v4422_v8 = vor.u32 %v5549_v2, %v4421_v1  ;;  %v5403_v15 = vld [vmem:[#allocation6 + $0x1c4] sm:$0xf]  ;;  %v5493_v61 = vld [vmem:[#allocation8 + $0xc] sm:$0xf0] }
  0x97   :  { %v4246_v11 = vor.u32 %v5505_v9, %v4245_v3  ;;  %v6083_v60 = vld [vmem:[#allocation11] ss:$4 sm:$0x3f] }
  0x98   :  { %1153 = vmatpush.bf16.msrb.mxu0 %v3638_v16  ;;  %v4406_v16 = vor.u32 %v5545_v12, %v4405_v10  ;;  %v258_v1 = vperm.slane %v6083_v60, 0  ;;  %v4501_v2 = vld [vmem:[#allocation8 + $0x260] sm:$0xf]  ;;  %v5569_v3 = vld [vmem:[#allocation8 + $0x26c] sm:$0xf0] }
  0x99   :  { %1166 = vmatpush.bf16.msrb.mxu1 %v3830_v19  ;;  %v4047_v19 = vld [vmem:[#allocation6 + $0x358] sm:$0xf0]  ;;  %v4629_v12 = vld [vmem:[#allocation8 + $0x360] sm:$0xf] }
  0x9a   :  { %1179 = vmatpush.bf16.msrb.mxu2 %v4022_v20  ;;  %1192 = vmatpush.bf16.msrb.mxu3 %v3642_v27  ;;  %v3858_v20 = vor.u32 %v5403_v15, %v3855_v17  ;;  %v5585_v27 = vld [vmem:[#allocation8 + $0x2ec] sm:$0xf0]  ;;  %v4485_v15 = vld [vmem:[#allocation8 + $0x240] sm:$0xf] }
  0x9b   :  { %1154 = vmatmul.bf16.vlgmr.msrb.gmra.mxu0 %v6059_v63  ;;  %v5601_v17 = vld [vmem:[#allocation8 + $0x36c] sm:$0xf0] }
  0x9c   :  { %1198 = vmatpush.bf16.msra.mxu0 %v4002_v21  ;;  %1167 = vmatmul.bf16.vlgmr.msrb.gmra.mxu1 %v6061_v4  ;;  %v4050_v21 = vor.u32 %v5451_v18, %v4047_v19  ;;  %v4630_v18 = vor.u32 %v5601_v17, %v4629_v12  ;;  %v4341_v19 = vld [vmem:[#allocation8 + $0x120] sm:$0xf]  ;;  %v4407_v12 = vld [vmem:[#allocation8 + $0x1b0] sm:$0xf0] }
  0x9d   :  { %1211 = vmatpush.bf16.msra.mxu1 %v4194_v22  ;;  %1180 = vmatmul.bf16.vlgmr.msrb.gmra.mxu2 %v6063_v5  ;;  %v5397_v22 = vld [vmem:[#allocation6 + $0x194] sm:$0xf] }
  0x9e   :  { %2397 = vmatpush.bf16.msra.mxu2 %v4310_v34  ;;  %1193 = vmatmul.bf16.vlgmr.msrb.gmra.mxu3 %v6059_v63  ;;  %v3906_v63 = vor.u32 %v5415_v54, %v3903_v55  ;;  %v3834_v30 = vor.u32 %v5397_v22, %v3831_v23  ;;  %v4549_v34 = vld [vmem:[#allocation8 + $0x2c0] sm:$0xf]  ;;  %v5537_v54 = vld [vmem:[#allocation8 + $0x16c] sm:$0xf0]  ;;  %v4534_v55 = vor.u32 %v5577_v47, %v4533_v46  ;;  %v5519_v46 = vld [vmem:[#allocation8 + $0xe4] sm:$0xf] }
  0x9f   :  { %2410 = vmatpush.bf16.msra.mxu3 %v4438_v42  ;;  %v4678_v42 = vor.u32 %v5613_v40, %v4677_v39  ;;  %v4613_v23 = vld [vmem:[#allocation8 + $0x340] sm:$0xf]  ;;  %v4311_v47 = vld [vmem:[#allocation8 + $0xf0] sm:$0xf0] }
  0xa0   :  { %1199 = vmatpush.bf16.msra.mxu0 %v3978_v31  ;;  %v4026_v31 = vor.u32 %v5445_v24, %v4023_v25  ;;  %v4469_v25 = vld [vmem:[#allocation8 + $0x220] sm:$0xf]  ;;  %v4263_v17 = vld [vmem:[#allocation8 + $0x90] sm:$0xf0] }
  0xa1   :  { %1212 = vmatpush.bf16.msra.mxu1 %v4170_v32  ;;  %v4566_v32 = vor.u32 %v5585_v27, %v4565_v26  ;;  %v5561_v26 = vld [vmem:[#allocation8 + $0x22c] sm:$0xf0]  ;;  %v4821_v39 = vld [vmem:[#allocation8 + $0x4e0] sm:$0xf] }
  0xa2   :  { %2398 = vmatpush.bf16.msra.mxu2 %v4294_v41  ;;  %v4550_v41 = vor.u32 %v5581_v35, %v4549_v34  ;;  %v5597_v27 = vld [vmem:[#allocation8 + $0x34c] sm:$0xf0]  ;;  %v4470_v36 = vor.u32 %v5561_v26, %v4469_v25  ;;  %v5503_v25 = vld [vmem:[#allocation8 + $0x64] sm:$0xf]  ;;  %v4247_v26 = vld [vmem:[#allocation8 + $0x70] sm:$0xf0] }
  0xa3   :  { %2411 = vmatpush.bf16.msra.mxu3 %v4422_v8  ;;  %v5533_v8 = vld [vmem:[#allocation8 + $0x14c] sm:$0xf0]  ;;  %v4614_v28 = vor.u32 %v5597_v27, %v4613_v23  ;;  %v5539_v23 = vld [vmem:[#allocation8 + $0x184] sm:$0xf]  ;;  %v4391_v27 = vld [vmem:[#allocation8 + $0x190] sm:$0xf0] }
  0xa4   :  { %1200 = vmatpush.bf16.msra.mxu0 %v3954_v43  ;;  %v4389_v43 = vld [vmem:[#allocation8 + $0x180] sm:$0xf]  ;;  %v4358_v9 = vor.u32 %v5533_v8, %v4357_v7 }
  0xa5   :  { %1213 = vmatpush.bf16.msra.mxu1 %v4146_v44  ;;  %v5541_v44 = vld [vmem:[#allocation8 + $0x18c] sm:$0xf0] }
  0xa6   :  { %2399 = vmatpush.bf16.msra.mxu2 %v4278_v51  ;;  %v4390_v48 = vor.u32 %v5541_v44, %v4389_v43  ;;  %v4661_v51 = vld [vmem:[#allocation8 + $0x3a0] sm:$0xf]  ;;  %v5557_v43 = vld [vmem:[#allocation8 + $0x20c] sm:$0xf0] }
  0xa7   :  { %2412 = vmatpush.bf16.msra.mxu3 %v4406_v16  ;;  %v5565_v16 = vld [vmem:[#allocation8 + $0x24c] sm:$0xf0] }
  0xa8   :  { %1201 = vmatpush.bf16.msra.mxu0 %v3930_v52  ;;  %v5609_v52 = vld [vmem:[#allocation8 + $0x3ac] sm:$0xf0]  ;;  %v4486_v22 = vor.u32 %v5565_v16, %v4485_v15  ;;  %v5507_v16 = vld [vmem:[#allocation8 + $0x84] sm:$0xf] }
  0xa9   :  { %1214 = vmatpush.bf16.msra.mxu1 %v4122_v53  ;;  %v4373_v53 = vld [vmem:[#allocation8 + $0x160] sm:$0xf]  ;;  %v4662_v56 = vor.u32 %v5609_v52, %v4661_v51  ;;  %v5649_v44 = vld [vmem:[#allocation8 + $0x4ec] sm:$0xf0]  ;;  %v4439_v51 = vld [vmem:[#allocation8 + $0x1f0] sm:$0xf0] }
  0xaa   :  { %2400 = vmatpush.bf16.msra.mxu2 %v4262_v62  ;;  %v4374_v57 = vor.u32 %v5537_v54, %v4373_v53  ;;  %v4805_v52 = vld [vmem:[#allocation8 + $0x4c0] sm:$0xf]  ;;  %v4454_v53 = vor.u32 %v5557_v43, %v4453_v37  ;;  %v4582_v54 = vor.u32 %v5589_v49, %v4581_v45  ;;  %v5499_v37 = vld [vmem:[#allocation8 + $0x44] sm:$0xf]  ;;  %v4215_v49 = vld [vmem:[#allocation8 + $0x30] sm:$0xf0] }
  0xab   :  { %2413 = vmatpush.bf16.msra.mxu3 %v4390_v48  ;;  %v4822_v48 = vor.u32 %v5649_v44, %v4821_v39  ;;  %v4375_v39 = vld [vmem:[#allocation8 + $0x170] sm:$0xf0]  ;;  %v5531_v45 = vld [vmem:[#allocation8 + $0x144] sm:$0xf] }
  0xac   :  { %1202 = vmatpush.bf16.msra.mxu0 %v3906_v63  ;;  %v4645_v63 = vld [vmem:[#allocation8 + $0x380] sm:$0xf] }
  0xad   :  { %1215 = vmatpush.bf16.msra.mxu1 %v4098_v0  ;;  %v5605_v0 = vld [vmem:[#allocation8 + $0x38c] sm:$0xf0] }
  0xae   :  { %2401 = vmatpush.bf16.msra.mxu2 %v4246_v11  ;;  %v4646_v6 = vor.u32 %v5605_v0, %v4645_v63  ;;  %v4502_v11 = vor.u32 %v5569_v3, %v4501_v2  ;;  %v5641_v63 = vld [vmem:[#allocation8 + $0x4ac] sm:$0xf0] }
  0xaf   :  { %2414 = vmatpush.bf16.msra.mxu3 %v4374_v57  ;;  %v5515_v57 = vld [vmem:[#allocation8 + $0xc4] sm:$0xf] }
  0xb0   :  { %1203 = vmatpush.bf16.msra.mxu0 %v3882_v13 }
  0xb1   :  { %1216 = vmatpush.bf16.msra.mxu1 %v4074_v14 }
  0xb2   :  { %2402 = vmatpush.bf16.msra.mxu2 %v4230_v38 }
  0xb3   :  { %2415 = vmatpush.bf16.msra.mxu3 %v4358_v9  ;;  %v4279_v9 = vld [vmem:[#allocation8 + $0xb0] sm:$0xf0] }
  0xb4   :  { %1204 = vmatpush.bf16.msra.mxu0 %v3858_v20  ;;  %v5529_v20 = vld [vmem:[#allocation8 + $0x12c] sm:$0xf0] }
  0xb5   :  { %1217 = vmatpush.bf16.msra.mxu1 %v4050_v21  ;;  %v4342_v21 = vor.u32 %v5529_v20, %v4341_v19  ;;  %v4773_v19 = vld [vmem:[#allocation8 + $0x480] sm:$0xf]  ;;  %v5637_v20 = vld [vmem:[#allocation8 + $0x48c] sm:$0xf0] }
  0xb6   :  { %2403 = vmatpush.bf16.msra.mxu2 %v4214_v50  ;;  %v5551_v50 = vld [vmem:[#allocation8 + $0x1e4] sm:$0xf] }
  0xb7   :  { %2416 = vmatpush.bf16.msra.mxu3 %v4342_v21  ;;  %v4774_v21 = vor.u32 %v5637_v20, %v4773_v19 }
  0xb8   :  { %1205 = vmatpush.bf16.msra.mxu0 %v3834_v30  ;;  %v999_v10 = vpop.f32.mrf.mxu0  ;;  %v5525_v30 = vld [vmem:[#allocation8 + $0x10c] sm:$0xf0] }
  0xb9   :  { %1218 = vmatpush.bf16.msra.mxu1 %v4026_v31  ;;  %v1000_v13 = vadd.f32 %v999_v10, %v258_v1  ;;  %v1012_v14 = vpop.f32.mrf.mxu1  ;;  %v4597_v31 = vld [vmem:[#allocation8 + $0x320] sm:$0xf] }
  0xbb   :  { %1206 = vmatmul.bf16.vlgmr.msra.gmra.mxu0 %v6061_v4  ;;  %v4197_v4 = vld [vmem:[#allocation8] sm:$0xf]  ;;  %v1013_v24 = vadd.f32 %v1012_v14, %v1000_v13  ;;  %v259_v13 = vperm.slane %v6083_v60, 1 }
  0xbc   :  { %2423 = vmatpush.bf16.msrb.mxu0 %v4566_v32  ;;  %1219 = vmatmul.bf16.vlgmr.msra.gmra.mxu1 %v6063_v5  ;;  %v4518_v5 = vor.u32 %v5573_v59, %v4517_v58  ;;  %v4198_v62 = vor.u32 %v5493_v61, %v4197_v4  ;;  %v4326_v32 = vor.u32 %v5525_v30, %v4325_v29  ;;  %v4295_v59 = vld [vmem:[#allocation8 + $0xd0] sm:$0xf0]  ;;  %v5547_v61 = vld [vmem:[#allocation8 + $0x1c4] sm:$0xf] }
  0xbd   :  { %2436 = vmatpush.bf16.msrb.mxu1 %v4694_v33  ;;  %v5593_v33 = vld [vmem:[#allocation8 + $0x32c] sm:$0xf0]  ;;  %v4442_v58 = vor.u32 %v5551_v50, %v4439_v51  ;;  %v4298_v3 = vor.u32 %v5515_v57, %v4295_v59  ;;  %v4394_v30 = vor.u32 %v5539_v23, %v4391_v27  ;;  %v4359_v50 = vld [vmem:[#allocation8 + $0x150] sm:$0xf0]  ;;  %v4949_v57 = vld [vmem:[#allocation8 + $0x5e0] sm:$0xf] }
  0xbe   :  { %2404 = vmatpush.bf16.msra.mxu2 %v4198_v62  ;;  %v4598_v38 = vor.u32 %v5593_v33, %v4597_v31  ;;  %2417 = vmatpush.bf16.msra.mxu3 %v4326_v32  ;;  %v4789_v62 = vld [vmem:[#allocation8 + $0x4a0] sm:$0xf]  ;;  %v5633_v32 = vld [vmem:[#allocation8 + $0x46c] sm:$0xf0]  ;;  %v5579_v23 = vld [vmem:[#allocation8 + $0x2c4] sm:$0xf] }
  0xbf   :  { %v4790_v10 = vor.u32 %v5641_v63, %v4789_v62  ;;  %v4757_v31 = vld [vmem:[#allocation8 + $0x460] sm:$0xf]  ;;  %v4343_v62 = vld [vmem:[#allocation8 + $0x130] sm:$0xf0] }
  0xc0   :  { %2424 = vmatpush.bf16.msrb.mxu0 %v4550_v41  ;;  %v1001_v34 = vpop.f32.mrf.mxu0  ;;  %v1025_v35 = vpop.f32.mrf.mxu2  ;;  %v4758_v33 = vor.u32 %v5633_v32, %v4757_v31 }
  0xc1   :  { %2437 = vmatpush.bf16.msrb.mxu1 %v4678_v42  ;;  %v1026_v40 = vadd.f32 %v1025_v35, %v1013_v24  ;;  %v1014_v41 = vpop.f32.mrf.mxu1  ;;  %v4250_v35 = vor.u32 %v5503_v25, %v4247_v26  ;;  %v4551_v26 = vld [vmem:[#allocation8 + $0x2d0] sm:$0xf0] }
  0xc2   :  { %v1038_v42 = vpop.f32.mrf.mxu3  ;;  %2449 = vmatpush.bf16.msrb.mxu2 %v4822_v48  ;;  %v4741_v41 = vld [vmem:[#allocation8 + $0x440] sm:$0xf]  ;;  %v5495_v48 = vld [vmem:[#allocation8 + $0x24] sm:$0xf]  ;;  %v4554_v27 = vor.u32 %v5579_v23, %v4551_v26  ;;  %v4679_v26 = vld [vmem:[#allocation8 + $0x3d0] sm:$0xf0] }
  0xc3   :  { %5792 = vtanh.f32 %v1026_v40  ;;  %v5639_v23 = vld [vmem:[#allocation8 + $0x4a4] sm:$0xf] }
  0xc4   :  { %2425 = vmatpush.bf16.msrb.mxu0 %v4534_v55  ;;  %v5645_v55 = vld [vmem:[#allocation8 + $0x4cc] sm:$0xf0] }
  0xc5   :  { %2438 = vmatpush.bf16.msrb.mxu1 %v4662_v56  ;;  %v4314_v56 = vor.u32 %v5519_v46, %v4311_v47  ;;  %v4806_v4 = vor.u32 %v5645_v55, %v4805_v52  ;;  %v4362_v52 = vor.u32 %v5531_v45, %v4359_v50  ;;  %v5661_v45 = vld [vmem:[#allocation8 + $0x54c] sm:$0xf0]  ;;  %v4503_v50 = vld [vmem:[#allocation8 + $0x270] sm:$0xf0] }
  0xc7   :  { %2450 = vmatpush.bf16.msrb.mxu2 %v4806_v4  ;;  %v4218_v4 = vor.u32 %v5495_v48, %v4215_v49 }
  0xc8   :  { %2426 = vmatpush.bf16.msrb.mxu0 %v4518_v5  ;;  %v4423_v5 = vld [vmem:[#allocation8 + $0x1d0] sm:$0xf0]  ;;  %v1027_v0 = vpop.f32.mrf.mxu2 }
  0xc9   :  { %2439 = vmatpush.bf16.msrb.mxu1 %v4646_v6  ;;  %v5793_v1 = vpop.eup %5792  ;;  %v5511_v6 = vld [vmem:[#allocation8 + $0xa4] sm:$0xf]  ;;  %v4426_v7 = vor.u32 %v5547_v61, %v4423_v5 }
  0xca   :  { %v1040_v2 = vpop.f32.mrf.mxu3  ;;  %v6086_v8 = vpack.c.bf16 %v5793_v1, %v5793_v1  ;;  %v4282_v14 = vor.u32 %v5511_v6, %v4279_v9  ;;  %v5527_v5 = vld [vmem:[#allocation8 + $0x124] sm:$0xf]  ;;  %v4199_v1 = vld [vmem:[#allocation8 + $0x10] sm:$0xf0]  ;;  %v5621_v6 = vld [vmem:[#allocation8 + $0x40c] sm:$0xf0] }
  0xcb   :  { %2451 = vmatpush.bf16.msrb.mxu2 %v4790_v10  ;;  %v5491_v0 = vld [vmem:[#allocation8 + $0x4] sm:$0xf]  ;;  %v4346_v2 = vor.u32 %v5527_v5, %v4343_v62  ;;  %v4933_v9 = vld [vmem:[#allocation8 + $0x5c0] sm:$0xf]  ;;  %v5677_v10 = vld [vmem:[#allocation8 + $0x5cc] sm:$0xf0] }
  0xcc   :  { %2427 = vmatpush.bf16.msrb.mxu0 %v4502_v11  ;;  %v5543_v11 = vld [vmem:[#allocation8 + $0x1a4] sm:$0xf]  ;;  %2405 = vmatmul.bf16.vlgmr.msra.gmra.mxu2 %v6086_v8 }
  0xcd   :  { %2440 = vmatpush.bf16.msrb.mxu1 %v4630_v18  ;;  %v4410_v15 = vor.u32 %v5543_v11, %v4407_v12  ;;  %v1039_v18 = vadd.f32 %v1038_v42, %v259_v13  ;;  %v5629_v42 = vld [vmem:[#allocation8 + $0x44c] sm:$0xf0]  ;;  %v5583_v11 = vld [vmem:[#allocation8 + $0x2e4] sm:$0xf]  ;;  %v4202_v12 = vor.u32 %v5491_v0, %v4199_v1  ;;  %v4934_v13 = vor.u32 %v5677_v10, %v4933_v9  ;;  %v4837_v1 = vld [vmem:[#allocation8 + $0x500] sm:$0xf] }
  0xce   :  { %v4742_v43 = vor.u32 %v5629_v42, %v4741_v41  ;;  %v261_v42 = vperm.slane %v6083_v60, 3 }
  0xcf   :  { %2452 = vmatpush.bf16.msrb.mxu2 %v4774_v21  ;;  %v4917_v21 = vld [vmem:[#allocation8 + $0x5a0] sm:$0xf] }
  0xd0   :  { %2428 = vmatpush.bf16.msrb.mxu0 %v4486_v22  ;;  %v4266_v22 = vor.u32 %v5507_v16, %v4263_v17  ;;  %v4327_v16 = vld [vmem:[#allocation8 + $0x110] sm:$0xf0] }
  0xd1   :  { %2441 = vmatpush.bf16.msrb.mxu1 %v4614_v28 }
  0xd3   :  { %2453 = vmatpush.bf16.msrb.mxu2 %v4758_v33  ;;  %v4535_v33 = vld [vmem:[#allocation8 + $0x2b0] sm:$0xf0] }
  0xd4   :  { %2429 = vmatpush.bf16.msrb.mxu0 %v4470_v36  ;;  %v5535_v36 = vld [vmem:[#allocation8 + $0x164] sm:$0xf] }
  0xd5   :  { %2442 = vmatpush.bf16.msrb.mxu1 %v4598_v38  ;;  %v4231_v38 = vld [vmem:[#allocation8 + $0x50] sm:$0xf0]  ;;  %v4378_v40 = vor.u32 %v5535_v36, %v4375_v39  ;;  %v5665_v36 = vld [vmem:[#allocation8 + $0x56c] sm:$0xf0] }
  0xd6   :  { %v4234_v44 = vor.u32 %v5499_v37, %v4231_v38  ;;  %v5571_v37 = vld [vmem:[#allocation8 + $0x284] sm:$0xf] }
  0xd7   :  { %2454 = vmatpush.bf16.msrb.mxu2 %v4742_v43 }
  0xd8   :  { %2430 = vmatpush.bf16.msrb.mxu0 %v4454_v53  ;;  %v1051_v24 = vpop.f32.mrf.mxu0  ;;  %v4725_v53 = vld [vmem:[#allocation8 + $0x420] sm:$0xf] }
  0xd9   :  { %2443 = vmatpush.bf16.msrb.mxu1 %v4582_v54  ;;  %v1052_v28 = vadd.f32 %v1051_v24, %v1039_v18  ;;  %v1064_v29 = vpop.f32.mrf.mxu1  ;;  %v5625_v54 = vld [vmem:[#allocation8 + $0x42c] sm:$0xf0]  ;;  %v260_v24 = vperm.slane %v6083_v60, 2 }
  0xdb   :  { %v1065_v34 = vadd.f32 %v1064_v29, %v1052_v28  ;;  %v4901_v28 = vld [vmem:[#allocation8 + $0x580] sm:$0xf]  ;;  %v5669_v29 = vld [vmem:[#allocation8 + $0x58c] sm:$0xf0] }
  0xdc   :  { %2475 = vmatpush.bf16.msra.mxu0 %v4314_v56  ;;  %v4726_v56 = vor.u32 %v5625_v54, %v4725_v53  ;;  %v4902_v32 = vor.u32 %v5669_v29, %v4901_v28  ;;  %v4853_v53 = vld [vmem:[#allocation8 + $0x520] sm:$0xf]  ;;  %v5657_v54 = vld [vmem:[#allocation8 + $0x52c] sm:$0xf0]  ;;  %v5679_v28 = vld [vmem:[#allocation8 + $0x5e4] sm:$0xf] }
  0xdd   :  { %2488 = vmatpush.bf16.msra.mxu1 %v4442_v58  ;;  %5794 = vtanh.f32 %v1065_v34  ;;  %v5681_v58 = vld [vmem:[#allocation8 + $0x5ec] sm:$0xf0]  ;;  %v4951_v29 = vld [vmem:[#allocation8 + $0x5f0] sm:$0xf0] }
  0xde   :  { %v4950_v61 = vor.u32 %v5681_v58, %v4949_v57  ;;  %2455 = vmatpush.bf16.msrb.mxu2 %v4726_v56  ;;  %v4854_v56 = vor.u32 %v5657_v54, %v4853_v53  ;;  %v4487_v57 = vld [vmem:[#allocation8 + $0x250] sm:$0xf0]  ;;  %v262_v53 = vperm.slane %v6083_v60, 4 }
  0xe0   :  { %2476 = vmatpush.bf16.msra.mxu0 %v4298_v3  ;;  %v1077_v46 = vpop.f32.mrf.mxu2  ;;  %v1053_v47 = vpop.f32.mrf.mxu0  ;;  %2462 = vmatpush.bf16.msrb.mxu3 %v4950_v61  ;;  %v4709_v3 = vld [vmem:[#allocation8 + $0x400] sm:$0xf] }
  0xe1   :  { %2489 = vmatpush.bf16.msra.mxu1 %v4426_v7  ;;  %v1066_v51 = vpop.f32.mrf.mxu1  ;;  %v4710_v7 = vor.u32 %v5621_v6, %v4709_v3  ;;  %v1078_v31 = vadd.f32 %v1077_v46, %v260_v24  ;;  %v5567_v46 = vld [vmem:[#allocation8 + $0x264] sm:$0xf] }
  0xe2   :  { %v1090_v55 = vpop.f32.mrf.mxu3  ;;  %v4506_v51 = vor.u32 %v5567_v46, %v4503_v50  ;;  %v5559_v3 = vld [vmem:[#allocation8 + $0x224] sm:$0xf] }
  0xe3   :  { %v5795_v59 = vpop.eup %5794  ;;  %2456 = vmatpush.bf16.msrb.mxu2 %v4710_v7  ;;  %v1091_v38 = vadd.f32 %v1090_v55, %v1078_v31  ;;  %v5563_v55 = vld [vmem:[#allocation8 + $0x244] sm:$0xf] }
  0xe4   :  { %2477 = vmatpush.bf16.msra.mxu0 %v4282_v14  ;;  %v6090_v63 = vpack.c.bf16 %v5795_v59, %v5795_v59  ;;  %v4567_v14 = vld [vmem:[#allocation8 + $0x2f0] sm:$0xf0]  ;;  %2463 = vmatpush.bf16.msrb.mxu3 %v4934_v13  ;;  %v5647_v59 = vld [vmem:[#allocation8 + $0x4e4] sm:$0xf]  ;;  %v4490_v61 = vor.u32 %v5563_v55, %v4487_v57 }
  0xe5   :  { %2490 = vmatpush.bf16.msra.mxu1 %v4410_v15  ;;  %v5523_v15 = vld [vmem:[#allocation8 + $0x104] sm:$0xf]  ;;  %v4570_v18 = vor.u32 %v5583_v11, %v4567_v14  ;;  %v4695_v14 = vld [vmem:[#allocation8 + $0x3f0] sm:$0xf0] }
  0xe6   :  { %2418 = vmatmul.bf16.vlgmr.msra.gmra.mxu3 %v6090_v63  ;;  %v4330_v19 = vor.u32 %v5523_v15, %v4327_v16  ;;  %v5615_v13 = vld [vmem:[#allocation8 + $0x3e4] sm:$0xf]  ;;  %v4743_v57 = vld [vmem:[#allocation8 + $0x450] sm:$0xf0] }
  0xe7   :  { %2501 = vmatpush.bf16.msra.mxu2 %v4570_v18  ;;  %v5643_v16 = vld [vmem:[#allocation8 + $0x4c4] sm:$0xf] }
  0xe8   :  { %2478 = vmatpush.bf16.msra.mxu0 %v4266_v22  ;;  %v1079_v17 = vpop.f32.mrf.mxu2  ;;  %v5673_v22 = vld [vmem:[#allocation8 + $0x5ac] sm:$0xf0]  ;;  %v5631_v46 = vld [vmem:[#allocation8 + $0x464] sm:$0xf] }
  0xe9   :  { %2491 = vmatpush.bf16.msra.mxu1 %v4394_v30  ;;  %v4918_v25 = vor.u32 %v5673_v22, %v4917_v21  ;;  %v5575_v30 = vld [vmem:[#allocation8 + $0x2a4] sm:$0xf]  ;;  %v4807_v17 = vld [vmem:[#allocation8 + $0x4d0] sm:$0xf0] }
  0xea   :  { %v1092_v20 = vpop.f32.mrf.mxu3  ;;  %v4538_v34 = vor.u32 %v5575_v30, %v4535_v33  ;;  %v4455_v21 = vld [vmem:[#allocation8 + $0x210] sm:$0xf0]  ;;  %v4810_v22 = vor.u32 %v5643_v16, %v4807_v17  ;;  %v5603_v50 = vld [vmem:[#allocation8 + $0x384] sm:$0xf] }
  0xeb   :  { %2464 = vmatpush.bf16.msrb.mxu3 %v4918_v25  ;;  %2502 = vmatpush.bf16.msra.mxu2 %v4554_v27  ;;  %v5555_v20 = vld [vmem:[#allocation8 + $0x204] sm:$0xf]  ;;  %v4791_v27 = vld [vmem:[#allocation8 + $0x4b0] sm:$0xf0] }
  0xec   :  { %2479 = vmatpush.bf16.msra.mxu0 %v4250_v35  ;;  %v4885_v35 = vld [vmem:[#allocation8 + $0x560] sm:$0xf]  ;;  %v4458_v24 = vor.u32 %v5555_v20, %v4455_v21  ;;  %v5611_v25 = vld [vmem:[#allocation8 + $0x3c4] sm:$0xf]  ;;  %v4871_v21 = vld [vmem:[#allocation8 + $0x550] sm:$0xf0] }
  0xed   :  { %2492 = vmatpush.bf16.msra.mxu1 %v4378_v40  ;;  %v4886_v39 = vor.u32 %v5665_v36, %v4885_v35  ;;  %v4519_v40 = vld [vmem:[#allocation8 + $0x290] sm:$0xf0]  ;;  %v4682_v31 = vor.u32 %v5611_v25, %v4679_v26  ;;  %v4954_v35 = vor.u32 %v5679_v28, %v4951_v29  ;;  %v5635_v36 = vld [vmem:[#allocation8 + $0x484] sm:$0xf]  ;;  %v5586_v25 = vld [vmem:[#allocation8 + $0x2f4] sm:$0xf0] }
  0xee   :  { %v4522_v41 = vor.u32 %v5571_v37, %v4519_v40  ;;  %v4775_v37 = vld [vmem:[#allocation8 + $0x490] sm:$0xf0]  ;;  %v5659_v20 = vld [vmem:[#allocation8 + $0x544] sm:$0xf] }
  0xef   :  { %2465 = vmatpush.bf16.msrb.mxu3 %v4902_v32  ;;  %2503 = vmatpush.bf16.msra.mxu2 %v4538_v34  ;;  %v4794_v34 = vor.u32 %v5639_v23, %v4791_v27  ;;  %v4935_v40 = vld [vmem:[#allocation8 + $0x5d0] sm:$0xf0] }
  0xf0   :  { %2480 = vmatpush.bf16.msra.mxu0 %v4234_v44  ;;  %v4869_v44 = vld [vmem:[#allocation8 + $0x540] sm:$0xf]  ;;  %v4599_v23 = vld [vmem:[#allocation8 + $0x330] sm:$0xf0] }
  0xf1   :  { %2493 = vmatpush.bf16.msra.mxu1 %v4362_v52  ;;  %v4870_v49 = vor.u32 %v5661_v45, %v4869_v44  ;;  %v4778_v44 = vor.u32 %v5635_v36, %v4775_v37  ;;  %v5587_v36 = vld [vmem:[#allocation8 + $0x304] sm:$0xf]  ;;  %v4583_v37 = vld [vmem:[#allocation8 + $0x310] sm:$0xf0] }
  0xf3   :  { %2466 = vmatpush.bf16.msrb.mxu3 %v4886_v39  ;;  %2504 = vmatpush.bf16.msra.mxu2 %v4522_v41  ;;  %v5607_v41 = vld [vmem:[#allocation8 + $0x3a4] sm:$0xf] }
  0xf4   :  { %2481 = vmatpush.bf16.msra.mxu0 %v4218_v4  ;;  %v4823_v4 = vld [vmem:[#allocation8 + $0x4f0] sm:$0xf0] }
  0xf5   :  { %2494 = vmatpush.bf16.msra.mxu1 %v4346_v2  ;;  %v5653_v2 = vld [vmem:[#allocation8 + $0x50c] sm:$0xf0]  ;;  %v4826_v9 = vor.u32 %v5647_v59, %v4823_v4  ;;  %v4903_v59 = vld [vmem:[#allocation8 + $0x590] sm:$0xf0]  ;;  %v5599_v4 = vld [vmem:[#allocation8 + $0x364] sm:$0xf] }
  0xf6   :  { %v4838_v11 = vor.u32 %v5653_v2, %v4837_v1  ;;  %v5623_v2 = vld [vmem:[#allocation8 + $0x424] sm:$0xf] }
  0xf7   :  { %2467 = vmatpush.bf16.msrb.mxu3 %v4870_v49  ;;  %2505 = vmatpush.bf16.msra.mxu2 %v4506_v51  ;;  %v4919_v49 = vld [vmem:[#allocation8 + $0x5b0] sm:$0xf0] }
  0xf8   :  { %2482 = vmatpush.bf16.msra.mxu0 %v4202_v12  ;;  %v1103_v43 = vpop.f32.mrf.mxu0  ;;  %v4471_v12 = vld [vmem:[#allocation8 + $0x230] sm:$0xf0] }
  0xf9   :  { %2495 = vmatpush.bf16.msra.mxu1 %v4330_v19  ;;  %v1104_v47 = vadd.f32 %v1103_v43, %v1091_v38  ;;  %v1116_v48 = vpop.f32.mrf.mxu1  ;;  %v4474_v18 = vor.u32 %v5559_v3, %v4471_v12  ;;  %v4698_v19 = vor.u32 %v5615_v13, %v4695_v14  ;;  %v5675_v38 = vld [vmem:[#allocation8 + $0x5c4] sm:$0xf]  ;;  %v4647_v51 = vld [vmem:[#allocation8 + $0x390] sm:$0xf0] }
  0xfa   :  { %v1117_v52 = vadd.f32 %v1116_v48, %v261_v42  ;;  %v4663_v42 = vld [vmem:[#allocation8 + $0x3b0] sm:$0xf0]  ;;  %v4938_v45 = vor.u32 %v5675_v38, %v4935_v40  ;;  %v5671_v48 = vld [vmem:[#allocation8 + $0x5a4] sm:$0xf]  ;;  %v4557_v38 = vld [vmem:[#allocation8 + $0x2c8] sm:$0xf] }
  0xfb   :  { %5796 = vtanh.f32 %v1104_v47  ;;  %2468 = vmatpush.bf16.msrb.mxu3 %v4854_v56  ;;  %2506 = vmatpush.bf16.msra.mxu2 %v4490_v61  ;;  %v4666_v43 = vor.u32 %v5607_v41, %v4663_v42  ;;  %v4759_v47 = vld [vmem:[#allocation8 + $0x470] sm:$0xf0]  ;;  %v4922_v55 = vor.u32 %v5671_v48, %v4919_v49  ;;  %v5627_v56 = vld [vmem:[#allocation8 + $0x444] sm:$0xf]  ;;  %v5582_v40 = vld [vmem:[#allocation8 + $0x2d4] sm:$0xf0]  ;;  %v4586_v42 = vor.u32 %v5587_v36, %v4583_v37 }
  0xfc   :  { %v4762_v54 = vor.u32 %v5631_v46, %v4759_v47  ;;  %v4631_v61 = vld [vmem:[#allocation8 + $0x370] sm:$0xf0]  ;;  %v4558_v46 = vor.u32 %v5582_v40, %v4557_v38  ;;  %v5651_v47 = vld [vmem:[#allocation8 + $0x504] sm:$0xf]  ;;  %v4541_v49 = vld [vmem:[#allocation8 + $0x2a8] sm:$0xf] }
  0xfd   :  { %v4727_v3 = vld [vmem:[#allocation8 + $0x430] sm:$0xf0]  ;;  %v5602_v36 = vld [vmem:[#allocation8 + $0x374] sm:$0xf0] }
  0xfe   :  { %v4615_v12 = vld [vmem:[#allocation8 + $0x350] sm:$0xf0]  ;;  %v4730_v16 = vor.u32 %v5623_v2, %v4727_v3 }
  0xff   :  { %2469 = vmatpush.bf16.msrb.mxu3 %v4838_v11  ;;  %2507 = vmatpush.bf16.msra.mxu2 %v4474_v18  ;;  %v5595_v11 = vld [vmem:[#allocation8 + $0x344] sm:$0xf]  ;;  %v4839_v48 = vld [vmem:[#allocation8 + $0x510] sm:$0xf0] }
 0x100   :  { %v1129_v58 = vpop.f32.mrf.mxu2  ;;  %v1105_v0 = vpop.f32.mrf.mxu0  ;;  %v4618_v13 = vor.u32 %v5595_v11, %v4615_v12  ;;  %v5619_v18 = vld [vmem:[#allocation8 + $0x404] sm:$0xf]  ;;  %v4509_v11 = vld [vmem:[#allocation8 + $0x268] sm:$0xf]  ;;  %v5570_v12 = vld [vmem:[#allocation8 + $0x274] sm:$0xf0] }
 0x101   :  { %v1130_v5 = vadd.f32 %v1129_v58, %v1117_v52  ;;  %v5797_v6 = vpop.eup %5796  ;;  %v1118_v10 = vpop.f32.mrf.mxu1  ;;  %v4650_v52 = vor.u32 %v5603_v50, %v4647_v51  ;;  %v5667_v58 = vld [vmem:[#allocation8 + $0x584] sm:$0xf]  ;;  %v4746_v0 = vor.u32 %v5627_v56, %v4743_v57  ;;  %v5578_v50 = vld [vmem:[#allocation8 + $0x2b4] sm:$0xf0]  ;;  %v4701_v51 = vld [vmem:[#allocation8 + $0x3e8] sm:$0xf]  ;;  %v4842_v56 = vor.u32 %v5651_v47, %v4839_v48 }
 0x102   :  { %v1142_v62 = vpop.f32.mrf.mxu3  ;;  %v6095_v15 = vpack.c.bf16 %v5797_v6, %v5797_v6  ;;  %v4906_v1 = vor.u32 %v5667_v58, %v4903_v59  ;;  %v5663_v6 = vld [vmem:[#allocation8 + $0x564] sm:$0xf]  ;;  %v4887_v10 = vld [vmem:[#allocation8 + $0x570] sm:$0xf0]  ;;  %v4542_v58 = vor.u32 %v5578_v50, %v4541_v49  ;;  %v4621_v47 = vld [vmem:[#allocation8 + $0x348] sm:$0xf] }
 0x103   :  { %v1143_v7 = vadd.f32 %v1142_v62, %v1130_v5  ;;  %2514 = vmatpush.bf16.msra.mxu3 %v4698_v19  ;;  %2508 = vmatpush.bf16.msra.mxu2 %v4458_v24  ;;  %v4634_v5 = vor.u32 %v5599_v4, %v4631_v61  ;;  %v4890_v17 = vor.u32 %v5663_v6, %v4887_v10  ;;  %v4711_v19 = vld [vmem:[#allocation8 + $0x410] sm:$0xf0]  ;;  %v4573_v24 = vld [vmem:[#allocation8 + $0x2e8] sm:$0xf]  ;;  %v5518_v61 = vld [vmem:[#allocation8 + $0xd4] sm:$0xf0] }
 0x104   :  { %2431 = vmatmul.bf16.vlgmr.msrb.gmra.mxu0 %v6095_v15  ;;  %v4714_v29 = vor.u32 %v5619_v18, %v4711_v19  ;;  %v4301_v4 = vld [vmem:[#allocation8 + $0xc8] sm:$0xf]  ;;  %v5514_v10 = vld [vmem:[#allocation8 + $0xb4] sm:$0xf0]  ;;  %v4510_v18 = vor.u32 %v5570_v12, %v4509_v11  ;;  %v5520_v49 = vld [vmem:[#allocation8 + $0xec] sm:$0xf] }
 0x105   :  { %5798 = vtanh.f32 %v1143_v7  ;;  %2527 = vmatpush.bf16.msrb.mxu0 %v4826_v9  ;;  %v4302_v3 = vor.u32 %v5518_v61, %v4301_v4  ;;  %v5598_v48 = vld [vmem:[#allocation8 + $0x354] sm:$0xf0]  ;;  %v4319_v50 = vld [vmem:[#allocation8 + $0xf8] sm:$0xf0]  ;;  %v4445_v4 = vld [vmem:[#allocation8 + $0x1e8] sm:$0xf] }
 0x106   :  { %v5554_v61 = vld [vmem:[#allocation8 + $0x1f4] sm:$0xf0] }
 0x107   :  { %2515 = vmatpush.bf16.msra.mxu3 %v4682_v31 }
 0x108   :  { %v1131_v30 = vpop.f32.mrf.mxu2 }
 0x109   :  { %2528 = vmatpush.bf16.msrb.mxu0 %v4810_v22  ;;  %v5591_v22 = vld [vmem:[#allocation8 + $0x324] sm:$0xf]  ;;  %v4874_v30 = vor.u32 %v5659_v20, %v4871_v21  ;;  %v4269_v20 = vld [vmem:[#allocation8 + $0x88] sm:$0xf]  ;;  %v5510_v21 = vld [vmem:[#allocation8 + $0x94] sm:$0xf0] }
 0x10a   :  { %v1144_v32 = vpop.f32.mrf.mxu3  ;;  %v4602_v26 = vor.u32 %v5591_v22, %v4599_v23  ;;  %v4493_v22 = vld [vmem:[#allocation8 + $0x248] sm:$0xf]  ;;  %v5566_v23 = vld [vmem:[#allocation8 + $0x254] sm:$0xf0] }
 0x10b   :  { %v5799_v33 = vpop.eup %5798  ;;  %2516 = vmatpush.bf16.msra.mxu3 %v4666_v43  ;;  %v5655_v32 = vld [vmem:[#allocation8 + $0x524] sm:$0xf] }
 0x10c   :  { %v6098_v39 = vpack.c.bf16 %v5799_v33, %v5799_v33  ;;  %v4574_v33 = vor.u32 %v5586_v25, %v4573_v24  ;;  %v4653_v24 = vld [vmem:[#allocation8 + $0x388] sm:$0xf]  ;;  %v5606_v25 = vld [vmem:[#allocation8 + $0x394] sm:$0xf0] }
 0x10d   :  { %2529 = vmatpush.bf16.msrb.mxu0 %v4794_v34 }
 0x10e   :  { %2444 = vmatmul.bf16.vlgmr.msrb.gmra.mxu1 %v6098_v39 }
 0x10f   :  { %2540 = vmatpush.bf16.msrb.mxu1 %v4954_v35  ;;  %2517 = vmatpush.bf16.msra.mxu3 %v4650_v52  ;;  %v4855_v35 = vld [vmem:[#allocation8 + $0x530] sm:$0xf0]  ;;  %v5618_v52 = vld [vmem:[#allocation8 + $0x3f4] sm:$0xf0] }
 0x110   :  { %v4858_v43 = vor.u32 %v5655_v32, %v4855_v35  ;;  %v4702_v59 = vor.u32 %v5618_v52, %v4701_v51  ;;  %v4637_v35 = vld [vmem:[#allocation8 + $0x368] sm:$0xf] }
 0x111   :  { %2530 = vmatpush.bf16.msrb.mxu0 %v4778_v44  ;;  %v4317_v44 = vld [vmem:[#allocation8 + $0xe8] sm:$0xf] }
 0x113   :  { %2541 = vmatpush.bf16.msrb.mxu1 %v4938_v45  ;;  %2518 = vmatpush.bf16.msra.mxu3 %v4634_v5  ;;  %v5522_v45 = vld [vmem:[#allocation8 + $0xf4] sm:$0xf0]  ;;  %v4525_v5 = vld [vmem:[#allocation8 + $0x288] sm:$0xf] }
 0x114   :  { %2483 = vmatmul.bf16.vlgmr.msra.gmra.mxu0 %v6086_v8 }
 0x115   :  { %2531 = vmatpush.bf16.msrb.mxu0 %v4762_v54 }
 0x117   :  { %2542 = vmatpush.bf16.msrb.mxu1 %v4922_v55  ;;  %2519 = vmatpush.bf16.msra.mxu3 %v4618_v13  ;;  %v4318_v55 = vor.u32 %v5522_v45, %v4317_v44  ;;  %v4669_v13 = vld [vmem:[#allocation8 + $0x3a8] sm:$0xf]  ;;  %v5502_v44 = vld [vmem:[#allocation8 + $0x54] sm:$0xf0] }
 0x118   :  { %v1155_v62 = vpop.f32.mrf.mxu0  ;;  %v4461_v45 = vld [vmem:[#allocation8 + $0x208] sm:$0xf] }
 0x119   :  { %v1156_v7 = vadd.f32 %v1155_v62, %v262_v53  ;;  %v1168_v9 = vpop.f32.mrf.mxu1  ;;  %2532 = vmatpush.bf16.msrb.mxu0 %v4746_v0  ;;  %v5574_v62 = vld [vmem:[#allocation8 + $0x294] sm:$0xf0]  ;;  %v4685_v0 = vld [vmem:[#allocation8 + $0x3c8] sm:$0xf] }
 0x11a   :  { %v4526_v6 = vor.u32 %v5574_v62, %v4525_v5  ;;  %v4605_v5 = vld [vmem:[#allocation8 + $0x328] sm:$0xf]  ;;  %v5594_v62 = vld [vmem:[#allocation8 + $0x334] sm:$0xf0] }
 0x11b   :  { %2543 = vmatpush.bf16.msrb.mxu1 %v4906_v1  ;;  %v1169_v14 = vadd.f32 %v1168_v9, %v1156_v7  ;;  %2520 = vmatpush.bf16.msra.mxu3 %v4602_v26  ;;  %v5614_v1 = vld [vmem:[#allocation8 + $0x3d4] sm:$0xf0]  ;;  %v4285_v9 = vld [vmem:[#allocation8 + $0xa8] sm:$0xf]  ;;  %v4606_v12 = vor.u32 %v5594_v62, %v4605_v5  ;;  %v4399_v5 = vld [vmem:[#allocation8 + $0x198] sm:$0xf0] }
 0x11c   :  { %v4686_v7 = vor.u32 %v5614_v1, %v4685_v0  ;;  %v5516_v1 = vld [vmem:[#allocation8 + $0xcc] sm:$0xf] }
 0x11d   :  { %2533 = vmatpush.bf16.msrb.mxu0 %v4730_v16  ;;  %v263_v16 = vperm.slane %v6083_v60, 5  ;;  %v4253_v60 = vld [vmem:[#allocation8 + $0x68] sm:$0xf] }
 0x11e   :  { %2496 = vmatmul.bf16.vlgmr.msra.gmra.mxu1 %v6090_v63 }
 0x11f   :  { %2544 = vmatpush.bf16.msrb.mxu1 %v4890_v17  ;;  %2521 = vmatpush.bf16.msra.mxu3 %v4586_v42  ;;  %v4286_v17 = vor.u32 %v5514_v10, %v4285_v9  ;;  %v4638_v42 = vor.u32 %v5602_v36, %v4637_v35  ;;  %v5494_v9 = vld [vmem:[#allocation8 + $0x14] sm:$0xf0]  ;;  %v4429_v10 = vld [vmem:[#allocation8 + $0x1c8] sm:$0xf]  ;;  %v5548_v35 = vld [vmem:[#allocation8 + $0x1cc] sm:$0xf] }
 0x120   :  { %v1181_v27 = vpop.f32.mrf.mxu2  ;;  %v1157_v31 = vpop.f32.mrf.mxu0  ;;  %v4431_v36 = vld [vmem:[#allocation8 + $0x1d8] sm:$0xf0] }
 0x121   :  { %v1182_v28 = vadd.f32 %v1181_v27, %v1169_v14  ;;  %v1170_v34 = vpop.f32.mrf.mxu1  ;;  %v1194_v41 = vpop.f32.mrf.mxu3  ;;  %2534 = vmatpush.bf16.msrb.mxu0 %v4714_v29  ;;  %v5610_v14 = vld [vmem:[#allocation8 + $0x3b4] sm:$0xf0]  ;;  %v4270_v27 = vor.u32 %v5510_v21, %v4269_v20  ;;  %v4654_v29 = vor.u32 %v5606_v25, %v4653_v24  ;;  %v4477_v31 = vld [vmem:[#allocation8 + $0x228] sm:$0xf]  ;;  %v5512_v20 = vld [vmem:[#allocation8 + $0xac] sm:$0xf] }
 0x122   :  { %v4670_v19 = vor.u32 %v5610_v14, %v4669_v13  ;;  %v1195_v26 = vadd.f32 %v1194_v41, %v263_v16  ;;  %v5562_v34 = vld [vmem:[#allocation8 + $0x234] sm:$0xf0]  ;;  %v4829_v14 = vld [vmem:[#allocation8 + $0x4e8] sm:$0xf]  ;;  %v4447_v24 = vld [vmem:[#allocation8 + $0x1f8] sm:$0xf0] }
 0x123   :  { %5800 = vtanh.f32 %v1182_v28  ;;  %2545 = vmatpush.bf16.msrb.mxu1 %v4874_v30  ;;  %v4494_v28 = vor.u32 %v5566_v23, %v4493_v22  ;;  %v5506_v30 = vld [vmem:[#allocation8 + $0x74] sm:$0xf0]  ;;  %v4478_v41 = vor.u32 %v5562_v34, %v4477_v31  ;;  %v4287_v22 = vld [vmem:[#allocation8 + $0xb8] sm:$0xf0]  ;;  %v5552_v23 = vld [vmem:[#allocation8 + $0x1ec] sm:$0xf] }
 0x124   :  { %v4254_v38 = vor.u32 %v5506_v30, %v4253_v60  ;;  %v5550_v13 = vld [vmem:[#allocation8 + $0x1d4] sm:$0xf0]  ;;  %v4813_v60 = vld [vmem:[#allocation8 + $0x4c8] sm:$0xf]  ;;  %v4290_v31 = vor.u32 %v5512_v20, %v4287_v22  ;;  %v4271_v34 = vld [vmem:[#allocation8 + $0x98] sm:$0xf0] }
 0x125   :  { %2579 = vmatpush.bf16.msra.mxu0 %v4574_v33  ;;  %v5650_v16 = vld [vmem:[#allocation8 + $0x4f4] sm:$0xf0]  ;;  %v4430_v25 = vor.u32 %v5550_v13, %v4429_v10  ;;  %v5496_v10 = vld [vmem:[#allocation8 + $0x2c] sm:$0xf]  ;;  %v4749_v22 = vld [vmem:[#allocation8 + $0x448] sm:$0xf] }
 0x126   :  { %v5646_v30 = vld [vmem:[#allocation8 + $0x4d4] sm:$0xf0]  ;;  %v5536_v13 = vld [vmem:[#allocation8 + $0x16c] sm:$0xf] }
 0x127   :  { %2546 = vmatpush.bf16.msrb.mxu1 %v4858_v43  ;;  %v4237_v43 = vld [vmem:[#allocation8 + $0x48] sm:$0xf] }
 0x128   :  { %v1183_v53 = vpop.f32.mrf.mxu2  ;;  %v4238_v51 = vor.u32 %v5502_v44, %v4237_v43  ;;  %v5642_v43 = vld [vmem:[#allocation8 + $0x4b4] sm:$0xf0] }
 0x129   :  { %v5801_v54 = vpop.eup %5800  ;;  %2580 = vmatpush.bf16.msra.mxu0 %v4558_v46  ;;  %v1196_v2 = vpop.f32.mrf.mxu3  ;;  %v5558_v46 = vld [vmem:[#allocation8 + $0x214] sm:$0xf0]  ;;  %v4622_v53 = vor.u32 %v5598_v48, %v4621_v47  ;;  %v4255_v47 = vld [vmem:[#allocation8 + $0x78] sm:$0xf0]  ;;  %v5544_v48 = vld [vmem:[#allocation8 + $0x1ac] sm:$0xf] }
 0x12a   :  { %v6104_v57 = vpack.c.bf16 %v5801_v54, %v5801_v54  ;;  %v4462_v52 = vor.u32 %v5558_v46, %v4461_v45  ;;  %v4221_v54 = vld [vmem:[#allocation8 + $0x28] sm:$0xf]  ;;  %v4303_v2 = vld [vmem:[#allocation8 + $0xd8] sm:$0xf0]  ;;  %v4434_v45 = vor.u32 %v5548_v35, %v4431_v36  ;;  %v5504_v46 = vld [vmem:[#allocation8 + $0x6c] sm:$0xf] }
 0x12b   :  { %2547 = vmatpush.bf16.msrb.mxu1 %v4842_v56 }
 0x12c   :  { %2457 = vmatmul.bf16.vlgmr.msrb.gmra.mxu2 %v6104_v57  ;;  %2535 = vmatmul.bf16.vlgmr.msrb.gmra.mxu0 %v6104_v57 }
 0x12d   :  { %2553 = vmatpush.bf16.msrb.mxu2 %v4318_v55  ;;  %2581 = vmatpush.bf16.msra.mxu0 %v4542_v58  ;;  %v5498_v55 = vld [vmem:[#allocation8 + $0x34] sm:$0xf0] }
 0x12e   :  { %v4222_v0 = vor.u32 %v5498_v55, %v4221_v54  ;;  %v4258_v54 = vor.u32 %v5504_v46, %v4255_v47  ;;  %v4815_v46 = vld [vmem:[#allocation8 + $0x4d8] sm:$0xf0] }
 0x12f   :  { %2592 = vmatpush.bf16.msra.mxu1 %v4702_v59  ;;  %v4322_v59 = vor.u32 %v5520_v49, %v4319_v50  ;;  %v4415_v49 = vld [vmem:[#allocation8 + $0x1b8] sm:$0xf0] }
 0x130   :  { %v4418_v55 = vor.u32 %v5544_v48, %v4415_v49  ;;  %v4717_v49 = vld [vmem:[#allocation8 + $0x408] sm:$0xf] }
 0x131   :  { %2554 = vmatpush.bf16.msrb.mxu2 %v4302_v3  ;;  %2582 = vmatpush.bf16.msra.mxu0 %v4526_v6  ;;  %v4446_v6 = vor.u32 %v5554_v61, %v4445_v4  ;;  %v4239_v4 = vld [vmem:[#allocation8 + $0x58] sm:$0xf0]  ;;  %v5540_v61 = vld [vmem:[#allocation8 + $0x18c] sm:$0xf] }
 0x133   :  { %2593 = vmatpush.bf16.msra.mxu1 %v4686_v7  ;;  %v4205_v7 = vld [vmem:[#allocation8 + $0x8] sm:$0xf] }
 0x134   :  { %v4206_v21 = vor.u32 %v5494_v9, %v4205_v7  ;;  %v4765_v7 = vld [vmem:[#allocation8 + $0x468] sm:$0xf]  ;;  %v5634_v9 = vld [vmem:[#allocation8 + $0x474] sm:$0xf0] }
 0x135   :  { %2555 = vmatpush.bf16.msrb.mxu2 %v4286_v17  ;;  %2583 = vmatpush.bf16.msra.mxu0 %v4510_v18  ;;  %v4306_v17 = vor.u32 %v5516_v1, %v4303_v2  ;;  %v4589_v18 = vld [vmem:[#allocation8 + $0x308] sm:$0xf]  ;;  %v5534_v2 = vld [vmem:[#allocation8 + $0x154] sm:$0xf0] }
 0x136   :  { %v4365_v1 = vld [vmem:[#allocation8 + $0x148] sm:$0xf] }
 0x137   :  { %2594 = vmatpush.bf16.msra.mxu1 %v4670_v19  ;;  %v5590_v19 = vld [vmem:[#allocation8 + $0x314] sm:$0xf0] }
 0x138   :  { %v1207_v32 = vpop.f32.mrf.mxu0 }
 0x139   :  { %v1220_v33 = vpop.f32.mrf.mxu1  ;;  %v1208_v37 = vadd.f32 %v1207_v32, %v1195_v26  ;;  %2556 = vmatpush.bf16.msrb.mxu2 %v4270_v27  ;;  %2584 = vmatpush.bf16.msra.mxu0 %v4494_v28  ;;  %v4830_v26 = vor.u32 %v5650_v16, %v4829_v14  ;;  %v4413_v27 = vld [vmem:[#allocation8 + $0x1a8] sm:$0xf]  ;;  %v4590_v28 = vor.u32 %v5590_v19, %v4589_v18  ;;  %v4383_v14 = vld [vmem:[#allocation8 + $0x178] sm:$0xf0]  ;;  %v5530_v19 = vld [vmem:[#allocation8 + $0x134] sm:$0xf0] }
 0x13a   :  { %v4450_v32 = vor.u32 %v5552_v23, %v4447_v24  ;;  %v4366_v16 = vor.u32 %v5534_v2, %v4365_v1  ;;  %v4349_v18 = vld [vmem:[#allocation8 + $0x128] sm:$0xf]  ;;  %v5630_v23 = vld [vmem:[#allocation8 + $0x454] sm:$0xf0]  ;;  %v5492_v24 = vld [vmem:[#allocation8 + $0xc] sm:$0xf] }
 0x13b   :  { %v1221_v40 = vadd.f32 %v1220_v33, %v1208_v37  ;;  %2595 = vmatpush.bf16.msra.mxu1 %v4654_v29  ;;  %v5546_v29 = vld [vmem:[#allocation8 + $0x1b4] sm:$0xf0]  ;;  %v5508_v33 = vld [vmem:[#allocation8 + $0x8c] sm:$0xf]  ;;  %v4925_v2 = vld [vmem:[#allocation8 + $0x5a8] sm:$0xf] }
 0x13c   :  { %2509 = vmatmul.bf16.vlgmr.msra.gmra.mxu2 %v6095_v15  ;;  %v4414_v37 = vor.u32 %v5546_v29, %v4413_v27  ;;  %v4274_v44 = vor.u32 %v5508_v33, %v4271_v34  ;;  %v4367_v27 = vld [vmem:[#allocation8 + $0x158] sm:$0xf0]  ;;  %v5648_v29 = vld [vmem:[#allocation8 + $0x4ec] sm:$0xf]  ;;  %v4733_v33 = vld [vmem:[#allocation8 + $0x428] sm:$0xf] }
 0x13d   :  { %5802 = vtanh.f32 %v1221_v40  ;;  %2557 = vmatpush.bf16.msrb.mxu2 %v4254_v38  ;;  %2585 = vmatpush.bf16.msra.mxu0 %v4478_v41  ;;  %v4814_v38 = vor.u32 %v5646_v30, %v4813_v60  ;;  %v4397_v40 = vld [vmem:[#allocation8 + $0x188] sm:$0xf]  ;;  %v5542_v41 = vld [vmem:[#allocation8 + $0x194] sm:$0xf0]  ;;  %v4831_v60 = vld [vmem:[#allocation8 + $0x4f8] sm:$0xf0]  ;;  %v4750_v30 = vor.u32 %v5630_v23, %v4749_v22 }
 0x13e   :  { %v4398_v50 = vor.u32 %v5542_v41, %v4397_v40  ;;  %v5682_v40 = vld [vmem:[#allocation8 + $0x5f4] sm:$0xf0]  ;;  %v4834_v41 = vor.u32 %v5648_v29, %v4831_v60  ;;  %v4909_v23 = vld [vmem:[#allocation8 + $0x588] sm:$0xf]  ;;  %v5632_v29 = vld [vmem:[#allocation8 + $0x46c] sm:$0xf] }
 0x13f   :  { %2596 = vmatpush.bf16.msra.mxu1 %v4638_v42  ;;  %v4797_v42 = vld [vmem:[#allocation8 + $0x4a8] sm:$0xf]  ;;  %v4767_v60 = vld [vmem:[#allocation8 + $0x478] sm:$0xf0] }
 0x140   :  { %v1209_v56 = vpop.f32.mrf.mxu0 }
 0x141   :  { %v1222_v58 = vpop.f32.mrf.mxu1  ;;  %2558 = vmatpush.bf16.msrb.mxu2 %v4238_v51  ;;  %2586 = vmatpush.bf16.msra.mxu0 %v4462_v52  ;;  %v4798_v51 = vor.u32 %v5642_v43, %v4797_v42  ;;  %v4381_v52 = vld [vmem:[#allocation8 + $0x168] sm:$0xf]  ;;  %v5528_v42 = vld [vmem:[#allocation8 + $0x12c] sm:$0xf]  ;;  %v4351_v43 = vld [vmem:[#allocation8 + $0x138] sm:$0xf0] }
 0x142   :  { %v4781_v56 = vld [vmem:[#allocation8 + $0x488] sm:$0xf]  ;;  %v5638_v58 = vld [vmem:[#allocation8 + $0x494] sm:$0xf0] }
 0x143   :  { %v5803_v3 = vpop.eup %5802  ;;  %2597 = vmatpush.bf16.msra.mxu1 %v4622_v53  ;;  %v5538_v53 = vld [vmem:[#allocation8 + $0x174] sm:$0xf0] }
 0x144   :  { %v6110_v11 = vpack.c.bf16 %v5803_v3, %v5803_v3  ;;  %2587 = vmatmul.bf16.vlgmr.msra.gmra.mxu0 %v6095_v15  ;;  %v4382_v62 = vor.u32 %v5538_v53, %v4381_v52  ;;  %v4354_v52 = vor.u32 %v5528_v42, %v4351_v43  ;;  %v5678_v53 = vld [vmem:[#allocation8 + $0x5d4] sm:$0xf0]  ;;  %v4527_v42 = vld [vmem:[#allocation8 + $0x298] sm:$0xf0]  ;;  %v5628_v43 = vld [vmem:[#allocation8 + $0x44c] sm:$0xf] }
 0x145   :  { %2631 = vmatpush.bf16.msrb.mxu0 %v4322_v59  ;;  %2559 = vmatpush.bf16.msrb.mxu2 %v4222_v0  ;;  %v5500_v59 = vld [vmem:[#allocation8 + $0x4c] sm:$0xf]  ;;  %v4782_v0 = vor.u32 %v5638_v58, %v4781_v56 }
 0x146   :  { %2470 = vmatmul.bf16.vlgmr.msrb.gmra.mxu3 %v6110_v11  ;;  %2548 = vmatmul.bf16.vlgmr.msrb.gmra.mxu1 %v6110_v11  ;;  %v4242_v3 = vor.u32 %v5500_v59, %v4239_v4  ;;  %v5524_v58 = vld [vmem:[#allocation8 + $0x10c] sm:$0xf]  ;;  %v4335_v59 = vld [vmem:[#allocation8 + $0x118] sm:$0xf0] }
 0x147   :  { %2566 = vmatpush.bf16.msrb.mxu3 %v4446_v6  ;;  %2598 = vmatpush.bf16.msra.mxu1 %v4606_v12  ;;  %v4402_v6 = vor.u32 %v5540_v61, %v4399_v5  ;;  %v4223_v12 = vld [vmem:[#allocation8 + $0x38] sm:$0xf0]  ;;  %v5640_v4 = vld [vmem:[#allocation8 + $0x4ac] sm:$0xf] }
 0x148   :  { %v4226_v20 = vor.u32 %v5496_v10, %v4223_v12  ;;  %v4799_v61 = vld [vmem:[#allocation8 + $0x4b8] sm:$0xf0]  ;;  %v5680_v5 = vld [vmem:[#allocation8 + $0x5ec] sm:$0xf]  ;;  %v5674_v10 = vld [vmem:[#allocation8 + $0x5b4] sm:$0xf0] }
 0x149   :  { %2632 = vmatpush.bf16.msrb.mxu0 %v4306_v17  ;;  %2560 = vmatpush.bf16.msrb.mxu2 %v4206_v21  ;;  %v4766_v17 = vor.u32 %v5634_v9, %v4765_v7  ;;  %v4386_v21 = vor.u32 %v5536_v13, %v4383_v14  ;;  %v4338_v7 = vor.u32 %v5524_v58, %v4335_v59  ;;  %v6121_v9 = vld [vmem:[#allocation11 + $0x1] ss:$4 sm:$0xf]  ;;  %v4895_v59 = vld [vmem:[#allocation8 + $0x578] sm:$0xf0] }
 0x14a   :  { %v4802_v12 = vor.u32 %v5640_v4, %v4799_v61  ;;  %v5580_v14 = vld [vmem:[#allocation8 + $0x2cc] sm:$0xf] }
 0x14b   :  { %2567 = vmatpush.bf16.msrb.mxu3 %v4430_v25  ;;  %2599 = vmatpush.bf16.msra.mxu1 %v4590_v28  ;;  %v4207_v25 = vld [vmem:[#allocation8 + $0x18] sm:$0xf0]  ;;  %v4350_v28 = vor.u32 %v5530_v19, %v4349_v18  ;;  %v5676_v19 = vld [vmem:[#allocation8 + $0x5cc] sm:$0xf] }
 0x14c   :  { %2561 = vmatmul.bf16.vlgmr.msrb.gmra.mxu2 %v6086_v8  ;;  %v4210_v35 = vor.u32 %v5492_v24, %v4207_v25  ;;  %v4783_v18 = vld [vmem:[#allocation8 + $0x498] sm:$0xf0]  ;;  %v5670_v24 = vld [vmem:[#allocation8 + $0x594] sm:$0xf0]  ;;  %v5664_v58 = vld [vmem:[#allocation8 + $0x56c] sm:$0xf] }
 0x14d   :  { %2605 = vmatpush.bf16.msra.mxu2 %v4830_v26  ;;  %2633 = vmatpush.bf16.msrb.mxu0 %v4290_v31  ;;  %v5532_v26 = vld [vmem:[#allocation8 + $0x14c] sm:$0xf]  ;;  %v4333_v31 = vld [vmem:[#allocation8 + $0x108] sm:$0xf] }
 0x14e   :  { %v4370_v36 = vor.u32 %v5532_v26, %v4367_v27  ;;  %v5576_v27 = vld [vmem:[#allocation8 + $0x2ac] sm:$0xf] }
 0x14f   :  { %2644 = vmatpush.bf16.msrb.mxu1 %v4450_v32  ;;  %2568 = vmatpush.bf16.msrb.mxu3 %v4414_v37  ;;  %v5526_v32 = vld [vmem:[#allocation8 + $0x114] sm:$0xf0]  ;;  %v6118_v34 = vpop.f32.mrf.mxu2 }
 0x150   :  { %v5626_v37 = vld [vmem:[#allocation8 + $0x434] sm:$0xf0] }
 0x151   :  { %2606 = vmatpush.bf16.msra.mxu2 %v4814_v38  ;;  %2634 = vmatpush.bf16.msrb.mxu0 %v4274_v44  ;;  %v4957_v38 = vld [vmem:[#allocation8 + $0x5e8] sm:$0xf]  ;;  %v4334_v44 = vor.u32 %v5526_v32, %v4333_v31  ;;  %v4734_v47 = vor.u32 %v5626_v37, %v4733_v33  ;;  %v4927_v31 = vld [vmem:[#allocation8 + $0x5b8] sm:$0xf0]  ;;  %v4910_v32 = vor.u32 %v5670_v24, %v4909_v23  ;;  %v5666_v37 = vld [vmem:[#allocation8 + $0x574] sm:$0xf0] }
 0x152   :  { %v4958_v48 = vor.u32 %v5682_v40, %v4957_v38  ;;  %v4770_v38 = vor.u32 %v5632_v29, %v4767_v60  ;;  %v4703_v23 = vld [vmem:[#allocation8 + $0x3f8] sm:$0xf0]  ;;  %v5656_v24 = vld [vmem:[#allocation8 + $0x52c] sm:$0xf] }
 0x153   :  { %2645 = vmatpush.bf16.msrb.mxu1 %v4434_v45  ;;  %2569 = vmatpush.bf16.msrb.mxu3 %v4398_v50  ;;  %v5644_v45 = vld [vmem:[#allocation8 + $0x4cc] sm:$0xf]  ;;  %v5622_v50 = vld [vmem:[#allocation8 + $0x414] sm:$0xf0]  ;;  %v4463_v60 = vld [vmem:[#allocation8 + $0x218] sm:$0xf0] }
 0x154   :  { %v4818_v56 = vor.u32 %v5644_v45, %v4815_v46  ;;  %v5668_v45 = vld [vmem:[#allocation8 + $0x58c] sm:$0xf]  ;;  %v4911_v46 = vld [vmem:[#allocation8 + $0x598] sm:$0xf0] }
 0x155   :  { %2607 = vmatpush.bf16.msra.mxu2 %v4798_v51  ;;  %2635 = vmatpush.bf16.msrb.mxu0 %v4258_v54  ;;  %v4941_v51 = vld [vmem:[#allocation8 + $0x5c8] sm:$0xf]  ;;  %v5584_v54 = vld [vmem:[#allocation8 + $0x2ec] sm:$0xf] }
 0x156   :  { %2522 = vmatmul.bf16.vlgmr.msra.gmra.mxu3 %v6098_v39  ;;  %2600 = vmatmul.bf16.vlgmr.msra.gmra.mxu1 %v6098_v39  ;;  %v4942_v1 = vor.u32 %v5678_v53, %v4941_v51  ;;  %v5568_v53 = vld [vmem:[#allocation8 + $0x26c] sm:$0xf] }
 0x157   :  { %2646 = vmatpush.bf16.msrb.mxu1 %v4418_v55  ;;  %2570 = vmatpush.bf16.msrb.mxu3 %v4382_v62  ;;  %v4575_v55 = vld [vmem:[#allocation8 + $0x2f8] sm:$0xf0]  ;;  %v5556_v29 = vld [vmem:[#allocation8 + $0x20c] sm:$0xf] }
 0x158   :  { %v4959_v62 = vld [vmem:[#allocation8 + $0x5f8] sm:$0xf0] }
 0x159   :  { %2608 = vmatpush.bf16.msra.mxu2 %v4782_v0  ;;  %2636 = vmatpush.bf16.msrb.mxu0 %v4242_v3  ;;  %v4718_v0 = vor.u32 %v5622_v50, %v4717_v49  ;;  %v2408_v3 = vpop.f32.mrf.mxu2  ;;  %v4962_v13 = vor.u32 %v5680_v5, %v4959_v62  ;;  %v4877_v49 = vld [vmem:[#allocation8 + $0x548] sm:$0xf]  ;;  %v5662_v50 = vld [vmem:[#allocation8 + $0x554] sm:$0xf0] }
 0x15a   :  { %v4878_v4 = vor.u32 %v5662_v50, %v4877_v49  ;;  %v4861_v5 = vld [vmem:[#allocation8 + $0x528] sm:$0xf]  ;;  %v5658_v62 = vld [vmem:[#allocation8 + $0x534] sm:$0xf0]  ;;  %v4495_v3 = vld [vmem:[#allocation8 + $0x258] sm:$0xf0] }
 0x15b   :  { %2647 = vmatpush.bf16.msrb.mxu1 %v4402_v6  ;;  %2571 = vmatpush.bf16.msrb.mxu3 %v4366_v16  ;;  %v4578_v6 = vor.u32 %v5584_v54, %v4575_v55  ;;  %v4559_v16 = vld [vmem:[#allocation8 + $0x2d8] sm:$0xf0]  ;;  %v5624_v55 = vld [vmem:[#allocation8 + $0x42c] sm:$0xf] }
 0x15c   :  { %v4562_v22 = vor.u32 %v5580_v14, %v4559_v16  ;;  %v4511_v54 = vld [vmem:[#allocation8 + $0x278] sm:$0xf0] }
 0x15d   :  { %2609 = vmatpush.bf16.msra.mxu2 %v4766_v17  ;;  %2637 = vmatpush.bf16.msrb.mxu0 %v4226_v20  ;;  %v5636_v17 = vld [vmem:[#allocation8 + $0x48c] sm:$0xf]  ;;  %v4943_v20 = vld [vmem:[#allocation8 + $0x5d8] sm:$0xf0]  ;;  %v4514_v61 = vor.u32 %v5568_v53, %v4511_v54 }
 0x15e   :  { %v4786_v25 = vor.u32 %v5636_v17, %v4783_v18  ;;  %v4946_v26 = vor.u32 %v5676_v19, %v4943_v20  ;;  %v4845_v17 = vld [vmem:[#allocation8 + $0x508] sm:$0xf]  ;;  %v5654_v18 = vld [vmem:[#allocation8 + $0x514] sm:$0xf0]  ;;  %v5560_v19 = vld [vmem:[#allocation8 + $0x22c] sm:$0xf] }
 0x15f   :  { %2648 = vmatpush.bf16.msrb.mxu1 %v4386_v21  ;;  %2572 = vmatpush.bf16.msrb.mxu3 %v4350_v28  ;;  %v1429_v21 = vperm.slane %v6121_v9, 0  ;;  %v4543_v28 = vld [vmem:[#allocation8 + $0x2b8] sm:$0xf0]  ;;  %v5600_v53 = vld [vmem:[#allocation8 + $0x36c] sm:$0xf] }
 0x160   :  { %v4655_v49 = vld [vmem:[#allocation8 + $0x398] sm:$0xf0] }
 0x161   :  { %2610 = vmatpush.bf16.msra.mxu2 %v4750_v30  ;;  %2638 = vmatpush.bf16.msrb.mxu0 %v4210_v35  ;;  %v5672_v30 = vld [vmem:[#allocation8 + $0x5ac] sm:$0xf]  ;;  %v2407_v33 = vadd.f32 %v6118_v34, %v1429_v21  ;;  %v4546_v35 = vor.u32 %v5576_v27, %v4543_v28  ;;  %v4479_v21 = vld [vmem:[#allocation8 + $0x238] sm:$0xf0] }
 0x162   :  { %v4930_v40 = vor.u32 %v5672_v30, %v4927_v31  ;;  %v4482_v27 = vor.u32 %v5560_v19, %v4479_v21  ;;  %v5612_v31 = vld [vmem:[#allocation8 + $0x3cc] sm:$0xf]  ;;  %v4639_v54 = vld [vmem:[#allocation8 + $0x378] sm:$0xf0]  ;;  %v5145_v19 = vld [vmem:[#allocation9 + $0x168] sm:$0xf] }
 0x163   :  { %2649 = vmatpush.bf16.msrb.mxu1 %v4370_v36  ;;  %2573 = vmatpush.bf16.msrb.mxu3 %v4334_v44  ;;  %v4893_v36 = vld [vmem:[#allocation8 + $0x568] sm:$0xf]  ;;  %v4751_v44 = vld [vmem:[#allocation8 + $0x458] sm:$0xf0]  ;;  %v5687_v21 = vld [vmem:[#allocation9 + $0x20] sm:$0xf0] }
 0x164   :  { %2639 = vmatmul.bf16.vlgmr.msrb.gmra.mxu0 %v6086_v8  ;;  %v4926_v8 = vor.u32 %v5674_v10, %v4925_v2  ;;  %v4754_v51 = vor.u32 %v5628_v43, %v4751_v44  ;;  %v5564_v2 = vld [vmem:[#allocation8 + $0x24c] sm:$0xf]  ;;  %v4671_v43 = vld [vmem:[#allocation8 + $0x3b8] sm:$0xf0] }
 0x165   :  { %2683 = vmatpush.bf16.msra.mxu0 %v4834_v41  ;;  %2611 = vmatpush.bf16.msra.mxu2 %v4734_v47  ;;  %v5572_v41 = vld [vmem:[#allocation8 + $0x28c] sm:$0xf]  ;;  %v4894_v47 = vor.u32 %v5666_v37, %v4893_v36  ;;  %v4498_v16 = vor.u32 %v5564_v2, %v4495_v3  ;;  %v5049_v36 = vld [vmem:[#allocation9 + $0xa8] sm:$0xf]  ;;  %v5705_v37 = vld [vmem:[#allocation9 + $0xb0] sm:$0xf0] }
 0x166   :  { %2574 = vmatmul.bf16.vlgmr.msrb.gmra.mxu3 %v6090_v63  ;;  %v5660_v10 = vld [vmem:[#allocation8 + $0x54c] sm:$0xf]  ;;  %v5050_v44 = vor.u32 %v5705_v37, %v5049_v36  ;;  %v4607_v3 = vld [vmem:[#allocation8 + $0x338] sm:$0xf0]  ;;  %v5723_v36 = vld [vmem:[#allocation9 + $0x140] sm:$0xf0] }
 0x167   :  { %2618 = vmatpush.bf16.msra.mxu3 %v4958_v48  ;;  %2650 = vmatpush.bf16.msrb.mxu1 %v4354_v52  ;;  %v4530_v48 = vor.u32 %v5572_v41, %v4527_v42  ;;  %v4914_v52 = vor.u32 %v5668_v45, %v4911_v46  ;;  %v5608_v42 = vld [vmem:[#allocation8 + $0x3ac] sm:$0xf]  ;;  %v5037_v45 = vld [vmem:[#allocation9 + $0x90] sm:$0xf]  ;;  %v5702_v46 = vld [vmem:[#allocation9 + $0x98] sm:$0xf0] }
 0x168   :  { %v5038_v50 = vor.u32 %v5702_v46, %v5037_v45  ;;  %v5592_v2 = vld [vmem:[#allocation8 + $0x32c] sm:$0xf]  ;;  %v5698_v45 = vld [vmem:[#allocation9 + $0x7c] sm:$0xf]  ;;  %v5027_v46 = vld [vmem:[#allocation9 + $0x84] sm:$0xf0] }
 0x169   :  { %2684 = vmatpush.bf16.msra.mxu0 %v4818_v56  ;;  %2612 = vmatpush.bf16.msra.mxu2 %v4718_v0  ;;  %v4735_v56 = vld [vmem:[#allocation8 + $0x438] sm:$0xf0] }
 0x16a   :  { %v4738_v0 = vor.u32 %v5624_v55, %v4735_v56  ;;  %v5013_v56 = vld [vmem:[#allocation9 + $0x60] sm:$0xf] }
 0x16b   :  { %2619 = vmatpush.bf16.msra.mxu3 %v4942_v1  ;;  %2651 = vmatpush.bf16.msrb.mxu1 %v4338_v7  ;;  %v4898_v1 = vor.u32 %v5664_v58, %v4895_v59  ;;  %v4719_v7 = vld [vmem:[#allocation8 + $0x418] sm:$0xf0]  ;;  %v5696_v58 = vld [vmem:[#allocation9 + $0x68] sm:$0xf0]  ;;  %v4642_v59 = vor.u32 %v5600_v53, %v4639_v54  ;;  %v5085_v54 = vld [vmem:[#allocation9 + $0xf0] sm:$0xf] }
 0x16c   :  { %2613 = vmatmul.bf16.vlgmr.msra.gmra.mxu2 %v6104_v57 }
 0x16d   :  { %2657 = vmatpush.bf16.msrb.mxu2 %v4578_v6  ;;  %2685 = vmatpush.bf16.msra.mxu0 %v4802_v12  ;;  %v5620_v6 = vld [vmem:[#allocation8 + $0x40c] sm:$0xf]  ;;  %v4879_v12 = vld [vmem:[#allocation8 + $0x558] sm:$0xf0] }
 0x16e   :  { %2652 = vmatmul.bf16.vlgmr.msrb.gmra.mxu1 %v6090_v63  ;;  %v2419_v63 = vpop.f32.mrf.mxu3  ;;  %v4722_v20 = vor.u32 %v5620_v6, %v4719_v7  ;;  %v4989_v7 = vld [vmem:[#allocation9 + $0x30] sm:$0xf] }
 0x16f   :  { %2696 = vmatpush.bf16.msra.mxu1 %v4962_v13  ;;  %2620 = vmatpush.bf16.msra.mxu3 %v4926_v8  ;;  %v6128_v34 = vadd.f32 %v2419_v63, %v2407_v33  ;;  %v4862_v13 = vor.u32 %v5658_v62, %v4861_v5  ;;  %v4882_v8 = vor.u32 %v5660_v10, %v4879_v12  ;;  %v5652_v33 = vld [vmem:[#allocation8 + $0x50c] sm:$0xf]  ;;  %v4623_v62 = vld [vmem:[#allocation8 + $0x358] sm:$0xf0] }
 0x170   :  { %v5596_v5 = vld [vmem:[#allocation8 + $0x34c] sm:$0xf]  ;;  %v5690_v10 = vld [vmem:[#allocation9 + $0x38] sm:$0xf0]  ;;  %v4610_v12 = vor.u32 %v5592_v2, %v4607_v3 }
 0x171   :  { %2658 = vmatpush.bf16.msrb.mxu2 %v4562_v22  ;;  %2686 = vmatpush.bf16.msra.mxu0 %v4786_v25  ;;  %v5616_v22 = vld [vmem:[#allocation8 + $0x3ec] sm:$0xf]  ;;  %v4863_v25 = vld [vmem:[#allocation8 + $0x538] sm:$0xf0] }
 0x172   :  { %v4706_v28 = vor.u32 %v5616_v22, %v4703_v23  ;;  %v4866_v30 = vor.u32 %v5656_v24, %v4863_v25  ;;  %v5133_v25 = vld [vmem:[#allocation9 + $0x150] sm:$0xf] }
 0x173   :  { %2697 = vmatpush.bf16.msra.mxu1 %v4946_v26  ;;  %2621 = vmatpush.bf16.msra.mxu3 %v4910_v32  ;;  %v4846_v26 = vor.u32 %v5654_v18, %v4845_v17  ;;  %v4687_v32 = vld [vmem:[#allocation8 + $0x3d8] sm:$0xf0]  ;;  %v4990_v18 = vor.u32 %v5690_v10, %v4989_v7  ;;  %v5708_v7 = vld [vmem:[#allocation9 + $0xc8] sm:$0xf0] }
 0x174   :  { %v4591_v17 = vld [vmem:[#allocation8 + $0x318] sm:$0xf0] }
 0x175   :  { %2659 = vmatpush.bf16.msrb.mxu2 %v4546_v35  ;;  %2687 = vmatpush.bf16.msra.mxu0 %v4770_v38  ;;  %v4847_v35 = vld [vmem:[#allocation8 + $0x518] sm:$0xf0]  ;;  %v4466_v38 = vor.u32 %v5556_v29, %v4463_v60  ;;  %v5704_v29 = vld [vmem:[#allocation9 + $0xac] sm:$0xf]  ;;  %v5051_v60 = vld [vmem:[#allocation9 + $0xb4] sm:$0xf0] }
 0x176   :  { %v2421_v14 = vpop.f32.mrf.mxu3  ;;  %v4850_v41 = vor.u32 %v5652_v33, %v4847_v35  ;;  %v5121_v35 = vld [vmem:[#allocation9 + $0x138] sm:$0xf]  ;;  %v5054_v37 = vor.u32 %v5704_v29, %v5051_v60  ;;  %v5229_v60 = vld [vmem:[#allocation9 + $0x210] sm:$0xf] }
 0x177   :  { %2698 = vmatpush.bf16.msra.mxu1 %v4930_v40  ;;  %2622 = vmatpush.bf16.msra.mxu3 %v4894_v47  ;;  %v4690_v40 = vor.u32 %v5612_v31, %v4687_v32  ;;  %v4674_v47 = vor.u32 %v5608_v42, %v4671_v43  ;;  %v5109_v42 = vld [vmem:[#allocation9 + $0x120] sm:$0xf]  ;;  %v5720_v43 = vld [vmem:[#allocation9 + $0x128] sm:$0xf0] }
 0x179   :  { %2660 = vmatpush.bf16.msrb.mxu2 %v4530_v48  ;;  %2688 = vmatpush.bf16.msra.mxu0 %v4754_v51  ;;  %v5604_v48 = vld [vmem:[#allocation8 + $0x38c] sm:$0xf]  ;;  %v5699_v51 = vld [vmem:[#allocation9 + $0x80] sm:$0xf0] }
 0x17b   :  { %2699 = vmatpush.bf16.msra.mxu1 %v4914_v52  ;;  %2623 = vmatpush.bf16.msra.mxu3 %v4878_v4  ;;  %v4658_v52 = vor.u32 %v5604_v48, %v4655_v49  ;;  %v5110_v48 = vor.u32 %v5720_v43, %v5109_v42  ;;  %v5097_v49 = vld [vmem:[#allocation9 + $0x108] sm:$0xf]  ;;  %v5111_v42 = vld [vmem:[#allocation9 + $0x12c] sm:$0xf0] }
 0x17d   :  { %2661 = vmatpush.bf16.msrb.mxu2 %v4514_v61  ;;  %2689 = vmatpush.bf16.msra.mxu0 %v4738_v0  ;;  %v5014_v0 = vor.u32 %v5696_v58, %v5013_v56  ;;  %v5692_v58 = vld [vmem:[#allocation9 + $0x4c] sm:$0xf] }
 0x17f   :  { %2700 = vmatpush.bf16.msra.mxu1 %v4898_v1  ;;  %2624 = vmatpush.bf16.msra.mxu3 %v4862_v13  ;;  %v5693_v1 = vld [vmem:[#allocation9 + $0x50] sm:$0xf0] }
 0x181   :  { %2662 = vmatpush.bf16.msrb.mxu2 %v4498_v16  ;;  %2690 = vmatpush.bf16.msra.mxu0 %v4722_v20  ;;  %v6132_v63 = vpop.f32.mrf.mxu0  ;;  %v5588_v16 = vld [vmem:[#allocation8 + $0x30c] sm:$0xf]  ;;  %v5729_v20 = vld [vmem:[#allocation9 + $0x170] sm:$0xf0] }
 0x182   :  { %v4594_v22 = vor.u32 %v5588_v16, %v4591_v17  ;;  %v5146_v23 = vor.u32 %v5729_v20, %v5145_v19  ;;  %v5686_v16 = vld [vmem:[#allocation9 + $0x1c] sm:$0xf]  ;;  %v4979_v17 = vld [vmem:[#allocation9 + $0x24] sm:$0xf0] }
 0x183   :  { %2701 = vmatpush.bf16.msra.mxu1 %v4882_v8  ;;  %2625 = vmatpush.bf16.msra.mxu3 %v4846_v26  ;;  %v4977_v8 = vld [vmem:[#allocation9 + $0x18] sm:$0xf]  ;;  %v5726_v26 = vld [vmem:[#allocation9 + $0x158] sm:$0xf0]  ;;  %v4982_v20 = vor.u32 %v5686_v16, %v4979_v17  ;;  %v1430_v16 = vperm.slane %v6121_v9, 1 }
 0x184   :  { %2691 = vmatmul.bf16.vlgmr.msra.gmra.mxu0 %v6104_v57  ;;  %v5025_v57 = vld [vmem:[#allocation9 + $0x78] sm:$0xf]  ;;  %v4978_v24 = vor.u32 %v5687_v21, %v4977_v8  ;;  %v5134_v32 = vor.u32 %v5726_v26, %v5133_v25  ;;  %v5725_v8 = vld [vmem:[#allocation9 + $0x154] sm:$0xf]  ;;  %v5241_v21 = vld [vmem:[#allocation9 + $0x228] sm:$0xf] }
 0x185   :  { %2663 = vmatpush.bf16.msrb.mxu2 %v4482_v27  ;;  %v5026_v55 = vor.u32 %v5699_v51, %v5025_v57  ;;  %v4965_v27 = vld [vmem:[#allocation9] sm:$0xf]  ;;  %v5030_v57 = vor.u32 %v5698_v45, %v5027_v46  ;;  %v5695_v51 = vld [vmem:[#allocation9 + $0x64] sm:$0xf]  ;;  %v4967_v26 = vld [vmem:[#allocation9 + $0xc] sm:$0xf0] }
 0x186   :  { %2626 = vmatmul.bf16.vlgmr.msra.gmra.mxu3 %v6110_v11  ;;  %v5683_v25 = vld [vmem:[#allocation9 + $0x4] sm:$0xf]  ;;  %v5205_v45 = vld [vmem:[#allocation9 + $0x1e0] sm:$0xf]  ;;  %v5744_v46 = vld [vmem:[#allocation9 + $0x1e8] sm:$0xf0] }
 0x187   :  { %2670 = vmatpush.bf16.msrb.mxu3 %v4706_v28  ;;  %2702 = vmatpush.bf16.msra.mxu1 %v4866_v30  ;;  %v5684_v28 = vld [vmem:[#allocation9 + $0x8] sm:$0xf0]  ;;  %v4970_v29 = vor.u32 %v5683_v25, %v4967_v26  ;;  %v5707_v17 = vld [vmem:[#allocation9 + $0xc4] sm:$0xf] }
 0x188   :  { %v4966_v33 = vor.u32 %v5684_v28, %v4965_v27  ;;  %v5703_v25 = vld [vmem:[#allocation9 + $0xa0] sm:$0xf0] }
 0x189   :  { %2664 = vmatpush.bf16.msrb.mxu2 %v4466_v38  ;;  %v2434_v4 = vpop.f32.mrf.mxu0  ;;  %v5701_v38 = vld [vmem:[#allocation9 + $0x94] sm:$0xf] }
 0x18b   :  { %2671 = vmatpush.bf16.msrb.mxu3 %v4690_v40  ;;  %2703 = vmatpush.bf16.msra.mxu1 %v4850_v41  ;;  %v6136_v61 = vpop.f32.mrf.mxu1  ;;  %v5039_v40 = vld [vmem:[#allocation9 + $0x9c] sm:$0xf0]  ;;  %v5122_v41 = vor.u32 %v5723_v36, %v5121_v35 }
 0x18c   :  { %2665 = vmatmul.bf16.vlgmr.msrb.gmra.mxu2 %v6095_v15  ;;  %v5001_v15 = vld [vmem:[#allocation9 + $0x48] sm:$0xf] }
 0x18d   :  { %3364 = vmatpush.bf16.msra.mxu2 %v5050_v44  ;;  %v5002_v6 = vor.u32 %v5693_v1, %v5001_v15  ;;  %v5042_v44 = vor.u32 %v5701_v38, %v5039_v40  ;;  %v5689_v1 = vld [vmem:[#allocation9 + $0x34] sm:$0xf]  ;;  %v5747_v38 = vld [vmem:[#allocation9 + $0x200] sm:$0xf0] }
 0x18e   :  { %2704 = vmatmul.bf16.vlgmr.msra.gmra.mxu1 %v6110_v11  ;;  %v4626_v11 = vor.u32 %v5596_v5, %v4623_v62  ;;  %v5073_v5 = vld [vmem:[#allocation9 + $0xd8] sm:$0xf]  ;;  %v5711_v62 = vld [vmem:[#allocation9 + $0xe0] sm:$0xf0] }
 0x18f   :  { %2672 = vmatpush.bf16.msrb.mxu3 %v4674_v47  ;;  %v5074_v3 = vor.u32 %v5711_v62, %v5073_v5 }
 0x191   :  { %3365 = vmatpush.bf16.msra.mxu2 %v5038_v50  ;;  %v6138_v14 = vpop.f32.mrf.mxu0  ;;  %v5717_v50 = vld [vmem:[#allocation9 + $0x110] sm:$0xf0] }
 0x192   :  { %v5098_v53 = vor.u32 %v5717_v50, %v5097_v49  ;;  %v5716_v49 = vld [vmem:[#allocation9 + $0x10c] sm:$0xf]  ;;  %v5099_v50 = vld [vmem:[#allocation9 + $0x114] sm:$0xf0] }
 0x193   :  { %2673 = vmatpush.bf16.msrb.mxu3 %v4658_v52  ;;  %v2447_v13 = vpop.f32.mrf.mxu1 }
 0x194   :  { %v5147_v13 = vld [vmem:[#allocation9 + $0x174] sm:$0xf0] }
 0x195   :  { %3366 = vmatpush.bf16.msra.mxu2 %v5026_v55  ;;  %v5714_v55 = vld [vmem:[#allocation9 + $0xf8] sm:$0xf0] }
 0x196   :  { %v5086_v4 = vor.u32 %v5714_v55, %v5085_v54  ;;  %v5193_v54 = vld [vmem:[#allocation9 + $0x1c8] sm:$0xf]  ;;  %v5741_v55 = vld [vmem:[#allocation9 + $0x1d0] sm:$0xf0] }
 0x197   :  { %2674 = vmatpush.bf16.msrb.mxu3 %v4642_v59  ;;  %v5003_v59 = vld [vmem:[#allocation9 + $0x54] sm:$0xf0] }
 0x199   :  { %3367 = vmatpush.bf16.msra.mxu2 %v5014_v0  ;;  %v2486_v30 = vpop.f32.mrf.mxu0  ;;  %v5006_v0 = vor.u32 %v5692_v58, %v5003_v59  ;;  %v5713_v59 = vld [vmem:[#allocation9 + $0xf4] sm:$0xf] }
 0x19a   :  { %v5750_v30 = vld [vmem:[#allocation9 + $0x218] sm:$0xf0] }
 0x19b   :  { %2675 = vmatpush.bf16.msrb.mxu3 %v4626_v11  ;;  %v6140_v31 = vpop.f32.mrf.mxu1  ;;  %v4991_v11 = vld [vmem:[#allocation9 + $0x3c] sm:$0xf0]  ;;  %v5230_v35 = vor.u32 %v5750_v30, %v5229_v60 }
 0x19c   :  { %v4994_v10 = vor.u32 %v5689_v1, %v4991_v11  ;;  %v5738_v1 = vld [vmem:[#allocation9 + $0x1b8] sm:$0xf0] }
 0x19d   :  { %3368 = vmatpush.bf16.msra.mxu2 %v5002_v6  ;;  %v5061_v6 = vld [vmem:[#allocation9 + $0xc0] sm:$0xf]  ;;  %v5710_v11 = vld [vmem:[#allocation9 + $0xdc] sm:$0xf] }
 0x19f   :  { %2676 = vmatpush.bf16.msrb.mxu3 %v4610_v12  ;;  %v5728_v12 = vld [vmem:[#allocation9 + $0x16c] sm:$0xf] }
 0x1a0   :  { %v5150_v19 = vor.u32 %v5728_v12, %v5147_v13  ;;  %v5169_v12 = vld [vmem:[#allocation9 + $0x198] sm:$0xf]  ;;  %v5735_v13 = vld [vmem:[#allocation9 + $0x1a0] sm:$0xf0] }
 0x1a1   :  { %3369 = vmatpush.bf16.msra.mxu2 %v4990_v18  ;;  %v5062_v18 = vor.u32 %v5708_v7, %v5061_v6  ;;  %v5057_v7 = vld [vmem:[#allocation9 + $0xb0] sm:$0xf] }
 0x1a3   :  { %2677 = vmatpush.bf16.msrb.mxu3 %v4594_v22  ;;  %v2499_v47 = vpop.f32.mrf.mxu1  ;;  %v5753_v22 = vld [vmem:[#allocation9 + $0x230] sm:$0xf0] }
 0x1a4   :  { %v5242_v27 = vor.u32 %v5753_v22, %v5241_v21  ;;  %v2433_v47 = vadd.f32 %v6132_v63, %v6128_v34  ;;  %v5194_v34 = vor.u32 %v5741_v55, %v5193_v54 }
 0x1a5   :  { %3370 = vmatpush.bf16.msra.mxu2 %v4978_v24  ;;  %v5135_v24 = vld [vmem:[#allocation9 + $0x15c] sm:$0xf0] }
 0x1a6   :  { %2678 = vmatmul.bf16.vlgmr.msrb.gmra.mxu3 %v6098_v39  ;;  %v5015_v39 = vld [vmem:[#allocation9 + $0x6c] sm:$0xf0]  ;;  %3390 = vmatpush.bf16.msrb.mxu0 %v5242_v27  ;;  %v5138_v28 = vor.u32 %v5725_v8, %v5135_v24  ;;  %v5157_v27 = vld [vmem:[#allocation9 + $0x180] sm:$0xf] }
 0x1a7   :  { %3377 = vmatpush.bf16.msra.mxu3 %v5146_v23  ;;  %v5018_v56 = vor.u32 %v5695_v51, %v5015_v39  ;;  %v2446_v39 = vadd.f32 %v6136_v61, %v2433_v47 }
 0x1a9   :  { %3371 = vmatpush.bf16.msra.mxu2 %v4966_v33  ;;  %v6143_v52 = vpop.f32.mrf.mxu0  ;;  %v5123_v33 = vld [vmem:[#allocation9 + $0x144] sm:$0xf0] }
 0x1aa   :  { %3391 = vmatpush.bf16.msrb.mxu0 %v5230_v35 }
 0x1ab   :  { %3378 = vmatpush.bf16.msra.mxu3 %v5134_v32  ;;  %v5722_v32 = vld [vmem:[#allocation9 + $0x13c] sm:$0xf] }
 0x1ac   :  { %v5126_v36 = vor.u32 %v5722_v32, %v5123_v33  ;;  %v5752_v32 = vld [vmem:[#allocation9 + $0x22c] sm:$0xf]  ;;  %v5243_v33 = vld [vmem:[#allocation9 + $0x234] sm:$0xf0] }
 0x1ad   :  { %3416 = vmatpush.bf16.msrb.mxu2 %v5054_v37  ;;  %v5217_v37 = vld [vmem:[#allocation9 + $0x1f8] sm:$0xf]  ;;  %v5246_v35 = vor.u32 %v5752_v32, %v5243_v33  ;;  %v5289_v32 = vld [vmem:[#allocation9 + $0x288] sm:$0xf]  ;;  %v5765_v33 = vld [vmem:[#allocation9 + $0x290] sm:$0xf0] }
 0x1ae   :  { %v5218_v43 = vor.u32 %v5747_v38, %v5217_v37  ;;  %v5337_v38 = vld [vmem:[#allocation9 + $0x2e8] sm:$0xf] }
 0x1af   :  { %3379 = vmatpush.bf16.msra.mxu3 %v5122_v41  ;;  %v6145_v15 = vpop.f32.mrf.mxu2  ;;  %v5719_v41 = vld [vmem:[#allocation9 + $0x124] sm:$0xf] }
 0x1b0   :  { %3392 = vmatpush.bf16.msrb.mxu0 %v5218_v43  ;;  %v5700_v43 = vld [vmem:[#allocation9 + $0x88] sm:$0xf0] }
 0x1b1   :  { %3417 = vmatpush.bf16.msrb.mxu2 %v5042_v44  ;;  %v2538_v2 = vpop.f32.mrf.mxu0  ;;  %v5114_v44 = vor.u32 %v5719_v41, %v5111_v42  ;;  %v5777_v41 = vld [vmem:[#allocation9 + $0x2f0] sm:$0xf0]  ;;  %v5033_v42 = vld [vmem:[#allocation9 + $0x80] sm:$0xf] }
 0x1b2   :  { %v5075_v2 = vld [vmem:[#allocation9 + $0xe4] sm:$0xf0] }
 0x1b3   :  { %3380 = vmatpush.bf16.msra.mxu3 %v5110_v48 }
 0x1b5   :  { %3418 = vmatpush.bf16.msrb.mxu2 %v5030_v57  ;;  %v5206_v57 = vor.u32 %v5744_v46, %v5205_v45  ;;  %v5749_v45 = vld [vmem:[#allocation9 + $0x214] sm:$0xf]  ;;  %v5231_v46 = vld [vmem:[#allocation9 + $0x21c] sm:$0xf0] }
 0x1b7   :  { %3381 = vmatpush.bf16.msra.mxu3 %v5098_v53  ;;  %v2460_v23 = vpop.f32.mrf.mxu2  ;;  %3393 = vmatpush.bf16.msrb.mxu0 %v5206_v57  ;;  %v5102_v53 = vor.u32 %v5716_v49, %v5099_v50  ;;  %v5234_v50 = vor.u32 %v5749_v45, %v5231_v46  ;;  %v5685_v46 = vld [vmem:[#allocation9 + $0x10] sm:$0xf0] }
 0x1b8   :  { %v5045_v23 = vld [vmem:[#allocation9 + $0x98] sm:$0xf] }
 0x1b9   :  { %3419 = vmatpush.bf16.msrb.mxu2 %v5018_v56  ;;  %v2459_v56 = vadd.f32 %v6145_v15, %v2446_v39  ;;  %v5706_v15 = vld [vmem:[#allocation9 + $0xb8] sm:$0xf0]  ;;  %v5046_v37 = vor.u32 %v5703_v25, %v5045_v23  ;;  %v5021_v39 = vld [vmem:[#allocation9 + $0x68] sm:$0xf]  ;;  %v4985_v25 = vld [vmem:[#allocation9 + $0x20] sm:$0xf] }
 0x1ba   :  { %v5058_v22 = vor.u32 %v5706_v15, %v5057_v7 }
 0x1bb   :  { %3382 = vmatpush.bf16.msra.mxu3 %v5086_v4  ;;  %v5087_v4 = vld [vmem:[#allocation9 + $0xfc] sm:$0xf0]  ;;  %3394 = vmatpush.bf16.msrb.mxu0 %v5194_v34 }
 0x1bc   :  { %v5090_v62 = vor.u32 %v5713_v59, %v5087_v4  ;;  %v5746_v59 = vld [vmem:[#allocation9 + $0x1fc] sm:$0xf] }
 0x1bd   :  { %3420 = vmatpush.bf16.msrb.mxu2 %v5006_v0  ;;  %v5181_v0 = vld [vmem:[#allocation9 + $0x1b0] sm:$0xf] }
 0x1bf   :  { %3383 = vmatpush.bf16.msra.mxu3 %v5074_v3  ;;  %v6147_v40 = vpop.f32.mrf.mxu2  ;;  %v5182_v3 = vor.u32 %v5738_v1, %v5181_v0  ;;  %v5313_v1 = vld [vmem:[#allocation9 + $0x2b8] sm:$0xf] }
 0x1c1   :  { %3421 = vmatpush.bf16.msrb.mxu2 %v4994_v10  ;;  %v6153_v51 = vpop.f32.mrf.mxu0  ;;  %3395 = vmatpush.bf16.msrb.mxu0 %v5182_v3  ;;  %v5078_v10 = vor.u32 %v5710_v11, %v5075_v2  ;;  %v5743_v11 = vld [vmem:[#allocation9 + $0x1e4] sm:$0xf]  ;;  %v5207_v2 = vld [vmem:[#allocation9 + $0x1ec] sm:$0xf0] }
 0x1c3   :  { %3384 = vmatpush.bf16.msra.mxu3 %v5062_v18  ;;  %v6151_v48 = vpop.f32.mrf.mxu1  ;;  %v5063_v18 = vld [vmem:[#allocation9 + $0xcc] sm:$0xf0] }
 0x1c4   :  { %v5066_v26 = vor.u32 %v5707_v17, %v5063_v18  ;;  %v5768_v17 = vld [vmem:[#allocation9 + $0x2a8] sm:$0xf0] }
 0x1c5   :  { %3422 = vmatpush.bf16.msrb.mxu2 %v4982_v20  ;;  %v5740_v18 = vld [vmem:[#allocation9 + $0x1cc] sm:$0xf] }
 0x1c7   :  { %3429 = vmatpush.bf16.msrb.mxu3 %v5150_v19  ;;  %v2512_v58 = vpop.f32.mrf.mxu2  ;;  %v5170_v19 = vor.u32 %v5735_v13, %v5169_v12  ;;  %v5153_v12 = vld [vmem:[#allocation9 + $0x170] sm:$0xf]  ;;  %v5730_v13 = vld [vmem:[#allocation9 + $0x178] sm:$0xf0] }
 0x1c8   :  { %v5774_v58 = vld [vmem:[#allocation9 + $0x2d8] sm:$0xf0]  ;;  %v5154_v23 = vor.u32 %v5730_v13, %v5153_v12  ;;  %v5339_v12 = vld [vmem:[#allocation9 + $0x2f4] sm:$0xf0] }
 0x1c9   :  { %3423 = vmatpush.bf16.msrb.mxu2 %v4970_v29  ;;  %v2471_v63 = vpop.f32.mrf.mxu3  ;;  %v2590_v6 = vpop.f32.mrf.mxu0  ;;  %3396 = vmatpush.bf16.msrb.mxu0 %v5170_v19  ;;  %v2485_v29 = vadd.f32 %v6138_v14, %v1430_v16  ;;  %v5338_v14 = vor.u32 %v5777_v41, %v5337_v38  ;;  %v5301_v16 = vld [vmem:[#allocation9 + $0x2a0] sm:$0xf]  ;;  %v5290_v38 = vor.u32 %v5765_v33, %v5289_v32 }
 0x1ca   :  { %v2472_v5 = vadd.f32 %v2471_v63, %v2459_v56  ;;  %v5325_v56 = vld [vmem:[#allocation9 + $0x2d0] sm:$0xf]  ;;  %v5210_v6 = vor.u32 %v5743_v11, %v5207_v2  ;;  %v5302_v19 = vor.u32 %v5768_v17, %v5301_v16  ;;  %v5183_v41 = vld [vmem:[#allocation9 + $0x1bc] sm:$0xf0]  ;;  %v5718_v2 = vld [vmem:[#allocation9 + $0x118] sm:$0xf0] }
 0x1cb   :  { %3430 = vmatpush.bf16.msrb.mxu3 %v5138_v28  ;;  %v2551_v61 = vpop.f32.mrf.mxu1  ;;  %v5732_v28 = vld [vmem:[#allocation9 + $0x188] sm:$0xf0]  ;;  %3403 = vmatpush.bf16.msrb.mxu1 %v5338_v14  ;;  %v5326_v4 = vor.u32 %v5774_v58, %v5325_v56 }
 0x1cc   :  { %5804 = vtanh.f32 %v2472_v5  ;;  %v5158_v30 = vor.u32 %v5732_v28, %v5157_v27  ;;  %v5009_v5 = vld [vmem:[#allocation9 + $0x50] sm:$0xf]  ;;  %v5771_v61 = vld [vmem:[#allocation9 + $0x2c0] sm:$0xf0]  ;;  %v5688_v28 = vld [vmem:[#allocation9 + $0x28] sm:$0xf0] }
 0x1ce   :  { %3397 = vmatpush.bf16.msrb.mxu0 %v5158_v30  ;;  %v5727_v30 = vld [vmem:[#allocation9 + $0x160] sm:$0xf0] }
 0x1cf   :  { %3431 = vmatpush.bf16.msrb.mxu3 %v5126_v36  ;;  %v6158_v20 = vpop.f32.mrf.mxu2  ;;  %v2498_v36 = vadd.f32 %v6140_v31, %v2485_v29  ;;  %v5034_v31 = vor.u32 %v5700_v43, %v5033_v42  ;;  %3404 = vmatpush.bf16.msrb.mxu1 %v5326_v4  ;;  %v5141_v29 = vld [vmem:[#allocation9 + $0x158] sm:$0xf]  ;;  %v4986_v43 = vor.u32 %v5688_v28, %v4985_v25  ;;  %v5721_v4 = vld [vmem:[#allocation9 + $0x130] sm:$0xf0]  ;;  %v5770_v28 = vld [vmem:[#allocation9 + $0x2bc] sm:$0xf] }
 0x1d0   :  { %v5142_v14 = vor.u32 %v5727_v30, %v5141_v29  ;;  %v5315_v29 = vld [vmem:[#allocation9 + $0x2c4] sm:$0xf0] }
 0x1d1   :  { %v2473_v8 = vpop.f32.mrf.mxu3  ;;  %v5318_v30 = vor.u32 %v5770_v28, %v5315_v29  ;;  %v5736_v28 = vld [vmem:[#allocation9 + $0x1a8] sm:$0xf0] }
 0x1d2   :  { %v5805_v21 = vpop.eup %5804  ;;  %3442 = vmatpush.bf16.msra.mxu0 %v5246_v35  ;;  %v5195_v8 = vld [vmem:[#allocation9 + $0x1d4] sm:$0xf0]  ;;  %v5737_v35 = vld [vmem:[#allocation9 + $0x1b4] sm:$0xf] }
 0x1d3   :  { %3432 = vmatpush.bf16.msrb.mxu3 %v5114_v44  ;;  %v6160_v24 = vpack.c.bf16 %v5805_v21, %v5805_v21  ;;  %v6163_v60 = vpop.f32.mrf.mxu1  ;;  %v2511_v44 = vadd.f32 %v6147_v40, %v2498_v36  ;;  %v5219_v40 = vld [vmem:[#allocation9 + $0x204] sm:$0xf0]  ;;  %v5186_v45 = vor.u32 %v5737_v35, %v5183_v41  ;;  %v5767_v41 = vld [vmem:[#allocation9 + $0x2a4] sm:$0xf] }
 0x1d4   :  { %v5222_v0 = vor.u32 %v5746_v59, %v5219_v40  ;;  %v5117_v59 = vld [vmem:[#allocation9 + $0x128] sm:$0xf]  ;;  %v5265_v40 = vld [vmem:[#allocation9 + $0x258] sm:$0xf] }
 0x1d5   :  { %3372 = vmatmul.bf16.vlgmr.msra.gmra.mxu2 %v6160_v24  ;;  %v5118_v11 = vor.u32 %v5721_v4, %v5117_v59  ;;  %v5069_v35 = vld [vmem:[#allocation9 + $0xc8] sm:$0xf] }
 0x1d6   :  { %3468 = vmatpush.bf16.msra.mxu2 %v5058_v22  ;;  %3443 = vmatpush.bf16.msra.mxu0 %v5234_v50  ;;  %v5277_v50 = vld [vmem:[#allocation9 + $0x270] sm:$0xf] }
 0x1d7   :  { %3433 = vmatpush.bf16.msrb.mxu3 %v5102_v53  ;;  %v2564_v47 = vpop.f32.mrf.mxu2  ;;  %v5697_v53 = vld [vmem:[#allocation9 + $0x70] sm:$0xf0] }
 0x1d8   :  { %v5022_v63 = vor.u32 %v5697_v53, %v5021_v39  ;;  %v5129_v47 = vld [vmem:[#allocation9 + $0x140] sm:$0xf]  ;;  %v5171_v53 = vld [vmem:[#allocation9 + $0x1a4] sm:$0xf0] }
 0x1d9   :  { %v2523_v49 = vpop.f32.mrf.mxu3 }
 0x1da   :  { %v2524_v57 = vadd.f32 %v2523_v49, %v2511_v44  ;;  %3469 = vmatpush.bf16.msra.mxu2 %v5046_v37  ;;  %3444 = vmatpush.bf16.msra.mxu0 %v5222_v0  ;;  %v4973_v44 = vld [vmem:[#allocation9 + $0x8] sm:$0xf]  ;;  %v5724_v49 = vld [vmem:[#allocation9 + $0x148] sm:$0xf0] }
 0x1db   :  { %3434 = vmatpush.bf16.msrb.mxu3 %v5090_v62  ;;  %v2603_v55 = vpop.f32.mrf.mxu1  ;;  %v5694_v62 = vld [vmem:[#allocation9 + $0x58] sm:$0xf0]  ;;  %v5130_v56 = vor.u32 %v5724_v49, %v5129_v47 }
 0x1dc   :  { %v2537_v54 = vadd.f32 %v6143_v52, %v2524_v57  ;;  %v5314_v52 = vor.u32 %v5771_v61, %v5313_v1  ;;  %v5010_v15 = vor.u32 %v5694_v62, %v5009_v5  ;;  %v5762_v57 = vld [vmem:[#allocation9 + $0x278] sm:$0xf0]  ;;  %v4974_v55 = vor.u32 %v5685_v46, %v4973_v44  ;;  %v5159_v1 = vld [vmem:[#allocation9 + $0x18c] sm:$0xf0]  ;;  %v5291_v46 = vld [vmem:[#allocation9 + $0x294] sm:$0xf0] }
 0x1dd   :  { %v5278_v39 = vor.u32 %v5762_v57, %v5277_v50  ;;  %v1431_v61 = vperm.slane %v6121_v9, 2  ;;  %v5093_v9 = vld [vmem:[#allocation9 + $0xf8] sm:$0xf] }
 0x1de   :  { %v2550_v34 = vadd.f32 %v6151_v48, %v2537_v54  ;;  %3470 = vmatpush.bf16.msra.mxu2 %v5034_v31  ;;  %v4997_v48 = vld [vmem:[#allocation9 + $0x38] sm:$0xf]  ;;  %3405 = vmatpush.bf16.msrb.mxu1 %v5314_v52  ;;  %v5734_v31 = vld [vmem:[#allocation9 + $0x19c] sm:$0xf]  ;;  %v5105_v52 = vld [vmem:[#allocation9 + $0x110] sm:$0xf] }
 0x1df   :  { %3435 = vmatpush.bf16.msrb.mxu3 %v5078_v10  ;;  %v5691_v10 = vld [vmem:[#allocation9 + $0x40] sm:$0xf0]  ;;  %3445 = vmatpush.bf16.msra.mxu0 %v5210_v6  ;;  %v5174_v58 = vor.u32 %v5734_v31, %v5171_v53  ;;  %v5253_v6 = vld [vmem:[#allocation9 + $0x240] sm:$0xf]  ;;  %v5106_v17 = vor.u32 %v5718_v2, %v5105_v52 }
 0x1e0   :  { %5806 = vtanh.f32 %v2550_v34  ;;  %v4998_v22 = vor.u32 %v5691_v10, %v4997_v48  ;;  %v5759_v34 = vld [vmem:[#allocation9 + $0x260] sm:$0xf0]  ;;  %v5776_v48 = vld [vmem:[#allocation9 + $0x2ec] sm:$0xf]  ;;  %v5279_v31 = vld [vmem:[#allocation9 + $0x27c] sm:$0xf0] }
 0x1e1   :  { %v2525_v3 = vpop.f32.mrf.mxu3  ;;  %v6170_v7 = vpop.f32.mrf.mxu0  ;;  %v5266_v0 = vor.u32 %v5759_v34, %v5265_v40  ;;  %v5342_v13 = vor.u32 %v5776_v48, %v5339_v12  ;;  %v5225_v2 = vld [vmem:[#allocation9 + $0x200] sm:$0xf]  ;;  %v5745_v48 = vld [vmem:[#allocation9 + $0x1f0] sm:$0xf0] }
 0x1e2   :  { %3471 = vmatpush.bf16.msra.mxu2 %v5022_v63  ;;  %3406 = vmatpush.bf16.msrb.mxu1 %v5302_v19  ;;  %v5731_v63 = vld [vmem:[#allocation9 + $0x184] sm:$0xf] }
 0x1e3   :  { %3436 = vmatpush.bf16.msrb.mxu3 %v5066_v26  ;;  %v5198_v26 = vor.u32 %v5740_v18, %v5195_v8  ;;  %v5162_v3 = vor.u32 %v5731_v63, %v5159_v1  ;;  %v2563_v18 = vadd.f32 %v6158_v20, %v1431_v61  ;;  %v5715_v19 = vld [vmem:[#allocation9 + $0x100] sm:$0xf0]  ;;  %v5773_v8 = vld [vmem:[#allocation9 + $0x2d4] sm:$0xf] }
 0x1e4   :  { %v5094_v25 = vor.u32 %v5715_v19, %v5093_v9  ;;  %v5755_v1 = vld [vmem:[#allocation9 + $0x244] sm:$0xf] }
 0x1e5   :  { %3424 = vmatmul.bf16.vlgmr.msrb.gmra.mxu2 %v6160_v24  ;;  %3446 = vmatpush.bf16.msra.mxu0 %v5198_v26  ;;  %v5712_v26 = vld [vmem:[#allocation9 + $0xe8] sm:$0xf0] }
 0x1e6   :  { %v5807_v21 = vpop.eup %5806  ;;  %3472 = vmatpush.bf16.msra.mxu2 %v5010_v15  ;;  %3407 = vmatpush.bf16.msrb.mxu1 %v5290_v38  ;;  %v5756_v15 = vld [vmem:[#allocation9 + $0x248] sm:$0xf0]  ;;  %v5709_v38 = vld [vmem:[#allocation9 + $0xd0] sm:$0xf0] }
 0x1e7   :  { %v6173_v27 = vpack.c.bf16 %v5807_v21, %v5807_v21  ;;  %v5254_v10 = vor.u32 %v5756_v15, %v5253_v6  ;;  %v5327_v21 = vld [vmem:[#allocation9 + $0x2dc] sm:$0xf0]  ;;  %v5213_v15 = vld [vmem:[#allocation9 + $0x1e8] sm:$0xf] }
 0x1e9   :  { %v6177_v37 = vpop.f32.mrf.mxu3  ;;  %3385 = vmatmul.bf16.vlgmr.msra.gmra.mxu3 %v6173_v27  ;;  %v2642_v42 = vpop.f32.mrf.mxu0  ;;  %3447 = vmatpush.bf16.msra.mxu0 %v5186_v45  ;;  %v5764_v45 = vld [vmem:[#allocation9 + $0x28c] sm:$0xf] }
 0x1ea   :  { %3473 = vmatpush.bf16.msra.mxu2 %v4998_v22  ;;  %3481 = vmatpush.bf16.msra.mxu3 %v5154_v23  ;;  %v5330_v22 = vor.u32 %v5773_v8, %v5327_v21  ;;  %v2576_v23 = vadd.f32 %v6177_v37, %v2563_v18  ;;  %v5303_v42 = vld [vmem:[#allocation9 + $0x2ac] sm:$0xf0]  ;;  %v5294_v49 = vor.u32 %v5764_v45, %v5291_v46  ;;  %v5189_v8 = vld [vmem:[#allocation9 + $0x1b8] sm:$0xf]  ;;  %v5739_v21 = vld [vmem:[#allocation9 + $0x1c0] sm:$0xf0] }
 0x1eb   :  { %v6175_v36 = vpop.f32.mrf.mxu1  ;;  %3408 = vmatpush.bf16.msrb.mxu1 %v5278_v39  ;;  %v5321_v45 = vld [vmem:[#allocation9 + $0x2c0] sm:$0xf]  ;;  %v5772_v46 = vld [vmem:[#allocation9 + $0x2c8] sm:$0xf0] }
 0x1ec   :  { %v2589_v20 = vadd.f32 %v6153_v51, %v2576_v23 }
 0x1ed   :  { %3448 = vmatpush.bf16.msra.mxu0 %v5174_v58  ;;  %v5267_v58 = vld [vmem:[#allocation9 + $0x264] sm:$0xf0] }
 0x1ee   :  { %3474 = vmatpush.bf16.msra.mxu2 %v4986_v43  ;;  %3482 = vmatpush.bf16.msra.mxu3 %v5142_v14  ;;  %v2602_v37 = vadd.f32 %v6163_v60, %v2589_v20  ;;  %v5070_v43 = vor.u32 %v5709_v38, %v5069_v35  ;;  %v5306_v14 = vor.u32 %v5767_v41, %v5303_v42  ;;  %v5761_v60 = vld [vmem:[#allocation9 + $0x274] sm:$0xf]  ;;  %v5165_v20 = vld [vmem:[#allocation9 + $0x188] sm:$0xf]  ;;  %v5345_v38 = vld [vmem:[#allocation9 + $0x2f0] sm:$0xf] }
 0x1ef   :  { %v6180_v54 = vpop.f32.mrf.mxu2  ;;  %3409 = vmatpush.bf16.msrb.mxu1 %v5266_v0  ;;  %v5282_v39 = vor.u32 %v5761_v60, %v5279_v31  ;;  %v5751_v0 = vld [vmem:[#allocation9 + $0x220] sm:$0xf0]  ;;  %v5766_v60 = vld [vmem:[#allocation9 + $0x298] sm:$0xf0] }
 0x1f0   :  { %v2615_v44 = vadd.f32 %v6180_v54, %v2602_v37  ;;  %v5758_v54 = vld [vmem:[#allocation9 + $0x25c] sm:$0xf] }
 0x1f1   :  { %v2577_v62 = vpop.f32.mrf.mxu3  ;;  %3449 = vmatpush.bf16.msra.mxu0 %v5162_v3  ;;  %v5270_v40 = vor.u32 %v5758_v54, %v5267_v58  ;;  %v5748_v3 = vld [vmem:[#allocation9 + $0x208] sm:$0xf0]  ;;  %v5778_v37 = vld [vmem:[#allocation9 + $0x2f8] sm:$0xf0] }
 0x1f2   :  { %3475 = vmatpush.bf16.msra.mxu2 %v4974_v55  ;;  %3483 = vmatpush.bf16.msra.mxu3 %v5130_v56  ;;  %v5249_v55 = vld [vmem:[#allocation9 + $0x230] sm:$0xf]  ;;  %v5754_v56 = vld [vmem:[#allocation9 + $0x238] sm:$0xf0]  ;;  %v5237_v62 = vld [vmem:[#allocation9 + $0x218] sm:$0xf]  ;;  %v5226_v6 = vor.u32 %v5748_v3, %v5225_v2  ;;  %v5346_v42 = vor.u32 %v5778_v37, %v5345_v38 }
 0x1f3   :  { %v2655_v5 = vpop.f32.mrf.mxu1  ;;  %3410 = vmatpush.bf16.msrb.mxu1 %v5254_v10  ;;  %v5250_v63 = vor.u32 %v5754_v56, %v5249_v55  ;;  %v5238_v52 = vor.u32 %v5751_v0, %v5237_v62  ;;  %v5812_v10 = vld [vmem:[#allocation11 + $0x1] ss:$4 sm:$0xf] }
 0x1f4   :  { %v1432_v12 = vperm.slane %v5812_v10, 3  ;;  %v5273_v56 = vld [vmem:[#allocation9 + $0x260] sm:$0xf]  ;;  %v5760_v54 = vld [vmem:[#allocation9 + $0x268] sm:$0xf0] }
 0x1f5   :  { %3476 = vmatmul.bf16.vlgmr.msra.gmra.mxu2 %v6160_v24  ;;  %v5081_v24 = vld [vmem:[#allocation9 + $0xe0] sm:$0xf]  ;;  %v5274_v58 = vor.u32 %v5760_v54, %v5273_v56 }
 0x1f6   :  { %3484 = vmatpush.bf16.msra.mxu3 %v5118_v11  ;;  %v5082_v32 = vor.u32 %v5712_v26, %v5081_v24  ;;  %v2641_v9 = vadd.f32 %v6170_v7, %v1432_v12  ;;  %v5177_v26 = vld [vmem:[#allocation9 + $0x1a0] sm:$0xf] }
 0x1f7   :  { %v2616_v16 = vpop.f32.mrf.mxu2  ;;  %3455 = vmatpush.bf16.msra.mxu1 %v5342_v13  ;;  %v5214_v13 = vor.u32 %v5745_v48, %v5213_v15 }
 0x1f8   :  { %v5201_v16 = vld [vmem:[#allocation9 + $0x1d0] sm:$0xf]  ;;  %v2654_v19 = vadd.f32 %v6175_v36, %v2641_v9 }
 0x1f9   :  { %3437 = vmatmul.bf16.vlgmr.msrb.gmra.mxu3 %v6173_v27 }
 0x1fa   :  { %3485 = vmatpush.bf16.msra.mxu3 %v5106_v17  ;;  %v5742_v17 = vld [vmem:[#allocation9 + $0x1d8] sm:$0xf0] }
 0x1fb   :  { %3456 = vmatpush.bf16.msra.mxu1 %v5330_v22  ;;  %v5202_v18 = vor.u32 %v5742_v17, %v5201_v16 }
 0x1fe   :  { %3486 = vmatpush.bf16.msra.mxu3 %v5094_v25  ;;  %v5190_v25 = vor.u32 %v5739_v21, %v5189_v8 }
 0x1ff   :  { %3457 = vmatpush.bf16.msra.mxu1 %v5318_v30  ;;  %v5178_v30 = vor.u32 %v5736_v28, %v5177_v26 }
 0x201   :  { %v6188_v33 = vpop.f32.mrf.mxu0 }
 0x202   :  { %3487 = vmatpush.bf16.msra.mxu3 %v5082_v32  ;;  %v5733_v32 = vld [vmem:[#allocation9 + $0x190] sm:$0xf0] }
 0x203   :  { %3458 = vmatpush.bf16.msra.mxu1 %v5306_v14  ;;  %v5166_v35 = vor.u32 %v5733_v32, %v5165_v20  ;;  %v5333_v14 = vld [vmem:[#allocation9 + $0x2d8] sm:$0xf] }
 0x206   :  { %3488 = vmatpush.bf16.msra.mxu3 %v5070_v43 }
 0x207   :  { %3459 = vmatpush.bf16.msra.mxu1 %v5294_v49  ;;  %v5769_v49 = vld [vmem:[#allocation9 + $0x2b0] sm:$0xf0] }
 0x209   :  { %v2627_v51 = vpop.f32.mrf.mxu3  ;;  %v2694_v57 = vpop.f32.mrf.mxu0  ;;  %3489 = vmatmul.bf16.vlgmr.msra.gmra.mxu3 %v6173_v27  ;;  %v5255_v27 = vld [vmem:[#allocation9 + $0x24c] sm:$0xf0] }
 0x20a   :  { %v2628_v50 = vadd.f32 %v2627_v51, %v2615_v44  ;;  %v5258_v61 = vor.u32 %v5755_v1, %v5255_v27  ;;  %v5775_v44 = vld [vmem:[#allocation9 + $0x2e0] sm:$0xf0]  ;;  %v5322_v51 = vor.u32 %v5772_v46, %v5321_v45  ;;  %v5297_v57 = vld [vmem:[#allocation9 + $0x290] sm:$0xf] }
 0x20b   :  { %v6192_v47 = vpop.f32.mrf.mxu1  ;;  %3460 = vmatpush.bf16.msra.mxu1 %v5282_v39  ;;  %v5298_v31 = vor.u32 %v5766_v60, %v5297_v57  ;;  %v5285_v39 = vld [vmem:[#allocation9 + $0x278] sm:$0xf] }
 0x20c   :  { %5808 = vtanh.f32 %v2628_v50 }
 0x20f   :  { %v2666_v53 = vpop.f32.mrf.mxu2  ;;  %3461 = vmatpush.bf16.msra.mxu1 %v5270_v40 }
 0x210   :  { %v2667_v22 = vadd.f32 %v2666_v53, %v2654_v19  ;;  %v5763_v53 = vld [vmem:[#allocation9 + $0x280] sm:$0xf0] }
 0x211   :  { %v2629_v59 = vpop.f32.mrf.mxu3  ;;  %v5286_v55 = vor.u32 %v5763_v53, %v5285_v39 }
 0x212   :  { %v5809_v34 = vpop.eup %5808  ;;  %v5261_v59 = vld [vmem:[#allocation9 + $0x248] sm:$0xf] }
 0x213   :  { %v2707_v4 = vpop.f32.mrf.mxu1  ;;  %v2715_v5 = vpack.c.bf16 %v5809_v34, %v5809_v34  ;;  %3462 = vmatpush.bf16.msra.mxu1 %v5258_v61 }
 0x214   :  { %v5757_v4 = vld [vmem:[#allocation9 + $0x250] sm:$0xf0] }
 0x215   :  { %3398 = vmatmul.bf16.vlgmr.msrb.gmra.mxu0 %v2715_v5  ;;  %v5262_v40 = vor.u32 %v5757_v4, %v5261_v59 }
 0x216   :  { %3494 = vmatpush.bf16.msrb.mxu0 %v5250_v63 }
 0x217   :  { %v2668_v11 = vpop.f32.mrf.mxu2 }
 0x21a   :  { %3495 = vmatpush.bf16.msrb.mxu0 %v5238_v52 }
 0x21e   :  { %3496 = vmatpush.bf16.msrb.mxu0 %v5226_v6 }
 0x222   :  { %3497 = vmatpush.bf16.msrb.mxu0 %v5214_v13 }
 0x225   :  { %3450 = vmatmul.bf16.vlgmr.msra.gmra.mxu0 %v2715_v5 }
 0x226   :  { %3498 = vmatpush.bf16.msrb.mxu0 %v5202_v18 }
 0x229   :  { %v2679_v23 = vpop.f32.mrf.mxu3 }
 0x22a   :  { %v2680_v24 = vadd.f32 %v2679_v23, %v2667_v22  ;;  %3499 = vmatpush.bf16.msrb.mxu0 %v5190_v25  ;;  %v3521_v23 = vlaneseq }
 0x22c   :  { %v2693_v29 = vadd.f32 %v6188_v33, %v2680_v24  ;;  %v5334_v33 = vor.u32 %v5775_v44, %v5333_v14  ;;  %v3522_v25 = vshrl.u32 %v3521_v23, 7  ;;  %v3526_v24 = vstv %s6224_s0  ;;  %s6002_s0 = smov [#allocation12]  }
 0x22d   :  { %s3589_s29 = sshll.u32 %s6002_s0, 4  ;;  %s3590_s29 = int_to_ptr.vmem [resolvable:$true] %s3589_s29 }
 0x22e   :  { %v2706_v7 = vadd.f32 %v6192_v47, %v2693_v29  ;;  %3500 = vmatpush.bf16.msrb.mxu0 %v5178_v30  ;;  %v5309_v47 = vld [vmem:[#allocation9 + $0x2a8] sm:$0xf]  ;;  %vm6202_vm0 = vcmp.lt.s32.totalorder %v3522_v25, %v3526_v24 }
 0x22f   :  { %v5310_v50 = vor.u32 %v5769_v49, %v5309_v47 }
 0x230   :  { %5810 = vtanh.f32 %v2706_v7 }
 0x231   :  { %v2681_v36 = vpop.f32.mrf.mxu3 }
 0x232   :  { %3501 = vmatpush.bf16.msrb.mxu0 %v5166_v35 }
 0x235   :  { %3502 = vmatmul.bf16.vlgmr.msrb.gmra.mxu0 %v2715_v5  ;;  %v112_v5 = vld [vmem:[#allocation11 + $0x2] ss:$4 sm:$0x7] }
 0x236   :  { %v5811_v41 = vpop.eup %5810  ;;  %v2846_v62 = vperm.slane %v112_v5, 0  ;;  %v2847_v2 = vperm.slane %v112_v5, 1  ;;  %v2848_v13 = vperm.slane %v112_v5, 2 }
 0x237   :  { %v2716_v43 = vpack.c.bf16 %v5811_v41, %v5811_v41 }
 0x239   :  { %3411 = vmatmul.bf16.vlgmr.msrb.gmra.mxu1 %v2716_v43 }
 0x23a   :  { %3507 = vmatpush.bf16.msrb.mxu1 %v5346_v42 }
 0x23e   :  { %3508 = vmatpush.bf16.msrb.mxu1 %v5334_v33 }
 0x242   :  { %3509 = vmatpush.bf16.msrb.mxu1 %v5322_v51 }
 0x246   :  { %3510 = vmatpush.bf16.msrb.mxu1 %v5310_v50 }
 0x249   :  { %3463 = vmatmul.bf16.vlgmr.msra.gmra.mxu1 %v2716_v43 }
 0x24a   :  { %3511 = vmatpush.bf16.msrb.mxu1 %v5298_v31 }
 0x24e   :  { %3512 = vmatpush.bf16.msrb.mxu1 %v5286_v55 }
 0x252   :  { %3513 = vmatpush.bf16.msrb.mxu1 %v5274_v58 }
 0x256   :  { %3514 = vmatpush.bf16.msrb.mxu1 %v5262_v40 }
 0x258   :  { %v3373_v34 = vpop.f32.mrf.mxu2 }
 0x259   :  { %3515 = vmatmul.bf16.vlgmr.msrb.gmra.mxu1 %v2716_v43  ;;  %v3374_v1 = vadd.f32 %v3373_v34, %v2846_v62 }
 0x260   :  { %v3375_v63 = vpop.f32.mrf.mxu2 }
 0x268   :  { %v3425_v0 = vpop.f32.mrf.mxu2 }
 0x269   :  { %v3426_v6 = vadd.f32 %v3425_v0, %v2847_v2 }
 0x26c   :  { %v3386_v27 = vpop.f32.mrf.mxu3 }
 0x26d   :  { %v3387_v61 = vadd.f32 %v3386_v27, %v3374_v1 }
 0x270   :  { %v3427_v11 = vpop.f32.mrf.mxu2 }
 0x274   :  { %v3388_v52 = vpop.f32.mrf.mxu3 }
 0x278   :  { %v3477_v3 = vpop.f32.mrf.mxu2 }
 0x279   :  { %v3478_v16 = vadd.f32 %v3477_v3, %v2848_v13 }
 0x27c   :  { %v3438_v15 = vpop.f32.mrf.mxu3 }
 0x27d   :  { %v3439_v48 = vadd.f32 %v3438_v15, %v3426_v6 }
 0x280   :  { %v3479_v10 = vpop.f32.mrf.mxu2 }
 0x284   :  { %v3440_v12 = vpop.f32.mrf.mxu3 }
 0x28c   :  { %v3490_v17 = vpop.f32.mrf.mxu3 }
 0x28d   :  { %v3491_v9 = vadd.f32 %v3490_v17, %v3478_v16 }
 0x292   :  { %v3399_v18 = vpop.f32.mrf.mxu0 }
 0x293   :  { %v3400_v26 = vadd.f32 %v3399_v18, %v3387_v61 }
 0x294   :  { %v3492_v19 = vpop.f32.mrf.mxu3 }
 0x29a   :  { %v3401_v8 = vpop.f32.mrf.mxu0 }
 0x2a2   :  { %v3451_v21 = vpop.f32.mrf.mxu0 }
 0x2a3   :  { %v3452_v51 = vadd.f32 %v3451_v21, %v3439_v48 }
 0x2aa   :  { %v3453_v22 = vpop.f32.mrf.mxu0 }
 0x2b2   :  { %v3503_v28 = vpop.f32.mrf.mxu0 }
 0x2b3   :  { %v3504_v0 = vadd.f32 %v3503_v28, %v3491_v9 }
 0x2b6   :  { %v3412_v29 = vpop.f32.mrf.mxu1 }
 0x2b7   :  { %v3413_v7 = vadd.f32 %v3412_v29, %v3400_v26 }
 0x2b9   :  { %v3528_v20 = vsel %vm6202_vm0, %v3413_v7, 0.0 }
 0x2ba   :  { %3531 = vst [vmem:[#allocation12] sm:$0xff] %v3528_v20  ;;  %v3534_v32 = vrot.slane %v3528_v20, 4  ;;  %v3552_v36 = vmul.f32 %v3528_v20, %v3528_v20  ;;  %v3505_v37 = vpop.f32.mrf.mxu0 }
 0x2bc   :  { %v3535_v35 = vadd.f32 %v3534_v32, %v3528_v20  ;;  %v3555_v38 = vrot.slane %v3552_v36, 4 }
 0x2be   :  { %v3536_v41 = vrot.slane %v3535_v35, 2  ;;  %v3556_v42 = vadd.f32 %v3555_v38, %v3552_v36  ;;  %v3414_v43 = vpop.f32.mrf.mxu1 }
 0x2c0   :  { %v3537_v14 = vadd.f32 %v3536_v41, %v3535_v35  ;;  %v3557_v44 = vrot.slane %v3556_v42, 2 }
 0x2c2   :  { %v3538_v33 = vrot.slane %v3537_v14, 1  ;;  %v3558_v45 = vadd.f32 %v3557_v44, %v3556_v42 }
 0x2c4   :  { %v3559_v46 = vrot.slane %v3558_v45, 1  ;;  %v3539_v47 = vadd.f32 %v3538_v33, %v3537_v14 }
 0x2c6   :  { %v3560_v49 = vadd.f32 %v3559_v46, %v3558_v45  ;;  %v3464_v50 = vpop.f32.mrf.mxu1 }
 0x2c7   :  { %v3465_v57 = vadd.f32 %v3464_v50, %v3452_v51 }
 0x2c8   :  { %v3574_v60 = vsel %vm3573_vm1, %v3539_v47, %v3560_v49 }
 0x2c9   :  { %v3529_v31 = vsel %vm6202_vm0, %v3465_v57, 0.0  ;;  %v3578_v39 = vsel %vm3577_vm2, %v3574_v60, 0.0 }
 0x2ca   :  { %3532 = vst [vmem:[#allocation12 + $0x8] sm:$0xff] %v3529_v31  ;;  %v3540_v53 = vrot.slane %v3529_v31, 4  ;;  %v3553_v55 = vmul.f32 %v3529_v31, %v3529_v31 }
 0x2cb   :  { %3581 = vst [vmem:[#allocation13] sm:$0xff] %v3578_v39 }
 0x2cc   :  { %v3541_v56 = vadd.f32 %v3540_v53, %v3529_v31  ;;  %v3561_v54 = vrot.slane %v3553_v55, 4 }
 0x2ce   :  { %v3542_v58 = vrot.slane %v3541_v56, 2  ;;  %v3562_v59 = vadd.f32 %v3561_v54, %v3553_v55  ;;  %v3466_v4 = vpop.f32.mrf.mxu1 }
 0x2d0   :  { %v3543_v40 = vadd.f32 %v3542_v58, %v3541_v56  ;;  %v3563_v34 = vrot.slane %v3562_v59, 2 }
 0x2d2   :  { %v3544_v63 = vrot.slane %v3543_v40, 1  ;;  %v3564_v5 = vadd.f32 %v3563_v34, %v3562_v59 }
 0x2d4   :  { %v3565_v62 = vrot.slane %v3564_v5, 1  ;;  %v3545_v1 = vadd.f32 %v3544_v63, %v3543_v40 }
 0x2d6   :  { %v3566_v27 = vadd.f32 %v3565_v62, %v3564_v5  ;;  %v3516_v61 = vpop.f32.mrf.mxu1 }
 0x2d7   :  { %v3517_v11 = vadd.f32 %v3516_v61, %v3504_v0 }
 0x2d8   :  { %v3575_v52 = vsel %vm3573_vm1, %v3545_v1, %v3566_v27 }
 0x2d9   :  { %v3530_v2 = vsel %vm6202_vm0, %v3517_v11, 0.0  ;;  %v3579_v3 = vsel %vm3577_vm2, %v3575_v52, 0.0 }
 0x2da   :  { %3533 = vst [vmem:[#allocation12 + $0x10] sm:$0xff] %v3530_v2  ;;  %v3546_v6 = vrot.slane %v3530_v2, 4  ;;  %v3554_v15 = vmul.f32 %v3530_v2, %v3530_v2 }
 0x2db   :  { %3594 = dma.vmem_to_hbm [thread:$0]  %s3590_s29, 384, %s3592_s9, [#allocation5]   ;;  %3582 = vst [vmem:[#allocation13 + $0x8] sm:$0xff] %v3579_v3 }
 0x2dc   :  { %v3547_v48 = vadd.f32 %v3546_v6, %v3530_v2  ;;  %v3567_v10 = vrot.slane %v3554_v15, 4 }
 0x2de   :  { %v3548_v12 = vrot.slane %v3547_v48, 2  ;;  %v3568_v13 = vadd.f32 %v3567_v10, %v3554_v15  ;;  %v3518_v16 = vpop.f32.mrf.mxu1 }
 0x2e0   :  { %v3549_v17 = vadd.f32 %v3548_v12, %v3547_v48  ;;  %v3569_v9 = vrot.slane %v3568_v13, 2 }
 0x2e2   :  { %v3550_v18 = vrot.slane %v3549_v17, 1  ;;  %v3570_v19 = vadd.f32 %v3569_v9, %v3568_v13 }
 0x2e4   :  { %v3571_v8 = vrot.slane %v3570_v19, 1  ;;  %v3551_v21 = vadd.f32 %v3550_v18, %v3549_v17 }
 0x2e6   :  { %v3572_v22 = vadd.f32 %v3571_v8, %v3570_v19 }
 0x2e8   :  { %v3576_v23 = vsel %vm3573_vm1, %v3551_v21, %v3572_v22 }
 0x2e9   :  { %v3580_v25 = vsel %vm3577_vm2, %v3576_v23, 0.0 }
 0x2ea   :  { %3583 = vst [vmem:[#allocation13 + $0x10] sm:$0xff] %v3580_v25 }
 0x2eb   :  { %3605 = dma.vmem_to_hbm [thread:$0]  %s3601_s10, 384, %s3603_s13, [#allocation14]  }
 0x2ec   :  { %5987 = dma.done.wait [#allocation5], 384  }
 0x2ed   :  { %5988 = vsyncadd [#allocation5], 4294966912 }
 0x2ee   :  { %5989 = dma.done.wait [#allocation14], 384  }
 0x2ef   :  { %5990 = vsyncadd [#allocation14], 4294966912 }
 0x2f0   :  { %3614 = vsyncpa [#allocation4], 1 }
 0x2f1   :  { %3615 = vsyncpa [#allocation7], 1 }
 0x2f2   :  { %3616 = vsyncpa [#allocation10], 1 }
 0x2f3   :  { %3617 = vsyncpa [#allocation5], 1 }
 0x2f4   :  { %3618 = vsyncpa [#allocation14], 1 }

</bundles_post_ra>
